<compile_context>
chip_gen: v5e
topology: v5e:2x2
jax: 0.10.0
libtpu: 0.0.40
codegen_flags: <defaults>
</compile_context>

<pallas_src>
import functools

import jax
import jax.numpy as jnp
from jax.experimental import pallas as pl
from jax.experimental.pallas import tpu as pltpu

NEG_SLOPE = 0.01  # PyTorch default negative slope for F.leaky_relu


# ------------------------------ fc kernel ------------------------------------
def _fc_kernel(h_ref, w_ref, b_ref, o_ref):
    acc = jnp.dot(h_ref[...], w_ref[...], preferred_element_type=jnp.float32)
    acc = acc + b_ref[...]
    acc = jnp.where(acc > 0, acc, NEG_SLOPE * acc)
    o_ref[...] = acc.astype(o_ref.dtype)


def fc_forward(h_bf16, w_bf16, b_f32, *, tile_n=2048, tile_m=256):
    """y = leaky_relu(h @ w + b), bf16 MXU inputs, f32 epilogue, bf16 output."""
    B, K = h_bf16.shape
    N = w_bf16.shape[1]
    tn = N if N <= tile_n else tile_n      # tile_n is a multiple of 128
    tm = B if B <= tile_m else tile_m
    grid = (pl.cdiv(B, tm), pl.cdiv(N, tn))
    return pl.pallas_call(
        _fc_kernel,
        out_shape=jax.ShapeDtypeStruct((B, N), jnp.bfloat16),
        grid=grid,
        in_specs=[
            pl.BlockSpec((tm, K), lambda i, j: (i, 0)),
            pl.BlockSpec((K, tn), lambda i, j: (0, j)),
            pl.BlockSpec((1, tn), lambda i, j: (0, j)),
        ],
        out_specs=pl.BlockSpec((tm, tn), lambda i, j: (i, j)),
        compiler_params=pltpu.CompilerParams(
            dimension_semantics=("parallel", "parallel")),
    )(h_bf16, w_bf16, b_f32)


# ------------------- fused stride-1 ConvTranspose kernel ----------------------
# Input : (B, Cin, (hin+5)*(hin+4)) bf16  -- image padded by 2 (plus 1 spare
#         zero row of slice head-room), flattened row-major.
# Output: (B, Cout, (hout+2*pad_next+1)*(hout+2*pad_next)) bf16 -- the valid
#         (hout x hout) result already embedded in the zero-padded flat layout
#         required by the *next* conv stage.
def _deconv_s1_kernel(x_ref, w_ref, b_ref, mask_ref, o_ref, *, hin, cout, pad_next):
    wp_in = hin + 4
    hout = hin + 2
    wp_out = hout + 2 * pad_next
    L = hout * wp_in                      # "wide" output (2 garbage cols / row)

    x = x_ref[0]                          # (cin, in_len) bf16, resident in VMEM
    acc = jnp.zeros((cout, L), jnp.float32)
    for kh in range(3):                   # fused im2col: 9 shifted lane-slices
        for kw in range(3):
            off = kh * wp_in + kw
            acc = acc + jnp.dot(w_ref[kh, kw], x[:, off:off + L],
                                preferred_element_type=jnp.float32)
    acc = acc + b_ref[...]
    acc = jnp.where(acc > 0, acc, NEG_SLOPE * acc)
    acc = acc * mask_ref[...]             # zero the wrap-around garbage columns

    o_ref[...] = jnp.zeros_like(o_ref)    # pad borders of the next stage
    out = acc.astype(o_ref.dtype)
    if wp_out == wp_in:                   # next stage is the stride-2 deconv
        start = pad_next * wp_out + pad_next
        o_ref[0, :, start:start + L] = out
    else:                                 # next stage is another stride-1 deconv
        for i in range(hout):
            row = out[:, i * wp_in:i * wp_in + hout]
            start = (i + pad_next) * wp_out + pad_next
            o_ref[0, :, start:start + hout] = row


def deconv_s1(x, w, b, *, hin, pad_next):
    B, cin, in_len = x.shape
    cout = w.shape[2]
    wp_in = hin + 4
    hout = hin + 2
    wp_out = hout + 2 * pad_next
    out_len = (hout + 2 * pad_next + 1) * wp_out
    L = hout * wp_in
    q = jnp.arange(L, dtype=jnp.int32)
    mask = ((q % wp_in) < hout).astype(jnp.float32).reshape(1, L)

    kern = functools.partial(_deconv_s1_kernel, hin=hin, cout=cout, pad_next=pad_next)
    return pl.pallas_call(
        kern,
        out_shape=jax.ShapeDtypeStruct((B, cout, out_len), jnp.bfloat16),
        grid=(B,),
        in_specs=[
            pl.BlockSpec((1, cin, in_len), lambda bb: (bb, 0, 0)),
            pl.BlockSpec((3, 3, cout, cin), lambda bb: (0, 0, 0, 0)),
            pl.BlockSpec((cout, 1), lambda bb: (0, 0)),
            pl.BlockSpec((1, L), lambda bb: (0, 0)),
        ],
        out_specs=pl.BlockSpec((1, cout, out_len), lambda bb: (bb, 0, 0)),
        compiler_params=pltpu.CompilerParams(dimension_semantics=("parallel",)),
    )(x, w, b, mask)


# ----- fused stride-2 / output_padding=1 ConvTranspose kernel (sub-pixel) -----
# Input : (B, Cmid, (hmid+3)*(hmid+2)) bf16 -- the hmid x hmid activation
#         padded by 1 in flat layout (exactly what deconv_s1(pad_next=1) emits).
# Output: (B, 4, Cout, (hmid+1)*(hmid+2)) f32 -- one wide slab per output
#         parity (even/even, even/odd, odd/even, odd/odd); interleaving to
#         (B, Cout, 2*(hmid+1), 2*(hmid+1)) is a tiny XLA epilogue.
def _deconv_s2_kernel(x_ref, w_ref, b_ref, o_ref, *, hmid, cout):
    wp = hmid + 2
    L = (hmid + 1) * wp
    x = x_ref[0]                          # (cmid, in_len) bf16
    bias = b_ref[...]                     # (cout, 1) f32

    parity_taps = [
        (0, 0, [(2 * a, 2 * c, a * wp + c) for a in (0, 1) for c in (0, 1)]),
        (0, 1, [(2 * a, 1, a * wp + 1) for a in (0, 1)]),
        (1, 0, [(1, 2 * c, wp + c) for c in (0, 1)]),
        (1, 1, [(1, 1, wp + 1)]),
    ]
    for dh, dw, taps in parity_taps:
        acc = jnp.zeros((cout, L), jnp.float32)
        for kh, kw, off in taps:
            acc = acc + jnp.dot(w_ref[kh, kw], x[:, off:off + L],
                                preferred_element_type=jnp.float32)
        o_ref[0, 2 * dh + dw] = acc + bias   # no activation on the last layer


def deconv_s2(x, w, b, *, hmid):
    B, cmid, in_len = x.shape
    cout = w.shape[2]
    wp = hmid + 2
    L = (hmid + 1) * wp
    kern = functools.partial(_deconv_s2_kernel, hmid=hmid, cout=cout)
    return pl.pallas_call(
        kern,
        out_shape=jax.ShapeDtypeStruct((B, 4, cout, L), jnp.float32),
        grid=(B,),
        in_specs=[
            pl.BlockSpec((1, cmid, in_len), lambda bb: (bb, 0, 0)),
            pl.BlockSpec((3, 3, cout, cmid), lambda bb: (0, 0, 0, 0)),
            pl.BlockSpec((cout, 1), lambda bb: (0, 0)),
        ],
        out_specs=pl.BlockSpec((1, 4, cout, L), lambda bb: (bb, 0, 0, 0)),
        compiler_params=pltpu.CompilerParams(dimension_semantics=("parallel",)),
    )(x, w, b)


# ------------------------------ parameters -----------------------------------
OUT_DIM = {2: 39, 4: 35, 6: 31}


def init_pixel_decoder_params(key, state_shape, latent_dim, layers_filter=(32, 32)):
    num_layers = len(layers_filter)
    num_filters = layers_filter[0]
    out_dim = OUT_DIM[num_layers]
    fc_out = num_filters * out_dim * out_dim

    in_chs = list(layers_filter)
    out_chs = list(layers_filter[1:]) + [state_shape[0]]

    keys = jax.random.split(key, 2 + 2 * len(in_chs))
    fc_w = jax.random.normal(keys[0], (latent_dim, fc_out), jnp.float32) / jnp.sqrt(latent_dim)
    fc_b = 0.01 * jax.random.normal(keys[1], (fc_out,), jnp.float32)

    deconv_w, deconv_b = [], []
    for i, (cin, cout) in enumerate(zip(in_chs, out_chs)):
        w = jax.random.normal(keys[2 + 2 * i], (cin, cout, 3, 3), jnp.float32) / jnp.sqrt(9.0 * cin)
        bb = 0.01 * jax.random.normal(keys[3 + 2 * i], (cout,), jnp.float32)
        deconv_w.append(w)      # PyTorch ConvTranspose2d layout: (Cin, Cout, K, K)
        deconv_b.append(bb)

    return {"fc_w": fc_w, "fc_b": fc_b, "deconv_w": deconv_w, "deconv_b": deconv_b,
            "num_filters": num_filters, "out_dim": out_dim}


def _flip_weight(w_t):
    """(Cin, Cout, 3, 3) -> (3, 3, Cout, Cin); W[kh,kw,co,ci] = w_t[ci,co,2-kh,2-kw]."""
    return jnp.transpose(w_t[:, :, ::-1, ::-1], (2, 3, 1, 0))


def prepare_params(params):
    """One-time prep: flip/transpose deconv weights and cast matmul operands to bf16."""
    return {
        "fc_w": params["fc_w"].astype(jnp.bfloat16),
        "fc_b": params["fc_b"].reshape(1, -1).astype(jnp.float32),
        "deconv_w": [_flip_weight(w).astype(jnp.bfloat16) for w in params["deconv_w"]],
        "deconv_b": [b.reshape(-1, 1).astype(jnp.float32) for b in params["deconv_b"]],
        "num_filters": params["num_filters"],
        "out_dim": params["out_dim"],
    }


# ------------------------------ forward pass ----------------------------------
def pixel_decoder_forward(h, prepped):
    """h: (B, latent_dim) f32 -> obs: (B, C, 84, 84) f32 (NCHW, like PyTorch)."""
    B = h.shape[0]
    F_ = prepped["num_filters"]
    out_dim = prepped["out_dim"]

    # fc + leaky_relu, tiled over N (bf16 output feeds the conv stack directly).
    y = fc_forward(h.astype(jnp.bfloat16), prepped["fc_w"], prepped["fc_b"])

    # view(-1, F, out_dim, out_dim), then embed in the flat padded layout of the
    # first stride-1 deconv (pad 2 on each side + 1 spare zero row).
    x = y.reshape(B, F_, out_dim, out_dim)
    x = jnp.pad(x, ((0, 0), (0, 0), (2, 3), (2, 2)))
    cur_h = out_dim
    x = x.reshape(B, F_, (cur_h + 5) * (cur_h + 4))

    n_deconv = len(prepped["deconv_w"])
    for i in range(n_deconv - 1):                       # stride-1 deconvs + leaky_relu
        pad_next = 2 if i < n_deconv - 2 else 1
        x = deconv_s1(x, prepped["deconv_w"][i], prepped["deconv_b"][i],
                      hin=cur_h, pad_next=pad_next)
        cur_h += 2

    # final stride-2 / output_padding=1 deconv, sub-pixel decomposed, no activation
    o4 = deconv_s2(x, prepped["deconv_w"][-1], prepped["deconv_b"][-1], hmid=cur_h)

    # tiny XLA epilogue: drop garbage column, interleave the 4 parities -> NCHW
    C = prepped["deconv_w"][-1].shape[2]
    Ho2 = cur_h + 1
    Wp = cur_h + 2
    o = o4.reshape(B, 2, 2, C, Ho2, Wp)[..., :Ho2]
    obs = jnp.transpose(o, (0, 3, 4, 1, 5, 2)).reshape(B, C, 2 * Ho2, 2 * Ho2)
    return obs.astype(jnp.float32)


# --------------------------- pure-JAX reference -------------------------------
def _reference_forward(h, params):
    y = h @ params["fc_w"] + params["fc_b"]
    y = jnp.where(y > 0, y, NEG_SLOPE * y)
    B = h.shape[0]
    x = y.reshape(B, params["num_filters"], params["out_dim"], params["out_dim"])
    n = len(params["deconv_w"])
    for i in range(n):
        w_t = params["deconv_w"][i]
        bb = params["deconv_b"][i]
        w_eff = jnp.transpose(w_t[:, :, ::-1, ::-1], (1, 0, 2, 3))   # (O, I, kh, kw)
        if i < n - 1:
            x = jax.lax.conv_general_dilated(
                x, w_eff, window_strides=(1, 1), padding=((2, 2), (2, 2)),
                dimension_numbers=("NCHW", "OIHW", "NCHW"))
            x = x + bb.reshape(1, -1, 1, 1)
            x = jnp.where(x > 0, x, NEG_SLOPE * x)
        else:
            x = jax.lax.conv_general_dilated(
                x, w_eff, window_strides=(1, 1), padding=((2, 3), (2, 3)),
                lhs_dilation=(2, 2),
                dimension_numbers=("NCHW", "OIHW", "NCHW"))
            x = x + bb.reshape(1, -1, 1, 1)
    return x


if __name__ == "__main__":
    # Small but structure-consistent configuration (out_dim is fixed to 39 by
    # the module for num_layers == 2; the output is always 84x84).
    state_shape = (3, 84, 84)
    latent_dim = 32
    layers_filter = (8, 8)
    batch = 2

    key = jax.random.PRNGKey(0)
    k_params, k_input = jax.random.split(key)

    params = init_pixel_decoder_params(k_params, state_shape, latent_dim, layers_filter)
    prepped = prepare_params(params)
    h = jax.random.normal(k_input, (batch, latent_dim), jnp.float32)

    fwd = jax.jit(lambda hh: pixel_decoder_forward(hh, prepped))
    obs = jax.block_until_ready(fwd(h))

    expected_shape = (batch, state_shape[0], 84, 84)
    assert obs.shape == expected_shape, (obs.shape, expected_shape)
    assert obs.dtype == jnp.float32
    assert bool(jnp.all(jnp.isfinite(obs)))

    # Numerical check against a pure-JAX f32 reference (bf16 MXU inputs -> loose tol).
    ref = _reference_forward(h, params)
    rel_err = jnp.linalg.norm((obs - ref).astype(jnp.float32)) / (
        jnp.linalg.norm(ref.astype(jnp.float32)) + 1e-6)
    assert float(rel_err) < 0.08, float(rel_err)

    print("KERNEL_OK")
</pallas_src>

<mosaic_0001>
module attributes {stable_mosaic.version = 11 : i64} {
  func.func @_fc_kernel(%arg0: i32, %arg1: i32, %arg2: memref<2x32xbf16, #tpu.memory_space<vmem>>, %arg3: memref<32x2048xbf16, #tpu.memory_space<vmem>>, %arg4: memref<1x2048xf32, #tpu.memory_space<vmem>>, %arg5: memref<2x2048xbf16, #tpu.memory_space<vmem>>) attributes {dimension_semantics = [#tpu.dimension_semantics<parallel>, #tpu.dimension_semantics<parallel>], iteration_bounds = array<i64: 1, 6>, scalar_prefetch = 0 : i64, scratch_operands = 0 : i64, tpu.core_type = #tpu.core_type<tc>, window_params = [{transform_indices = @transform_0, window_bounds = array<i64: 2, 32>}, {transform_indices = @transform_1, window_bounds = array<i64: 32, 2048>}, {transform_indices = @transform_2, window_bounds = array<i64: 1, 2048>}, {transform_indices = @transform_3, window_bounds = array<i64: 2, 2048>}]} {
    %c0 = arith.constant 0 : index
    %c0_0 = arith.constant 0 : index
    %0 = vector.load %arg2[%c0, %c0_0] : memref<2x32xbf16, #tpu.memory_space<vmem>>, vector<2x32xbf16>
    %c0_1 = arith.constant 0 : index
    %c0_2 = arith.constant 0 : index
    %1 = vector.load %arg3[%c0_1, %c0_2] : memref<32x2048xbf16, #tpu.memory_space<vmem>>, vector<32x2048xbf16>
    %cst = arith.constant dense<0.000000e+00> : vector<2x2048xf32>
    %2 = tpu.matmul %0, %1, %cst {dimension_numbers = #tpu.dot_dimension_numbers<[1], [0], [0], [1], [0, 0, 1, 1], [], []>} : vector<2x32xbf16>, vector<32x2048xbf16>, vector<2x2048xf32> -> vector<2x2048xf32>
    %c0_3 = arith.constant 0 : index
    %c0_4 = arith.constant 0 : index
    %3 = vector.load %arg4[%c0_3, %c0_4] : memref<1x2048xf32, #tpu.memory_space<vmem>>, vector<1x2048xf32>
    %4 = vector.broadcast %3 : vector<1x2048xf32> to vector<2x2048xf32>
    %5 = arith.addf %2, %4 : vector<2x2048xf32>
    %cst_5 = arith.constant 0.000000e+00 : f32
    %6 = vector.broadcast %cst_5 : f32 to vector<2x2048xf32>
    %7 = arith.cmpf ogt, %5, %6 : vector<2x2048xf32>
    %cst_6 = arith.constant 0.00999999977 : f32
    %8 = vector.broadcast %cst_6 : f32 to vector<2x2048xf32>
    %9 = arith.mulf %8, %5 : vector<2x2048xf32>
    %10 = arith.select %7, %5, %9 : vector<2x2048xi1>, vector<2x2048xf32>
    %11 = arith.truncf %10 : vector<2x2048xf32> to vector<2x2048xbf16>
    %c0_7 = arith.constant 0 : index
    %c0_8 = arith.constant 0 : index
    %12 = vector.load %arg5[%c0_7, %c0_8] : memref<2x2048xbf16, #tpu.memory_space<vmem>>, vector<2x2048xbf16>
    tpu.vector_store %arg5[%c0_7, %c0_8], %11 {strides = array<i32>} : memref<2x2048xbf16, #tpu.memory_space<vmem>>, vector<2x2048xbf16>,
    return
  }
  func.func @transform_0(%arg0: i32, %arg1: i32) -> (i32, i32) {
    %c0_i32 = arith.constant 0 : i32
    %c0_i32_0 = arith.constant 0 : i32
    return %arg0, %c0_i32 : i32, i32
  }
  func.func @transform_1(%arg0: i32, %arg1: i32) -> (i32, i32) {
    %c0_i32 = arith.constant 0 : i32
    %c0_i32_0 = arith.constant 0 : i32
    return %c0_i32, %arg1 : i32, i32
  }
  func.func @transform_2(%arg0: i32, %arg1: i32) -> (i32, i32) {
    %c0_i32 = arith.constant 0 : i32
    %c0_i32_0 = arith.constant 0 : i32
    return %c0_i32, %arg1 : i32, i32
  }
  func.func @transform_3(%arg0: i32, %arg1: i32) -> (i32, i32) {
    %c0_i32 = arith.constant 0 : i32
    return %arg0, %arg1 : i32, i32
  }
}

module attributes {stable_mosaic.version = 11 : i64} {
  func.func @_deconv_s2_kernel(%arg0: i32, %arg1: memref<1x8x1892xbf16, #tpu.memory_space<vmem>>, %arg2: memref<3x3x3x8xbf16, #tpu.memory_space<vmem>>, %arg3: memref<3x1xf32, #tpu.memory_space<vmem>>, %arg4: memref<1x4x3x1806xf32, #tpu.memory_space<vmem>>) attributes {dimension_semantics = [#tpu.dimension_semantics<parallel>], iteration_bounds = array<i64: 2>, scalar_prefetch = 0 : i64, scratch_operands = 0 : i64, tpu.core_type = #tpu.core_type<tc>, window_params = [{transform_indices = @transform_0, window_bounds = array<i64: 1, 8, 1892>}, {pipeline_mode = #tpu.pipeline_mode<synchronous>, transform_indices = @transform_1, window_bounds = array<i64: 3, 3, 3, 8>}, {pipeline_mode = #tpu.pipeline_mode<synchronous>, transform_indices = @transform_2, window_bounds = array<i64: 3, 1>}, {transform_indices = @transform_3, window_bounds = array<i64: 1, 4, 3, 1806>}]} {
    %c0 = arith.constant 0 : index
    %c0_0 = arith.constant 0 : index
    %c0_1 = arith.constant 0 : index
    %0 = vector.load %arg1[%c0, %c0_0, %c0_1] : memref<1x8x1892xbf16, #tpu.memory_space<vmem>>, vector<1x8x1892xbf16>
    %1 = vector.shape_cast %0 : vector<1x8x1892xbf16> to vector<8x1892xbf16>
    %c0_2 = arith.constant 0 : index
    %c0_3 = arith.constant 0 : index
    %2 = vector.load %arg3[%c0_2, %c0_3] : memref<3x1xf32, #tpu.memory_space<vmem>>, vector<3x1xf32>
    %cst = arith.constant 0.000000e+00 : f32
    %3 = vector.broadcast %cst : f32 to vector<3x1806xf32>
    %c0_4 = arith.constant 0 : index
    %c0_5 = arith.constant 0 : index
    %c0_6 = arith.constant 0 : index
    %c0_7 = arith.constant 0 : index
    %4 = vector.load %arg2[%c0_4, %c0_5, %c0_6, %c0_7] : memref<3x3x3x8xbf16, #tpu.memory_space<vmem>>, vector<1x1x3x8xbf16>
    %5 = vector.shape_cast %4 : vector<1x1x3x8xbf16> to vector<3x8xbf16>
    %6 = vector.extract_strided_slice %1 {offsets = [0, 0], sizes = [8, 1806], strides = [1, 1]} : vector<8x1892xbf16> to vector<8x1806xbf16>
    %cst_8 = arith.constant dense<0.000000e+00> : vector<3x1806xf32>
    %7 = tpu.matmul %5, %6, %cst_8 {dimension_numbers = #tpu.dot_dimension_numbers<[1], [0], [0], [1], [0, 0, 1, 1], [], []>} : vector<3x8xbf16>, vector<8x1806xbf16>, vector<3x1806xf32> -> vector<3x1806xf32>
    %8 = arith.addf %3, %7 : vector<3x1806xf32>
    %c0_9 = arith.constant 0 : index
    %c2 = arith.constant 2 : index
    %c0_10 = arith.constant 0 : index
    %c0_11 = arith.constant 0 : index
    %9 = vector.load %arg2[%c0_9, %c2, %c0_10, %c0_11] : memref<3x3x3x8xbf16, #tpu.memory_space<vmem>>, vector<1x1x3x8xbf16>
    %10 = vector.shape_cast %9 : vector<1x1x3x8xbf16> to vector<3x8xbf16>
    %11 = vector.extract_strided_slice %1 {offsets = [0, 1], sizes = [8, 1806], strides = [1, 1]} : vector<8x1892xbf16> to vector<8x1806xbf16>
    %cst_12 = arith.constant dense<0.000000e+00> : vector<3x1806xf32>
    %12 = tpu.matmul %10, %11, %cst_12 {dimension_numbers = #tpu.dot_dimension_numbers<[1], [0], [0], [1], [0, 0, 1, 1], [], []>} : vector<3x8xbf16>, vector<8x1806xbf16>, vector<3x1806xf32> -> vector<3x1806xf32>
    %13 = arith.addf %8, %12 : vector<3x1806xf32>
    %c2_13 = arith.constant 2 : index
    %c0_14 = arith.constant 0 : index
    %c0_15 = arith.constant 0 : index
    %c0_16 = arith.constant 0 : index
    %14 = vector.load %arg2[%c2_13, %c0_14, %c0_15, %c0_16] : memref<3x3x3x8xbf16, #tpu.memory_space<vmem>>, vector<1x1x3x8xbf16>
    %15 = vector.shape_cast %14 : vector<1x1x3x8xbf16> to vector<3x8xbf16>
    %16 = vector.extract_strided_slice %1 {offsets = [0, 43], sizes = [8, 1806], strides = [1, 1]} : vector<8x1892xbf16> to vector<8x1806xbf16>
    %cst_17 = arith.constant dense<0.000000e+00> : vector<3x1806xf32>
    %17 = tpu.matmul %15, %16, %cst_17 {dimension_numbers = #tpu.dot_dimension_numbers<[1], [0], [0], [1], [0, 0, 1, 1], [], []>} : vector<3x8xbf16>, vector<8x1806xbf16>, vector<3x1806xf32> -> vector<3x1806xf32>
    %18 = arith.addf %13, %17 : vector<3x1806xf32>
    %c2_18 = arith.constant 2 : index
    %c2_19 = arith.constant 2 : index
    %c0_20 = arith.constant 0 : index
    %c0_21 = arith.constant 0 : index
    %19 = vector.load %arg2[%c2_18, %c2_19, %c0_20, %c0_21] : memref<3x3x3x8xbf16, #tpu.memory_space<vmem>>, vector<1x1x3x8xbf16>
    %20 = vector.shape_cast %19 : vector<1x1x3x8xbf16> to vector<3x8xbf16>
    %21 = vector.extract_strided_slice %1 {offsets = [0, 44], sizes = [8, 1806], strides = [1, 1]} : vector<8x1892xbf16> to vector<8x1806xbf16>
    %cst_22 = arith.constant dense<0.000000e+00> : vector<3x1806xf32>
    %22 = tpu.matmul %20, %21, %cst_22 {dimension_numbers = #tpu.dot_dimension_numbers<[1], [0], [0], [1], [0, 0, 1, 1], [], []>} : vector<3x8xbf16>, vector<8x1806xbf16>, vector<3x1806xf32> -> vector<3x1806xf32>
    %23 = arith.addf %18, %22 : vector<3x1806xf32>
    %24 = vector.broadcast %2 : vector<3x1xf32> to vector<3x1806xf32>
    %25 = arith.addf %23, %24 : vector<3x1806xf32>
    %c0_23 = arith.constant 0 : index
    %c0_24 = arith.constant 0 : index
    %c0_25 = arith.constant 0 : index
    %c0_26 = arith.constant 0 : index
    %26 = vector.load %arg4[%c0_23, %c0_24, %c0_25, %c0_26] : memref<1x4x3x1806xf32, #tpu.memory_space<vmem>>, vector<1x1x3x1806xf32>
    %27 = vector.shape_cast %26 : vector<1x1x3x1806xf32> to vector<3x1806xf32>
    %28 = vector.shape_cast %25 : vector<3x1806xf32> to vector<1x1x3x1806xf32>
    tpu.vector_store %arg4[%c0_23, %c0_24, %c0_25, %c0_26], %28 {strides = array<i32>} : memref<1x4x3x1806xf32, #tpu.memory_space<vmem>>, vector<1x1x3x1806xf32>,
    %cst_27 = arith.constant 0.000000e+00 : f32
    %29 = vector.broadcast %cst_27 : f32 to vector<3x1806xf32>
    %c0_28 = arith.constant 0 : index
    %c1 = arith.constant 1 : index
    %c0_29 = arith.constant 0 : index
    %c0_30 = arith.constant 0 : index
    %30 = vector.load %arg2[%c0_28, %c1, %c0_29, %c0_30] : memref<3x3x3x8xbf16, #tpu.memory_space<vmem>>, vector<1x1x3x8xbf16>
    %31 = vector.shape_cast %30 : vector<1x1x3x8xbf16> to vector<3x8xbf16>
    %32 = vector.extract_strided_slice %1 {offsets = [0, 1], sizes = [8, 1806], strides = [1, 1]} : vector<8x1892xbf16> to vector<8x1806xbf16>
    %cst_31 = arith.constant dense<0.000000e+00> : vector<3x1806xf32>
    %33 = tpu.matmul %31, %32, %cst_31 {dimension_numbers = #tpu.dot_dimension_numbers<[1], [0], [0], [1], [0, 0, 1, 1], [], []>} : vector<3x8xbf16>, vector<8x1806xbf16>, vector<3x1806xf32> -> vector<3x1806xf32>
    %34 = arith.addf %29, %33 : vector<3x1806xf32>
    %c2_32 = arith.constant 2 : index
    %c1_33 = arith.constant 1 : index
    %c0_34 = arith.constant 0 : index
    %c0_35 = arith.constant 0 : index
    %35 = vector.load %arg2[%c2_32, %c1_33, %c0_34, %c0_35] : memref<3x3x3x8xbf16, #tpu.memory_space<vmem>>, vector<1x1x3x8xbf16>
    %36 = vector.shape_cast %35 : vector<1x1x3x8xbf16> to vector<3x8xbf16>
    %37 = vector.extract_strided_slice %1 {offsets = [0, 44], sizes = [8, 1806], strides = [1, 1]} : vector<8x1892xbf16> to vector<8x1806xbf16>
    %cst_36 = arith.constant dense<0.000000e+00> : vector<3x1806xf32>
    %38 = tpu.matmul %36, %37, %cst_36 {dimension_numbers = #tpu.dot_dimension_numbers<[1], [0], [0], [1], [0, 0, 1, 1], [], []>} : vector<3x8xbf16>, vector<8x1806xbf16>, vector<3x1806xf32> -> vector<3x1806xf32>
    %39 = arith.addf %34, %38 : vector<3x1806xf32>
    %40 = vector.broadcast %2 : vector<3x1xf32> to vector<3x1806xf32>
    %41 = arith.addf %39, %40 : vector<3x1806xf32>
    %c0_37 = arith.constant 0 : index
    %c1_38 = arith.constant 1 : index
    %c0_39 = arith.constant 0 : index
    %c0_40 = arith.constant 0 : index
    %42 = vector.load %arg4[%c0_37, %c1_38, %c0_39, %c0_40] : memref<1x4x3x1806xf32, #tpu.memory_space<vmem>>, vector<1x1x3x1806xf32>
    %43 = vector.shape_cast %42 : vector<1x1x3x1806xf32> to vector<3x1806xf32>
    %44 = vector.shape_cast %41 : vector<3x1806xf32> to vector<1x1x3x1806xf32>
    tpu.vector_store %arg4[%c0_37, %c1_38, %c0_39, %c0_40], %44 {strides = array<i32>} : memref<1x4x3x1806xf32, #tpu.memory_space<vmem>>, vector<1x1x3x1806xf32>,
    %cst_41 = arith.constant 0.000000e+00 : f32
    %45 = vector.broadcast %cst_41 : f32 to vector<3x1806xf32>
    %c1_42 = arith.constant 1 : index
    %c0_43 = arith.constant 0 : index
    %c0_44 = arith.constant 0 : index
    %c0_45 = arith.constant 0 : index
    %46 = vector.load %arg2[%c1_42, %c0_43, %c0_44, %c0_45] : memref<3x3x3x8xbf16, #tpu.memory_space<vmem>>, vector<1x1x3x8xbf16>
    %47 = vector.shape_cast %46 : vector<1x1x3x8xbf16> to vector<3x8xbf16>
    %48 = vector.extract_strided_slice %1 {offsets = [0, 43], sizes = [8, 1806], strides = [1, 1]} : vector<8x1892xbf16> to vector<8x1806xbf16>
    %cst_46 = arith.constant dense<0.000000e+00> : vector<3x1806xf32>
    %49 = tpu.matmul %47, %48, %cst_46 {dimension_numbers = #tpu.dot_dimension_numbers<[1], [0], [0], [1], [0, 0, 1, 1], [], []>} : vector<3x8xbf16>, vector<8x1806xbf16>, vector<3x1806xf32> -> vector<3x1806xf32>
    %50 = arith.addf %45, %49 : vector<3x1806xf32>
    %c1_47 = arith.constant 1 : index
    %c2_48 = arith.constant 2 : index
    %c0_49 = arith.constant 0 : index
    %c0_50 = arith.constant 0 : index
    %51 = vector.load %arg2[%c1_47, %c2_48, %c0_49, %c0_50] : memref<3x3x3x8xbf16, #tpu.memory_space<vmem>>, vector<1x1x3x8xbf16>
    %52 = vector.shape_cast %51 : vector<1x1x3x8xbf16> to vector<3x8xbf16>
    %53 = vector.extract_strided_slice %1 {offsets = [0, 44], sizes = [8, 1806], strides = [1, 1]} : vector<8x1892xbf16> to vector<8x1806xbf16>
    %cst_51 = arith.constant dense<0.000000e+00> : vector<3x1806xf32>
    %54 = tpu.matmul %52, %53, %cst_51 {dimension_numbers = #tpu.dot_dimension_numbers<[1], [0], [0], [1], [0, 0, 1, 1], [], []>} : vector<3x8xbf16>, vector<8x1806xbf16>, vector<3x1806xf32> -> vector<3x1806xf32>
    %55 = arith.addf %50, %54 : vector<3x1806xf32>
    %56 = vector.broadcast %2 : vector<3x1xf32> to vector<3x1806xf32>
    %57 = arith.addf %55, %56 : vector<3x1806xf32>
    %c0_52 = arith.constant 0 : index
    %c2_53 = arith.constant 2 : index
    %c0_54 = arith.constant 0 : index
    %c0_55 = arith.constant 0 : index
    %58 = vector.load %arg4[%c0_52, %c2_53, %c0_54, %c0_55] : memref<1x4x3x1806xf32, #tpu.memory_space<vmem>>, vector<1x1x3x1806xf32>
    %59 = vector.shape_cast %58 : vector<1x1x3x1806xf32> to vector<3x1806xf32>
    %60 = vector.shape_cast %57 : vector<3x1806xf32> to vector<1x1x3x1806xf32>
    tpu.vector_store %arg4[%c0_52, %c2_53, %c0_54, %c0_55], %60 {strides = array<i32>} : memref<1x4x3x1806xf32, #tpu.memory_space<vmem>>, vector<1x1x3x1806xf32>,
    %cst_56 = arith.constant 0.000000e+00 : f32
    %61 = vector.broadcast %cst_56 : f32 to vector<3x1806xf32>
    %c1_57 = arith.constant 1 : index
    %c1_58 = arith.constant 1 : index
    %c0_59 = arith.constant 0 : index
    %c0_60 = arith.constant 0 : index
    %62 = vector.load %arg2[%c1_57, %c1_58, %c0_59, %c0_60] : memref<3x3x3x8xbf16, #tpu.memory_space<vmem>>, vector<1x1x3x8xbf16>
    %63 = vector.shape_cast %62 : vector<1x1x3x8xbf16> to vector<3x8xbf16>
    %64 = vector.extract_strided_slice %1 {offsets = [0, 44], sizes = [8, 1806], strides = [1, 1]} : vector<8x1892xbf16> to vector<8x1806xbf16>
    %cst_61 = arith.constant dense<0.000000e+00> : vector<3x1806xf32>
    %65 = tpu.matmul %63, %64, %cst_61 {dimension_numbers = #tpu.dot_dimension_numbers<[1], [0], [0], [1], [0, 0, 1, 1], [], []>} : vector<3x8xbf16>, vector<8x1806xbf16>, vector<3x1806xf32> -> vector<3x1806xf32>
    %66 = arith.addf %61, %65 : vector<3x1806xf32>
    %67 = vector.broadcast %2 : vector<3x1xf32> to vector<3x1806xf32>
    %68 = arith.addf %66, %67 : vector<3x1806xf32>
    %c0_62 = arith.constant 0 : index
    %c3 = arith.constant 3 : index
    %c0_63 = arith.constant 0 : index
    %c0_64 = arith.constant 0 : index
    %69 = vector.load %arg4[%c0_62, %c3, %c0_63, %c0_64] : memref<1x4x3x1806xf32, #tpu.memory_space<vmem>>, vector<1x1x3x1806xf32>
    %70 = vector.shape_cast %69 : vector<1x1x3x1806xf32> to vector<3x1806xf32>
    %71 = vector.shape_cast %68 : vector<3x1806xf32> to vector<1x1x3x1806xf32>
    tpu.vector_store %arg4[%c0_62, %c3, %c0_63, %c0_64], %71 {strides = array<i32>} : memref<1x4x3x1806xf32, #tpu.memory_space<vmem>>, vector<1x1x3x1806xf32>,
    return
  }
  func.func @transform_0(%arg0: i32) -> (i32, i32, i32) {
    %c0_i32 = arith.constant 0 : i32
    %c0_i32_0 = arith.constant 0 : i32
    %c0_i32_1 = arith.constant 0 : i32
    return %arg0, %c0_i32, %c0_i32_0 : i32, i32, i32
  }
  func.func @transform_1(%arg0: i32) -> (i32, i32, i32, i32) {
    %c0_i32 = arith.constant 0 : i32
    %c0_i32_0 = arith.constant 0 : i32
    %c0_i32_1 = arith.constant 0 : i32
    %c0_i32_2 = arith.constant 0 : i32
    %c0_i32_3 = arith.constant 0 : i32
    return %c0_i32, %c0_i32_0, %c0_i32_1, %c0_i32_2 : i32, i32, i32, i32
  }
  func.func @transform_2(%arg0: i32) -> (i32, i32) {
    %c0_i32 = arith.constant 0 : i32
    %c0_i32_0 = arith.constant 0 : i32
    %c0_i32_1 = arith.constant 0 : i32
    return %c0_i32, %c0_i32_0 : i32, i32
  }
  func.func @transform_3(%arg0: i32) -> (i32, i32, i32, i32) {
    %c0_i32 = arith.constant 0 : i32
    %c0_i32_0 = arith.constant 0 : i32
    %c0_i32_1 = arith.constant 0 : i32
    %c0_i32_2 = arith.constant 0 : i32
    return %arg0, %c0_i32, %c0_i32_0, %c0_i32_1 : i32, i32, i32, i32
  }
}

module attributes {stable_mosaic.version = 11 : i64} {
  func.func @_deconv_s1_kernel(%arg0: i32, %arg1: memref<1x8x1892xbf16, #tpu.memory_space<vmem>>, %arg2: memref<3x3x8x8xbf16, #tpu.memory_space<vmem>>, %arg3: memref<8x1xf32, #tpu.memory_space<vmem>>, %arg4: memref<1x1763xf32, #tpu.memory_space<vmem>>, %arg5: memref<1x8x1892xbf16, #tpu.memory_space<vmem>>) attributes {dimension_semantics = [#tpu.dimension_semantics<parallel>], iteration_bounds = array<i64: 2>, scalar_prefetch = 0 : i64, scratch_operands = 0 : i64, tpu.core_type = #tpu.core_type<tc>, window_params = [{transform_indices = @transform_0, window_bounds = array<i64: 1, 8, 1892>}, {pipeline_mode = #tpu.pipeline_mode<synchronous>, transform_indices = @transform_1, window_bounds = array<i64: 3, 3, 8, 8>}, {pipeline_mode = #tpu.pipeline_mode<synchronous>, transform_indices = @transform_2, window_bounds = array<i64: 8, 1>}, {pipeline_mode = #tpu.pipeline_mode<synchronous>, transform_indices = @transform_3, window_bounds = array<i64: 1, 1763>}, {transform_indices = @transform_4, window_bounds = array<i64: 1, 8, 1892>}]} {
    %c0 = arith.constant 0 : index
    %c0_0 = arith.constant 0 : index
    %c0_1 = arith.constant 0 : index
    %0 = vector.load %arg1[%c0, %c0_0, %c0_1] : memref<1x8x1892xbf16, #tpu.memory_space<vmem>>, vector<1x8x1892xbf16>
    %1 = vector.shape_cast %0 : vector<1x8x1892xbf16> to vector<8x1892xbf16>
    %cst = arith.constant 0.000000e+00 : f32
    %2 = vector.broadcast %cst : f32 to vector<8x1763xf32>
    %c0_2 = arith.constant 0 : index
    %c0_3 = arith.constant 0 : index
    %c0_4 = arith.constant 0 : index
    %c0_5 = arith.constant 0 : index
    %3 = vector.load %arg2[%c0_2, %c0_3, %c0_4, %c0_5] : memref<3x3x8x8xbf16, #tpu.memory_space<vmem>>, vector<1x1x8x8xbf16>
    %4 = vector.shape_cast %3 : vector<1x1x8x8xbf16> to vector<8x8xbf16>
    %5 = vector.extract_strided_slice %1 {offsets = [0, 0], sizes = [8, 1763], strides = [1, 1]} : vector<8x1892xbf16> to vector<8x1763xbf16>
    %cst_6 = arith.constant dense<0.000000e+00> : vector<8x1763xf32>
    %6 = tpu.matmul %4, %5, %cst_6 {dimension_numbers = #tpu.dot_dimension_numbers<[1], [0], [0], [1], [0, 0, 1, 1], [], []>} : vector<8x8xbf16>, vector<8x1763xbf16>, vector<8x1763xf32> -> vector<8x1763xf32>
    %7 = arith.addf %2, %6 : vector<8x1763xf32>
    %c0_7 = arith.constant 0 : index
    %c1 = arith.constant 1 : index
    %c0_8 = arith.constant 0 : index
    %c0_9 = arith.constant 0 : index
    %8 = vector.load %arg2[%c0_7, %c1, %c0_8, %c0_9] : memref<3x3x8x8xbf16, #tpu.memory_space<vmem>>, vector<1x1x8x8xbf16>
    %9 = vector.shape_cast %8 : vector<1x1x8x8xbf16> to vector<8x8xbf16>
    %10 = vector.extract_strided_slice %1 {offsets = [0, 1], sizes = [8, 1763], strides = [1, 1]} : vector<8x1892xbf16> to vector<8x1763xbf16>
    %cst_10 = arith.constant dense<0.000000e+00> : vector<8x1763xf32>
    %11 = tpu.matmul %9, %10, %cst_10 {dimension_numbers = #tpu.dot_dimension_numbers<[1], [0], [0], [1], [0, 0, 1, 1], [], []>} : vector<8x8xbf16>, vector<8x1763xbf16>, vector<8x1763xf32> -> vector<8x1763xf32>
    %12 = arith.addf %7, %11 : vector<8x1763xf32>
    %c0_11 = arith.constant 0 : index
    %c2 = arith.constant 2 : index
    %c0_12 = arith.constant 0 : index
    %c0_13 = arith.constant 0 : index
    %13 = vector.load %arg2[%c0_11, %c2, %c0_12, %c0_13] : memref<3x3x8x8xbf16, #tpu.memory_space<vmem>>, vector<1x1x8x8xbf16>
    %14 = vector.shape_cast %13 : vector<1x1x8x8xbf16> to vector<8x8xbf16>
    %15 = vector.extract_strided_slice %1 {offsets = [0, 2], sizes = [8, 1763], strides = [1, 1]} : vector<8x1892xbf16> to vector<8x1763xbf16>
    %cst_14 = arith.constant dense<0.000000e+00> : vector<8x1763xf32>
    %16 = tpu.matmul %14, %15, %cst_14 {dimension_numbers = #tpu.dot_dimension_numbers<[1], [0], [0], [1], [0, 0, 1, 1], [], []>} : vector<8x8xbf16>, vector<8x1763xbf16>, vector<8x1763xf32> -> vector<8x1763xf32>
    %17 = arith.addf %12, %16 : vector<8x1763xf32>
    %c1_15 = arith.constant 1 : index
    %c0_16 = arith.constant 0 : index
    %c0_17 = arith.constant 0 : index
    %c0_18 = arith.constant 0 : index
    %18 = vector.load %arg2[%c1_15, %c0_16, %c0_17, %c0_18] : memref<3x3x8x8xbf16, #tpu.memory_space<vmem>>, vector<1x1x8x8xbf16>
    %19 = vector.shape_cast %18 : vector<1x1x8x8xbf16> to vector<8x8xbf16>
    %20 = vector.extract_strided_slice %1 {offsets = [0, 43], sizes = [8, 1763], strides = [1, 1]} : vector<8x1892xbf16> to vector<8x1763xbf16>
    %cst_19 = arith.constant dense<0.000000e+00> : vector<8x1763xf32>
    %21 = tpu.matmul %19, %20, %cst_19 {dimension_numbers = #tpu.dot_dimension_numbers<[1], [0], [0], [1], [0, 0, 1, 1], [], []>} : vector<8x8xbf16>, vector<8x1763xbf16>, vector<8x1763xf32> -> vector<8x1763xf32>
    %22 = arith.addf %17, %21 : vector<8x1763xf32>
    %c1_20 = arith.constant 1 : index
    %c1_21 = arith.constant 1 : index
    %c0_22 = arith.constant 0 : index
    %c0_23 = arith.constant 0 : index
    %23 = vector.load %arg2[%c1_20, %c1_21, %c0_22, %c0_23] : memref<3x3x8x8xbf16, #tpu.memory_space<vmem>>, vector<1x1x8x8xbf16>
    %24 = vector.shape_cast %23 : vector<1x1x8x8xbf16> to vector<8x8xbf16>
    %25 = vector.extract_strided_slice %1 {offsets = [0, 44], sizes = [8, 1763], strides = [1, 1]} : vector<8x1892xbf16> to vector<8x1763xbf16>
    %cst_24 = arith.constant dense<0.000000e+00> : vector<8x1763xf32>
    %26 = tpu.matmul %24, %25, %cst_24 {dimension_numbers = #tpu.dot_dimension_numbers<[1], [0], [0], [1], [0, 0, 1, 1], [], []>} : vector<8x8xbf16>, vector<8x1763xbf16>, vector<8x1763xf32> -> vector<8x1763xf32>
    %27 = arith.addf %22, %26 : vector<8x1763xf32>
    %c1_25 = arith.constant 1 : index
    %c2_26 = arith.constant 2 : index
    %c0_27 = arith.constant 0 : index
    %c0_28 = arith.constant 0 : index
    %28 = vector.load %arg2[%c1_25, %c2_26, %c0_27, %c0_28] : memref<3x3x8x8xbf16, #tpu.memory_space<vmem>>, vector<1x1x8x8xbf16>
    %29 = vector.shape_cast %28 : vector<1x1x8x8xbf16> to vector<8x8xbf16>
    %30 = vector.extract_strided_slice %1 {offsets = [0, 45], sizes = [8, 1763], strides = [1, 1]} : vector<8x1892xbf16> to vector<8x1763xbf16>
    %cst_29 = arith.constant dense<0.000000e+00> : vector<8x1763xf32>
    %31 = tpu.matmul %29, %30, %cst_29 {dimension_numbers = #tpu.dot_dimension_numbers<[1], [0], [0], [1], [0, 0, 1, 1], [], []>} : vector<8x8xbf16>, vector<8x1763xbf16>, vector<8x1763xf32> -> vector<8x1763xf32>
    %32 = arith.addf %27, %31 : vector<8x1763xf32>
    %c2_30 = arith.constant 2 : index
    %c0_31 = arith.constant 0 : index
    %c0_32 = arith.constant 0 : index
    %c0_33 = arith.constant 0 : index
    %33 = vector.load %arg2[%c2_30, %c0_31, %c0_32, %c0_33] : memref<3x3x8x8xbf16, #tpu.memory_space<vmem>>, vector<1x1x8x8xbf16>
    %34 = vector.shape_cast %33 : vector<1x1x8x8xbf16> to vector<8x8xbf16>
    %35 = vector.extract_strided_slice %1 {offsets = [0, 86], sizes = [8, 1763], strides = [1, 1]} : vector<8x1892xbf16> to vector<8x1763xbf16>
    %cst_34 = arith.constant dense<0.000000e+00> : vector<8x1763xf32>
    %36 = tpu.matmul %34, %35, %cst_34 {dimension_numbers = #tpu.dot_dimension_numbers<[1], [0], [0], [1], [0, 0, 1, 1], [], []>} : vector<8x8xbf16>, vector<8x1763xbf16>, vector<8x1763xf32> -> vector<8x1763xf32>
    %37 = arith.addf %32, %36 : vector<8x1763xf32>
    %c2_35 = arith.constant 2 : index
    %c1_36 = arith.constant 1 : index
    %c0_37 = arith.constant 0 : index
    %c0_38 = arith.constant 0 : index
    %38 = vector.load %arg2[%c2_35, %c1_36, %c0_37, %c0_38] : memref<3x3x8x8xbf16, #tpu.memory_space<vmem>>, vector<1x1x8x8xbf16>
    %39 = vector.shape_cast %38 : vector<1x1x8x8xbf16> to vector<8x8xbf16>
    %40 = vector.extract_strided_slice %1 {offsets = [0, 87], sizes = [8, 1763], strides = [1, 1]} : vector<8x1892xbf16> to vector<8x1763xbf16>
    %cst_39 = arith.constant dense<0.000000e+00> : vector<8x1763xf32>
    %41 = tpu.matmul %39, %40, %cst_39 {dimension_numbers = #tpu.dot_dimension_numbers<[1], [0], [0], [1], [0, 0, 1, 1], [], []>} : vector<8x8xbf16>, vector<8x1763xbf16>, vector<8x1763xf32> -> vector<8x1763xf32>
    %42 = arith.addf %37, %41 : vector<8x1763xf32>
    %c2_40 = arith.constant 2 : index
    %c2_41 = arith.constant 2 : index
    %c0_42 = arith.constant 0 : index
    %c0_43 = arith.constant 0 : index
    %43 = vector.load %arg2[%c2_40, %c2_41, %c0_42, %c0_43] : memref<3x3x8x8xbf16, #tpu.memory_space<vmem>>, vector<1x1x8x8xbf16>
    %44 = vector.shape_cast %43 : vector<1x1x8x8xbf16> to vector<8x8xbf16>
    %45 = vector.extract_strided_slice %1 {offsets = [0, 88], sizes = [8, 1763], strides = [1, 1]} : vector<8x1892xbf16> to vector<8x1763xbf16>
    %cst_44 = arith.constant dense<0.000000e+00> : vector<8x1763xf32>
    %46 = tpu.matmul %44, %45, %cst_44 {dimension_numbers = #tpu.dot_dimension_numbers<[1], [0], [0], [1], [0, 0, 1, 1], [], []>} : vector<8x8xbf16>, vector<8x1763xbf16>, vector<8x1763xf32> -> vector<8x1763xf32>
    %47 = arith.addf %42, %46 : vector<8x1763xf32>
    %c0_45 = arith.constant 0 : index
    %c0_46 = arith.constant 0 : index
    %48 = vector.load %arg3[%c0_45, %c0_46] : memref<8x1xf32, #tpu.memory_space<vmem>>, vector<8x1xf32>
    %49 = vector.broadcast %48 : vector<8x1xf32> to vector<8x1763xf32>
    %50 = arith.addf %47, %49 : vector<8x1763xf32>
    %cst_47 = arith.constant 0.000000e+00 : f32
    %51 = vector.broadcast %cst_47 : f32 to vector<8x1763xf32>
    %52 = arith.cmpf ogt, %50, %51 : vector<8x1763xf32>
    %cst_48 = arith.constant 0.00999999977 : f32
    %53 = vector.broadcast %cst_48 : f32 to vector<8x1763xf32>
    %54 = arith.mulf %53, %50 : vector<8x1763xf32>
    %55 = arith.select %52, %50, %54 : vector<8x1763xi1>, vector<8x1763xf32>
    %c0_49 = arith.constant 0 : index
    %c0_50 = arith.constant 0 : index
    %56 = vector.load %arg4[%c0_49, %c0_50] : memref<1x1763xf32, #tpu.memory_space<vmem>>, vector<1x1763xf32>
    %57 = vector.broadcast %56 : vector<1x1763xf32> to vector<8x1763xf32>
    %58 = arith.mulf %55, %57 : vector<8x1763xf32>
    %cst_51 = arith.constant 0.000000e+00 : bf16
    %59 = vector.broadcast %cst_51 : bf16 to vector<1x8x1892xbf16>
    %c0_52 = arith.constant 0 : index
    %c0_53 = arith.constant 0 : index
    %c0_54 = arith.constant 0 : index
    %60 = vector.load %arg5[%c0_52, %c0_53, %c0_54] : memref<1x8x1892xbf16, #tpu.memory_space<vmem>>, vector<1x8x1892xbf16>
    tpu.vector_store %arg5[%c0_52, %c0_53, %c0_54], %59 {strides = array<i32>} : memref<1x8x1892xbf16, #tpu.memory_space<vmem>>, vector<1x8x1892xbf16>,
    %61 = arith.truncf %58 : vector<8x1763xf32> to vector<8x1763xbf16>
    %c0_55 = arith.constant 0 : index
    %c0_56 = arith.constant 0 : index
    %c44 = arith.constant 44 : index
    %62 = vector.load %arg5[%c0_55, %c0_56, %c44] : memref<1x8x1892xbf16, #tpu.memory_space<vmem>>, vector<1x8x1763xbf16>
    %63 = vector.shape_cast %62 : vector<1x8x1763xbf16> to vector<8x1763xbf16>
    %64 = vector.shape_cast %61 : vector<8x1763xbf16> to vector<1x8x1763xbf16>
    tpu.vector_store %arg5[%c0_55, %c0_56, %c44], %64 {strides = array<i32>} : memref<1x8x1892xbf16, #tpu.memory_space<vmem>>, vector<1x8x1763xbf16>,
    return
  }
  func.func @transform_0(%arg0: i32) -> (i32, i32, i32) {
    %c0_i32 = arith.constant 0 : i32
    %c0_i32_0 = arith.constant 0 : i32
    %c0_i32_1 = arith.constant 0 : i32
    return %arg0, %c0_i32, %c0_i32_0 : i32, i32, i32
  }
  func.func @transform_1(%arg0: i32) -> (i32, i32, i32, i32) {
    %c0_i32 = arith.constant 0 : i32
    %c0_i32_0 = arith.constant 0 : i32
    %c0_i32_1 = arith.constant 0 : i32
    %c0_i32_2 = arith.constant 0 : i32
    %c0_i32_3 = arith.constant 0 : i32
    return %c0_i32, %c0_i32_0, %c0_i32_1, %c0_i32_2 : i32, i32, i32, i32
  }
  func.func @transform_2(%arg0: i32) -> (i32, i32) {
    %c0_i32 = arith.constant 0 : i32
    %c0_i32_0 = arith.constant 0 : i32
    %c0_i32_1 = arith.constant 0 : i32
    return %c0_i32, %c0_i32_0 : i32, i32
  }
  func.func @transform_3(%arg0: i32) -> (i32, i32) {
    %c0_i32 = arith.constant 0 : i32
    %c0_i32_0 = arith.constant 0 : i32
    %c0_i32_1 = arith.constant 0 : i32
    return %c0_i32, %c0_i32_0 : i32, i32
  }
  func.func @transform_4(%arg0: i32) -> (i32, i32, i32) {
    %c0_i32 = arith.constant 0 : i32
    %c0_i32_0 = arith.constant 0 : i32
    %c0_i32_1 = arith.constant 0 : i32
    return %arg0, %c0_i32, %c0_i32_0 : i32, i32, i32
  }
}

</mosaic_0001>

<bundles_post_ra>
// kernel: _lambda_.3
= control target key start
LH: loop header
LB: loop body
LE: loop exit
PB: predicated region body
PF: predicated region fallthrough
CT: control target
= control target key end

     0   :  { %8 = vsyncpa [#allocation3], 0  ;;  %s1580_s0 = inlined_call_operand.vmem [shape: bf16[2,32], index: 0, kind: input, shape index: {}]   ;;  %s1581_s1 = inlined_call_operand.hbm [shape: bf16[32,12168], index: 1, kind: input, shape index: {}]   ;;  %s1582_s2 = inlined_call_operand.hbm [shape: f32[1,12168], index: 2, kind: input, shape index: {}]   ;;  %s1583_s3 = inlined_call_operand.vmem [shape: bf16[2,12168], index: 3, kind: output, shape index: {}]  }
   0x1   :  { %10 = vsyncpa [#allocation3 + $0x1], 0 }
   0x2   :  { %11 = vsyncpa [#allocation5], 0 }
   0x3   :  { %13 = vsyncpa [#allocation5 + $0x1], 0  ;;  %s1346_s12 = smov 0   ;;  %s1348_s13 = smov 0  }
   0x4   :  { %s1350_s14 = smov 0   ;;  %s1352_s15 = smov 0  }
   0x5   :  { %s1354_s16 = smov 0   ;;  %s1356_s17 = smov 0  }
   0x6 LB: > { %s951_s18 = sadd.s32 4294967295, %s1321_s17   ;;  %s28_s19 = sadd.s32 1, %s1317_s16  ;;  %s1321_s17 = sphi %s1356_s17, %s19_s17   ;;  %s1317_s16 = sphi %s1354_s16, %s1591_s16   ;;  %s1313_s15 = sphi %s1352_s15, %s1590_s15   ;;  %s1309_s14 = sphi %s1350_s14, %s1589_s14   ;;  %s1305_s13 = sphi %s1348_s13, %s1588_s13   ;;  %s1301_s12 = sphi %s1346_s12, %s1587_s12  }
   0x7   : > { %p29_p0 = scmp.ge.s32.totalorder %s28_s19, 6  ;;  %s64_s20 = sadd.s32 1, %s1309_s14 }
   0x8   : > { %p71_p1 = scmp.ne.s32.totalorder %s1309_s14, %s1305_s13  ;;  %p72_p2 = scmp.eq.s32.totalorder %s1321_s17, 0 }
   0x9   : > { %s1593_s19 = smov (%p29_p0, %s28_s19), 0  ;;  %p77_p4 = scmp.ne.s32.totalorder %s1305_s13, %s1301_s12 }
   0xa   : > { %p1382_p3 = por %p72_p2, %p71_p1  ;;  %s61_s22 = ssub.s32 %s1317_s16, %s1593_s19 }
   0xb   : > { %p78_p5 = scmp.eq.s32.totalorder %s951_s18, 0  ;;  %p62_p6 = scmp.eq.s32.totalorder %s61_s22, 0 }
   0xc   : > { %p1155_p8 = scmp.lt.s32.totalorder %s1321_s17, 6  ;;  %s1398_s25 = sand.u32 1, %s1309_s14  }
   0xd   : > { %p1389_p7 = por %p78_p5, %p77_p4  ;;  %s1111_s26 = sshll.u32 %s1317_s16, 6 }
   0xe   : > { %s1395_s24 = scalar_select %p62_p6, %s1309_s14, %s64_s20  }
   0xf   : > { %s956_s27 = sshll.u32 %s1398_s25, 8  ;;  %s170_s30 = scalar_lea.hbm %s1581_s1, %s1111_s26 }
  0x10   : > { %s171_s4 = sshll.u32 %s170_s30, 4  ;;  %s165_s5 = scalar_lea.vmem [#allocation2], %s956_s27  ;;  %s172_s4 = int_to_ptr.hbm [resolvable:$true] %s171_s4 }
  0x11   : > { %s173_s6 = sshll.u32 %s165_s5, 4  ;;  %p1407_p9 = pnand %p1155_p8, %p1382_p3  ;;  %s174_s6 = int_to_ptr.vmem [resolvable:$true] %s173_s6 }
  0x12   : > { %p961_p10 = scmp.ge.s32.totalorder %s1321_s17, 1  ;;  %s162_s8 = scalar_lea.sflag [#allocation3], %s1398_s25 }
  0x13   : > { %s1323_s9 = smov 6144   ;;  %s1324_s10 = smov 1024  }
  0x14   : > { %s1325_s11 = smov 64   ;;  %p200_p11 = scmp.lt.s32.totalorder %s1321_s17, 7 }
  0x15   : > { %1151 = dma.hbm_to_vmem [thread:$0]  (!%p1407_p9), %s172_s4, 4096, %s174_s6, %s162_s8, %s1323_s9, %s1324_s10, %s1325_s11  }
  0x16   : > { %s959_s12 = sshll.u32 %s1398_s25, 4  ;;  %s960_s18 = sshll.u32 %s1317_s16, 4 }
  0x17   : > { %p201_p12 = pnand %p961_p10, %p200_p11  ;;  %s191_s22 = scalar_lea.hbm %s1582_s2, %s960_s18 }
  0x18   : > { %s187_s26 = scalar_lea.vmem [#allocation4], %s959_s12  ;;  %s193_s28 = sshll.u32 %s191_s22, 4  ;;  %s194_s28 = int_to_ptr.hbm [resolvable:$true] %s193_s28 }
  0x19   : > { %s195_s27 = sshll.u32 %s187_s26, 4  ;;  %s184_s29 = scalar_lea.sflag [#allocation5], %s1398_s25  ;;  %s196_s27 = int_to_ptr.vmem [resolvable:$true] %s195_s27 }
  0x1a   : > { %1154 = dma.hbm_to_vmem [thread:$0]  (!%p1407_p9), %s194_s28, 256, %s196_s27, %s184_s29  }
  0x1b   : > { %204 = sbr.rel (%p201_p12) target bundleno = 242 (0xf2), region = 32  ;;  %s206_s30 = sand.u32 (!%p201_p12), 1, %s1305_s13  }
  0x1c   : > { %s962_s4 = sshll.u32 (!%p201_p12), %s206_s30, 8  ;;  %s207_s5 = scalar_lea.sflag (!%p201_p12), [#allocation3], %s206_s30 }
  0x1d   : > { %s1425_s6 = scalar_lea.vmem (!%p201_p12), [#allocation2], %s962_s4 }
  0x20   : > { %1292 = dma.done.wait (%p1389_p7), %s207_s5, 4096  }
  0x21   : > { %1294 = vsyncadd (%p1389_p7), %s207_s5, 4294963200  ;;  %s963_s8 = sshll.u32 %s206_s30, 4  ;;  %s217_s9 = scalar_lea.sflag [#allocation5], %s206_s30 }
  0x22   : > { %s1431_s10 = scalar_lea.vmem [#allocation4], %s963_s8 }
  0x23   : > { %1296 = dma.done.wait (%p1389_p7), %s217_s9, 256  }
  0x24   : > { %1298 = vsyncadd (%p1389_p7), %s217_s9, 4294967040  ;;  %vm499_vm0 = vcmask 261120   ;;  %v1031_v0 = vld [vmem:[%s1425_s6 + $0x80] sm:$0xf]  ;;  %v1128_v2 = vld [vmem:[%s1425_s6 + $0x84] sm:$0xf] }
  0x25   : > { %v1136_v1 = vld [vmem:[%s1425_s6 + $0xbc] sm:$0xf0]  ;;  %v1033_v4 = vld [vmem:[%s1425_s6 + $0xc0] sm:$0xf0]  ;;  %v1039_v5 = vld [vmem:[%s1425_s6 + $0x88] sm:$0xf] }
  0x26   : > { %v1032_v3 = vor.u32 %v1136_v1, %v1031_v0  ;;  %v1137_v6 = vld [vmem:[%s1425_s6 + $0xc4] sm:$0xf0]  ;;  %v1036_v7 = vor.u32 %v1128_v2, %v1033_v4  ;;  %v1129_v9 = vld [vmem:[%s1425_s6 + $0x8c] sm:$0xf]  ;;  %v967_v11 = vld [vmem:[%s1425_s6] sm:$0xf] }
  0x27   : > { %v1040_v8 = vor.u32 %v1137_v6, %v1039_v5  ;;  %v1041_v10 = vld [vmem:[%s1425_s6 + $0xc8] sm:$0xf0]  ;;  %v1120_v13 = vld [vmem:[%s1425_s6 + $0x3c] sm:$0xf0]  ;;  %v1112_v14 = vld [vmem:[%s1425_s6 + $0x4] sm:$0xf] }
  0x28   : > { %509 = vmatpush.bf16.msra.mxu0 %v1032_v3  ;;  %v1044_v12 = vor.u32 %v1129_v9, %v1041_v10  ;;  %v969_v15 = vld [vmem:[%s1425_s6 + $0x40] sm:$0xf0]  ;;  %522 = vmatpush.bf16.msra.mxu1 %v1036_v7  ;;  %v968_v16 = vor.u32 %v1120_v13, %v967_v11  ;;  %v975_v18 = vld [vmem:[%s1425_s6 + $0x8] sm:$0xf]  ;;  %v1113_v20 = vld [vmem:[%s1425_s6 + $0xc] sm:$0xf] }
  0x29   : > { %535 = vmatpush.bf16.msra.mxu2 %v1040_v8  ;;  %v972_v17 = vor.u32 %v1112_v14, %v969_v15  ;;  %v1121_v19 = vld [vmem:[%s1425_s6 + $0x44] sm:$0xf0]  ;;  %v977_v22 = vld [vmem:[%s1425_s6 + $0x48] sm:$0xf0]  ;;  %v1456_v23 = vld [vmem:[%s1580_s0] sm:$0x1] }
  0x2a   : > { %548 = vmatpush.bf16.msra.mxu3 %v1044_v12  ;;  %v976_v21 = vor.u32 %v1121_v19, %v975_v18  ;;  %v1055_v24 = vld [vmem:[%s1425_s6 + $0x98] sm:$0xf]  ;;  %v980_v25 = vor.u32 %v1113_v20, %v977_v22  ;;  %v1131_v27 = vld [vmem:[%s1425_s6 + $0x9c] sm:$0xf]  ;;  %v1047_v31 = vld [vmem:[%s1425_s6 + $0x90] sm:$0xf] }
  0x2b   : > { %v1139_v26 = vld [vmem:[%s1425_s6 + $0xd4] sm:$0xf0]  ;;  %v1057_v28 = vld [vmem:[%s1425_s6 + $0xd8] sm:$0xf0]  ;;  %v1138_v32 = vld [vmem:[%s1425_s6 + $0xcc] sm:$0xf0] }
  0x2c   : > { %510 = vmatpush.bf16.msra.mxu0 %v968_v16  ;;  %v1056_v29 = vor.u32 %v1139_v26, %v1055_v24  ;;  %v1060_v30 = vor.u32 %v1131_v27, %v1057_v28  ;;  %v1130_v33 = vld [vmem:[%s1425_s6 + $0x94] sm:$0xf]  ;;  %523 = vmatpush.bf16.msra.mxu1 %v972_v17  ;;  %v1048_v34 = vor.u32 %v1138_v32, %v1047_v31  ;;  %v991_v36 = vld [vmem:[%s1425_s6 + $0x18] sm:$0xf]  ;;  %v1115_v40 = vld [vmem:[%s1425_s6 + $0x1c] sm:$0xf] }
  0x2d   : > { %536 = vmatpush.bf16.msra.mxu2 %v976_v21  ;;  %v1049_v35 = vld [vmem:[%s1425_s6 + $0xd0] sm:$0xf0]  ;;  %v1123_v37 = vld [vmem:[%s1425_s6 + $0x54] sm:$0xf0]  ;;  %v993_v41 = vld [vmem:[%s1425_s6 + $0x58] sm:$0xf0] }
  0x2e   : > { %549 = vmatpush.bf16.msra.mxu3 %v980_v25  ;;  %v1052_v38 = vor.u32 %v1130_v33, %v1049_v35  ;;  %v992_v39 = vor.u32 %v1123_v37, %v991_v36  ;;  %v983_v42 = vld [vmem:[%s1425_s6 + $0x10] sm:$0xf]  ;;  %v996_v43 = vor.u32 %v1115_v40, %v993_v41  ;;  %v1114_v45 = vld [vmem:[%s1425_s6 + $0x14] sm:$0xf]  ;;  %v1071_v47 = vld [vmem:[%s1425_s6 + $0xa8] sm:$0xf] }
  0x2f   : > { %1093 = vmatmul.msk.bf16.vlgmr.msra.gmra.mxu0 %vm499_vm0, %v1456_v23  ;;  %v1122_v44 = vld [vmem:[%s1425_s6 + $0x4c] sm:$0xf0]  ;;  %v985_v46 = vld [vmem:[%s1425_s6 + $0x50] sm:$0xf0]  ;;  %1094 = vmatmul.msk.bf16.vlgmr.msra.gmra.mxu1 %vm499_vm0, %v1456_v23  ;;  %v1141_v48 = vld [vmem:[%s1425_s6 + $0xe4] sm:$0xf0] }
  0x30   : > { %1095 = vmatmul.msk.bf16.vlgmr.msra.gmra.mxu2 %vm499_vm0, %v1456_v23  ;;  %v1133_v49 = vld [vmem:[%s1425_s6 + $0xac] sm:$0xf]  ;;  %561 = vmatpush.bf16.msrb.mxu0 %v1048_v34  ;;  %v984_v50 = vor.u32 %v1122_v44, %v983_v42  ;;  %v1072_v51 = vor.u32 %v1141_v48, %v1071_v47  ;;  %v1063_v53 = vld [vmem:[%s1425_s6 + $0xa0] sm:$0xf]  ;;  %v988_v55 = vor.u32 %v1114_v45, %v985_v46  ;;  %v1132_v58 = vld [vmem:[%s1425_s6 + $0xa4] sm:$0xf] }
  0x31   : > { %587 = vmatpush.bf16.msrb.mxu2 %v1056_v29  ;;  %1096 = vmatmul.msk.bf16.vlgmr.msra.gmra.mxu3 %vm499_vm0, %v1456_v23  ;;  %v1073_v52 = vld [vmem:[%s1425_s6 + $0xe8] sm:$0xf0]  ;;  %v1140_v54 = vld [vmem:[%s1425_s6 + $0xdc] sm:$0xf0]  ;;  %v1065_v59 = vld [vmem:[%s1425_s6 + $0xe0] sm:$0xf0] }
  0x32   : > { %600 = vmatpush.bf16.msrb.mxu3 %v1060_v30  ;;  %574 = vmatpush.bf16.msrb.mxu1 %v1052_v38  ;;  %v1076_v56 = vor.u32 %v1133_v49, %v1073_v52  ;;  %v1064_v57 = vor.u32 %v1140_v54, %v1063_v53  ;;  %v1007_v60 = vld [vmem:[%s1425_s6 + $0x28] sm:$0xf]  ;;  %v1068_v61 = vor.u32 %v1132_v58, %v1065_v59  ;;  %v1117_v63 = vld [vmem:[%s1425_s6 + $0x2c] sm:$0xf]  ;;  %v999_v3 = vld [vmem:[%s1425_s6 + $0x20] sm:$0xf] }
  0x33   : > { %v1125_v62 = vld [vmem:[%s1425_s6 + $0x64] sm:$0xf0]  ;;  %v1009_v0 = vld [vmem:[%s1425_s6 + $0x68] sm:$0xf0]  ;;  %v1124_v4 = vld [vmem:[%s1425_s6 + $0x5c] sm:$0xf0] }
  0x34   : > { %v1008_v1 = vor.u32 %v1125_v62, %v1007_v60  ;;  %v1012_v2 = vor.u32 %v1117_v63, %v1009_v0  ;;  %v1116_v5 = vld [vmem:[%s1425_s6 + $0x24] sm:$0xf]  ;;  %562 = vmatpush.bf16.msrb.mxu0 %v984_v50  ;;  %v1000_v7 = vor.u32 %v1124_v4, %v999_v3  ;;  %v1087_v9 = vld [vmem:[%s1425_s6 + $0xb8] sm:$0xf]  ;;  %v1135_v11 = vld [vmem:[%s1425_s6 + $0xbc] sm:$0xf] }
  0x35   : > { %588 = vmatpush.bf16.msrb.mxu2 %v992_v39  ;;  %v1001_v6 = vld [vmem:[%s1425_s6 + $0x60] sm:$0xf0]  ;;  %v1143_v10 = vld [vmem:[%s1425_s6 + $0xf4] sm:$0xf0]  ;;  %v1089_v12 = vld [vmem:[%s1425_s6 + $0xf8] sm:$0xf0] }
  0x36   : > { %601 = vmatpush.bf16.msrb.mxu3 %v996_v43  ;;  %575 = vmatpush.bf16.msrb.mxu1 %v988_v55  ;;  %v1004_v8 = vor.u32 %v1116_v5, %v1001_v6  ;;  %v1079_v13 = vld [vmem:[%s1425_s6 + $0xb0] sm:$0xf]  ;;  %v1134_v15 = vld [vmem:[%s1425_s6 + $0xb4] sm:$0xf]  ;;  %v1088_v17 = vor.u32 %v1143_v10, %v1087_v9  ;;  %v1092_v18 = vor.u32 %v1135_v11, %v1089_v12  ;;  %v1023_v20 = vld [vmem:[%s1425_s6 + $0x38] sm:$0xf] }
  0x37   : > { %v1142_v14 = vld [vmem:[%s1425_s6 + $0xec] sm:$0xf0]  ;;  %v1081_v16 = vld [vmem:[%s1425_s6 + $0xf0] sm:$0xf0]  ;;  %v1127_v21 = vld [vmem:[%s1425_s6 + $0x74] sm:$0xf0] }
  0x38   : > { %613 = vmatpush.bf16.msra.mxu0 %v1064_v57  ;;  %v1080_v19 = vor.u32 %v1142_v14, %v1079_v13  ;;  %v1119_v22 = vld [vmem:[%s1425_s6 + $0x3c] sm:$0xf]  ;;  %v1084_v24 = vor.u32 %v1134_v15, %v1081_v16  ;;  %v1015_v26 = vld [vmem:[%s1425_s6 + $0x30] sm:$0xf]  ;;  %v1118_v28 = vld [vmem:[%s1425_s6 + $0x34] sm:$0xf]  ;;  %v1024_v30 = vor.u32 %v1127_v21, %v1023_v20 }
  0x39   : > { %639 = vmatpush.bf16.msra.mxu2 %v1072_v51  ;;  %v1025_v25 = vld [vmem:[%s1425_s6 + $0x78] sm:$0xf0]  ;;  %v1126_v27 = vld [vmem:[%s1425_s6 + $0x6c] sm:$0xf0]  ;;  %v1017_v29 = vld [vmem:[%s1425_s6 + $0x70] sm:$0xf0] }
  0x3a   : > { %652 = vmatpush.bf16.msra.mxu3 %v1076_v56  ;;  %626 = vmatpush.bf16.msra.mxu1 %v1068_v61  ;;  %v1028_v31 = vor.u32 %v1119_v22, %v1025_v25  ;;  %v1016_v32 = vor.u32 %v1126_v27, %v1015_v26  ;;  %v1020_v33 = vor.u32 %v1118_v28, %v1017_v29  ;;  %v303_v36 = vld [vmem:[%s1431_s10] sm:$0xff]  ;;  %s964_s7 = sshll.u32 %s1313_s15, 4  ;;  %vm793_vm9 = vcmask 1042434  }
  0x3b   : > { %v309_v40 = vperm.slane %v303_v36, 2  ;;  %v310_v41 = vperm.slane %v303_v36, 3  ;;  %v307_v43 = vperm.slane %v303_v36, 0  ;;  %v308_v44 = vperm.slane %v303_v36, 1  ;;  %p263_p13 = scmp.lt.s32.totalorder %s964_s7, 95 }
  0x3c   : > { %614 = vmatpush.bf16.msra.mxu0 %v1000_v7  ;;  %v311_v47 = vperm.slane %v303_v36, 4  ;;  %v312_v49 = vperm.slane %v303_v36, 5  ;;  %v313_v57 = vperm.slane %v303_v36, 6  ;;  %vm789_vm10 = vcmask 1040384  }
  0x3d   : > { %640 = vmatpush.bf16.msra.mxu2 %v1008_v1  ;;  %v314_v1 = vperm.slane %v303_v36, 7  ;;  %s1595_s7 = smov (!%p263_p13, %s964_s7), 95  ;;  %vm797_vm11 = vcmask 1041408   ;;  %vm799_vm12 = vcmask 1044484   ;;  %vm803_vm13 = vcmask 1046534  }
  0x3e   : > { %653 = vmatpush.bf16.msra.mxu3 %v1012_v2  ;;  %627 = vmatpush.bf16.msra.mxu1 %v1004_v8  ;;  %vm807_vm14 = vcmask 1045508   ;;  %vm809_vm15 = vcmask 1043456   ;;  %s1546_s12 = scalar_lea.vmem %s1583_s3, %s1595_s7 }
  0x3f   : > { %1097 = vmatmul.msk.bf16.vlgmr.msrb.gmra.mxu0 %vm499_vm0, %v1456_v23  ;;  %1098 = vmatmul.msk.bf16.vlgmr.msrb.gmra.mxu1 %vm499_vm0, %v1456_v23 }
  0x40   : > { %1099 = vmatmul.msk.bf16.vlgmr.msrb.gmra.mxu2 %vm499_vm0, %v1456_v23  ;;  %665 = vmatpush.bf16.msrb.mxu0 %v1080_v19 }
  0x41   : > { %1100 = vmatmul.msk.bf16.vlgmr.msrb.gmra.mxu3 %vm499_vm0, %v1456_v23  ;;  %691 = vmatpush.bf16.msrb.mxu2 %v1088_v17 }
  0x42   : > { %704 = vmatpush.bf16.msrb.mxu3 %v1092_v18  ;;  %678 = vmatpush.bf16.msrb.mxu1 %v1084_v24 }
  0x44   : > { %666 = vmatpush.bf16.msrb.mxu0 %v1016_v32 }
  0x45   : > { %692 = vmatpush.bf16.msrb.mxu2 %v1024_v30 }
  0x46   : > { %705 = vmatpush.bf16.msrb.mxu3 %v1028_v31  ;;  %679 = vmatpush.bf16.msrb.mxu1 %v1020_v33 }
  0x4f   : > { %1101 = vmatmul.msk.bf16.vlgmr.msra.gmra.mxu0 %vm499_vm0, %v1456_v23  ;;  %1102 = vmatmul.msk.bf16.vlgmr.msra.gmra.mxu1 %vm499_vm0, %v1456_v23 }
  0x50   : > { %1103 = vmatmul.msk.bf16.vlgmr.msra.gmra.mxu2 %vm499_vm0, %v1456_v23 }
  0x51   : > { %1104 = vmatmul.msk.bf16.vlgmr.msra.gmra.mxu3 %vm499_vm0, %v1456_v23 }
  0x5f   : > { %1105 = vmatmul.msk.bf16.vlgmr.msrb.gmra.mxu0 %vm499_vm0, %v1456_v23  ;;  %1106 = vmatmul.msk.bf16.vlgmr.msrb.gmra.mxu1 %vm499_vm0, %v1456_v23 }
  0x60   : > { %1107 = vmatmul.msk.bf16.vlgmr.msrb.gmra.mxu2 %vm499_vm0, %v1456_v23 }
  0x61   : > { %1108 = vmatmul.msk.bf16.vlgmr.msrb.gmra.mxu3 %vm499_vm0, %v1456_v23 }
  0xac   : > { %v512_v34 = vpop.f32.mrf.mxu0  ;;  %v525_v35 = vpop.f32.mrf.mxu1 }
  0xad   : > { %v513_v48 = vadd.f32 %v512_v34, %v307_v43  ;;  %v526_v50 = vadd.f32 %v525_v35, %v308_v44 }
  0xaf   : > { %vm711_vm1 = vcmp.gt.f32.partialorder %v513_v48, 0.0  ;;  %v727_v59 = vmul.f32 0.01, %v513_v48  ;;  %v728_v60 = vmul.f32 0.01, %v526_v50  ;;  %vm712_vm4 = vcmp.gt.f32.partialorder %v526_v50, 0.0 }
  0xb1   : > { %v743_v2 = vsel %vm711_vm1, %v513_v48, %v727_v59  ;;  %v744_v3 = vsel %vm712_vm4, %v526_v50, %v728_v60 }
  0xb2   : > { %v759_v13 = vpack.c.bf16 %v744_v3, %v743_v2 }
  0xb3   : > { %v538_v37 = vpop.f32.mrf.mxu2 }
  0xb4   : > { %v551_v38 = vpop.f32.mrf.mxu3  ;;  %v514_v39 = vpop.f32.mrf.mxu0  ;;  %v539_v45 = vadd.f32 %v538_v37, %v309_v40  ;;  %v775_v21 = vrot.slane %v759_v13, 3 }
  0xb5   : > { %v527_v42 = vpop.f32.mrf.mxu1  ;;  %v552_v46 = vadd.f32 %v551_v38, %v310_v41  ;;  %v304_v39 = vld [vmem:[%s1431_s10 + $0x8] sm:$0xff] }
  0xb6   : > { %v729_v53 = vmul.f32 0.01, %v539_v45  ;;  %vm713_vm2 = vcmp.gt.f32.partialorder %v539_v45, 0.0  ;;  %v792_v33 = vsel %vm789_vm10, %v759_v13, %v775_v21  ;;  %v317_v43 = vperm.slane %v304_v39, 2 }
  0xb7   : > { %v730_v54 = vmul.f32 0.01, %v552_v46  ;;  %vm714_vm3 = vcmp.gt.f32.partialorder %v552_v46, 0.0  ;;  %v318_v44 = vperm.slane %v304_v39, 3  ;;  %v319_v50 = vperm.slane %v304_v39, 4 }
  0xb8   : > { %v745_v63 = vsel %vm713_vm2, %v539_v45, %v729_v53  ;;  %v321_v60 = vperm.slane %v304_v39, 6 }
  0xb9   : > { %v746_v0 = vsel %vm714_vm3, %v552_v46, %v730_v54  ;;  %v315_v46 = vperm.slane %v304_v39, 0 }
  0xba   : > { %v760_v7 = vpack.c.bf16 %v746_v0, %v745_v63 }
  0xbb   : > { %v540_v51 = vpop.f32.mrf.mxu2 }
  0xbc   : > { %v553_v52 = vpop.f32.mrf.mxu3  ;;  %v564_v23 = vpop.f32.mrf.mxu0  ;;  %v776_v17 = vrot.slane %v760_v7, 6  ;;  %v777_v18 = vrot.slane %v760_v7, 1 }
  0xbd   : > { %v565_v55 = vadd.f32 %v564_v23, %v311_v47  ;;  %v577_v56 = vpop.f32.mrf.mxu1  ;;  %v316_v47 = vperm.slane %v304_v39, 1  ;;  %v320_v52 = vperm.slane %v304_v39, 5 }
  0xbe   : > { %v578_v58 = vadd.f32 %v577_v56, %v312_v49  ;;  %v796_v27 = vsel %vm793_vm9, %v776_v17, %v777_v18 }
  0xbf   : > { %v731_v61 = vmul.f32 0.01, %v565_v55  ;;  %vm715_vm5 = vcmp.gt.f32.partialorder %v565_v55, 0.0  ;;  %v798_v36 = vsel %vm797_vm11, %v792_v33, %v796_v27 }
  0xc0   : > { %vm716_vm6 = vcmp.gt.f32.partialorder %v578_v58, 0.0  ;;  %v732_v62 = vmul.f32 0.01, %v578_v58 }
  0xc1   : > { %v747_v4 = vsel %vm715_vm5, %v565_v55, %v731_v61 }
  0xc2   : > { %v748_v5 = vsel %vm716_vm6, %v578_v58, %v732_v62 }
  0xc3   : > { %v590_v6 = vpop.f32.mrf.mxu2  ;;  %v761_v14 = vpack.c.bf16 %v748_v5, %v747_v4  ;;  %v322_v4 = vperm.slane %v304_v39, 7 }
  0xc4   : > { %v591_v8 = vadd.f32 %v590_v6, %v313_v57  ;;  %v603_v9 = vpop.f32.mrf.mxu3  ;;  %v566_v10 = vpop.f32.mrf.mxu0 }
  0xc5   : > { %v604_v11 = vadd.f32 %v603_v9, %v314_v1  ;;  %v579_v12 = vpop.f32.mrf.mxu1  ;;  %v778_v22 = vrot.slane %v761_v14, 4  ;;  %v779_v24 = vrot.slane %v761_v14, 7 }
  0xc6   : > { %vm717_vm7 = vcmp.gt.f32.partialorder %v591_v8, 0.0  ;;  %v733_v15 = vmul.f32 0.01, %v591_v8 }
  0xc7   : > { %vm718_vm8 = vcmp.gt.f32.partialorder %v604_v11, 0.0  ;;  %v734_v16 = vmul.f32 0.01, %v604_v11  ;;  %v802_v34 = vsel %vm799_vm12, %v778_v22, %v779_v24 }
  0xc8   : > { %v749_v19 = vsel %vm717_vm7, %v591_v8, %v733_v15 }
  0xc9   : > { %v750_v20 = vsel %vm718_vm8, %v604_v11, %v734_v16 }
  0xca   : > { %v762_v25 = vpack.c.bf16 %v750_v20, %v749_v19 }
  0xcb   : > { %v592_v26 = vpop.f32.mrf.mxu2 }
  0xcc   : > { %v780_v28 = vrot.slane %v762_v25, 2  ;;  %v781_v29 = vrot.slane %v762_v25, 5  ;;  %v605_v30 = vpop.f32.mrf.mxu3  ;;  %v616_v31 = vpop.f32.mrf.mxu0 }
  0xcd   : > { %v629_v32 = vpop.f32.mrf.mxu1  ;;  %v617_v51 = vadd.f32 %v616_v31, %v315_v46 }
  0xce   : > { %v806_v35 = vsel %vm803_vm13, %v780_v28, %v781_v29  ;;  %v630_v23 = vadd.f32 %v629_v32, %v316_v47 }
  0xcf   : > { %v808_v37 = vsel %vm807_vm14, %v802_v34, %v806_v35  ;;  %vm719_vm0 = vcmp.gt.f32.partialorder %v617_v51, 0.0  ;;  %v735_v62 = vmul.f32 0.01, %v617_v51 }
  0xd0   : > { %v810_v38 = vsel %vm809_vm15, %v798_v36, %v808_v37  ;;  %v736_v63 = vmul.f32 0.01, %v630_v23  ;;  %vm720_vm3 = vcmp.gt.f32.partialorder %v630_v23, 0.0 }
  0xd1   : > { %828 = vst [vmem:[%s1546_s12] sm:$0xff] %v810_v38  ;;  %v751_v5 = vsel %vm719_vm0, %v617_v51, %v735_v62 }
  0xd2   : > { %v752_v6 = vsel %vm720_vm3, %v630_v23, %v736_v63 }
  0xd3   : > { %v642_v40 = vpop.f32.mrf.mxu2  ;;  %v763_v16 = vpack.c.bf16 %v752_v6, %v751_v5 }
  0xd4   : > { %v655_v41 = vpop.f32.mrf.mxu3  ;;  %v618_v42 = vpop.f32.mrf.mxu0  ;;  %v643_v48 = vadd.f32 %v642_v40, %v317_v43 }
  0xd5   : > { %v631_v45 = vpop.f32.mrf.mxu1  ;;  %v656_v49 = vadd.f32 %v655_v41, %v318_v44  ;;  %v782_v25 = vrot.slane %v763_v16, 3 }
  0xd6   : > { %v737_v56 = vmul.f32 0.01, %v643_v48  ;;  %vm721_vm1 = vcmp.gt.f32.partialorder %v643_v48, 0.0 }
  0xd7   : > { %v738_v57 = vmul.f32 0.01, %v656_v49  ;;  %vm722_vm2 = vcmp.gt.f32.partialorder %v656_v49, 0.0  ;;  %v813_v34 = vsel %vm789_vm10, %v763_v16, %v782_v25 }
  0xd8   : > { %v753_v2 = vsel %vm721_vm1, %v643_v48, %v737_v56 }
  0xd9   : > { %v754_v3 = vsel %vm722_vm2, %v656_v49, %v738_v57 }
  0xda   : > { %v764_v10 = vpack.c.bf16 %v754_v3, %v753_v2 }
  0xdb   : > { %v644_v53 = vpop.f32.mrf.mxu2 }
  0xdc   : > { %v657_v54 = vpop.f32.mrf.mxu3  ;;  %v668_v55 = vpop.f32.mrf.mxu0  ;;  %v783_v20 = vrot.slane %v764_v10, 6  ;;  %v784_v21 = vrot.slane %v764_v10, 1 }
  0xdd   : > { %v669_v58 = vadd.f32 %v668_v55, %v319_v50  ;;  %v681_v59 = vpop.f32.mrf.mxu1 }
  0xde   : > { %v682_v61 = vadd.f32 %v681_v59, %v320_v52  ;;  %v816_v30 = vsel %vm793_vm9, %v783_v20, %v784_v21 }
  0xdf   : > { %v739_v0 = vmul.f32 0.01, %v669_v58  ;;  %vm723_vm4 = vcmp.gt.f32.partialorder %v669_v58, 0.0  ;;  %v817_v37 = vsel %vm797_vm11, %v813_v34, %v816_v30 }
  0xe0   : > { %vm724_vm5 = vcmp.gt.f32.partialorder %v682_v61, 0.0  ;;  %v740_v1 = vmul.f32 0.01, %v682_v61 }
  0xe1   : > { %v755_v7 = vsel %vm723_vm4, %v669_v58, %v739_v0 }
  0xe2   : > { %v756_v8 = vsel %vm724_vm5, %v682_v61, %v740_v1 }
  0xe3   : > { %v694_v9 = vpop.f32.mrf.mxu2  ;;  %v765_v17 = vpack.c.bf16 %v756_v8, %v755_v7 }
  0xe4   : > { %v695_v11 = vadd.f32 %v694_v9, %v321_v60  ;;  %v707_v12 = vpop.f32.mrf.mxu3  ;;  %v670_v13 = vpop.f32.mrf.mxu0 }
  0xe5   : > { %v708_v14 = vadd.f32 %v707_v12, %v322_v4  ;;  %v683_v15 = vpop.f32.mrf.mxu1  ;;  %v785_v26 = vrot.slane %v765_v17, 4  ;;  %v786_v27 = vrot.slane %v765_v17, 7 }
  0xe6   : > { %vm725_vm6 = vcmp.gt.f32.partialorder %v695_v11, 0.0  ;;  %v741_v18 = vmul.f32 0.01, %v695_v11 }
  0xe7   : > { %vm726_vm7 = vcmp.gt.f32.partialorder %v708_v14, 0.0  ;;  %v742_v19 = vmul.f32 0.01, %v708_v14  ;;  %v820_v35 = vsel %vm799_vm12, %v785_v26, %v786_v27 }
  0xe8   : > { %v757_v22 = vsel %vm725_vm6, %v695_v11, %v741_v18 }
  0xe9   : > { %v758_v24 = vsel %vm726_vm7, %v708_v14, %v742_v19 }
  0xea   : > { %v766_v28 = vpack.c.bf16 %v758_v24, %v757_v22 }
  0xeb   : > { %v696_v29 = vpop.f32.mrf.mxu2 }
  0xec   : > { %v787_v31 = vrot.slane %v766_v28, 2  ;;  %v788_v32 = vrot.slane %v766_v28, 5  ;;  %v709_v33 = vpop.f32.mrf.mxu3 }
  0xee   : > { %v823_v36 = vsel %vm803_vm13, %v787_v31, %v788_v32 }
  0xef   : > { %v824_v38 = vsel %vm807_vm14, %v820_v35, %v823_v36 }
  0xf0   : > { %v825_v39 = vsel %vm809_vm15, %v817_v37, %v824_v38 }
  0xf1   : > { %829 = vst [vmem:[%s1546_s12 + $0x8] sm:$0xff] %v825_v39 }
  0xf2 PF: > { %s19_s17 = sadd.s32 1, %s1321_s17   ;;  %s1587_s12 = smov %s1305_s13 }
  0xf3   : > { %p16_p0 = scmp.ge.s32.totalorder %s19_s17, 8   ;;  %s1588_s13 = smov %s1309_s14 }
  0xf4   : > { %s1589_s14 = smov %s1395_s24  ;;  %s1590_s15 = smov %s1317_s16 }
  0xf5   : > { %s1591_s16 = smov %s1593_s19  ;;  %18 = sbr.rel (!%p16_p0) target bundleno = 6 (0x6), region = 88 }
  0xfa   :  { %858 = vsyncpa [#allocation3], 1 }
  0xfb   :  { %860 = vsyncpa [#allocation3 + $0x1], 1 }
  0xfc   :  { %861 = vsyncpa [#allocation5], 1 }
  0xfd   :  { %863 = vsyncpa [#allocation5 + $0x1], 1 }

// kernel: _lambda_.5
= control target key start
LH: loop header
LB: loop body
LE: loop exit
PB: predicated region body
PF: predicated region fallthrough
CT: control target
= control target key end

     0   :  { %8 = vsyncpa [#allocation3], 0  ;;  %s4064_s0 = inlined_call_operand.vmem [shape: bf16[2,8,1892], index: 0, kind: input, shape index: {}]   ;;  %s4065_s1 = inlined_call_operand.hbm [shape: bf16[3,3,3,8], index: 1, kind: input, shape index: {}]   ;;  %s4066_s2 = inlined_call_operand.hbm [shape: f32[3,1], index: 2, kind: input, shape index: {}]   ;;  %s4067_s3 = inlined_call_operand.vmem [shape: f32[2,4,3,1806], index: 3, kind: output, shape index: {}]  }
   0x1   :  { %9 = vsyncpa [#allocation5], 0  ;;  %s3014_s12 = smov 0  }
   0x2 LB: > { %s125_s15 = sshll.u32 %s4065_s1, 4  ;;  %s2700_s16 = sadd.s32 4294967295, %s2984_s12   ;;  %s2984_s12 = sphi %s3014_s12, %s15_s12   ;;  %s126_s15 = int_to_ptr.hbm [resolvable:$true] %s125_s15 }
   0x3   : > { %p2702_p0 = scmp.ge.s32.totalorder %s2984_s12, 1  ;;  %p114_p1 = scmp.lt.s32.totalorder %s2984_s12, 3 }
   0x4   : > { %p2889_p2 = scmp.eq.s32.totalorder %s2700_s16, 0  ;;  %s2986_s18 = smov [#allocation2]  }
   0x5   : > { %p3025_p3 = pnand %p2702_p0, %p114_p1  ;;  %s127_s19 = sshll.u32 %s2986_s18, 4  ;;  %s128_s19 = int_to_ptr.vmem [resolvable:$true] %s127_s19 }
   0x6   : > { %s140_s22 = sshll.u32 %s4066_s2, 4  ;;  %s2987_s23 = smov [#allocation4]   ;;  %s141_s22 = int_to_ptr.hbm [resolvable:$true] %s140_s22 }
   0x7   : > { %p2882_p4 = pneg %p3025_p3  ;;  %s142_s24 = sshll.u32 %s2987_s23, 4  ;;  %s143_s24 = int_to_ptr.vmem [resolvable:$true] %s142_s24 }
   0x8   : > { %s2988_s25 = smov 32   ;;  %s2989_s26 = smov 2  }
   0x9   : > { %p2883_p5 = pnand %p2889_p2, %p2882_p4  ;;  %163 = sbr.rel (%p3025_p3) target bundleno = 825 (0x339), region = 32 }
   0xb   : > { %2885 = dma.hbm_to_vmem [thread:$0]  (!%p2883_p5), %s126_s15, 288, %s128_s19, [#allocation3], %s2988_s25, %s2988_s25, %s2989_s26  }
   0xc   : > { %2888 = dma.hbm_to_vmem [thread:$0]  (!%p2883_p5), %s141_s22, 64, %s143_s24, [#allocation5]  }
   0xe   : > { %2975 = dma.done.wait (%p2889_p2), [#allocation3], 288  }
   0xf   : > { %2977 = vsyncadd (%p2889_p2), [#allocation3], 4294967008 }
  0x10   : > { %2979 = dma.done.wait (%p2889_p2), [#allocation5], 64  }
  0x11   : > { %2981 = vsyncadd (%p2889_p2), [#allocation5], 4294967232  ;;  %p193_p6 = scmp.lt.s32.totalorder %s2700_s16, 1  ;;  %s2990_s4 = smov 127   ;;  %vm284_vm0 = vcmask 1039360   ;;  %vm303_vm1 = vcmask 1043456  }
  0x12   : > { %s2991_s5 = smov 85   ;;  %s2992_s6 = smov 84   ;;  %v3165_v54 = vld [vmem:[#allocation2 + $0x4] sm:$0x3]  ;;  %vm299_vm2 = vcmask 64512   ;;  %vm819_vm3 = vcmask 695296  }
  0x13   : > { %s4097_s16 = smov (!%p193_p6, %s2700_s16), 1  ;;  %vm1124_vm4 = vcmask 687104   ;;  %vm1459_vm5 = vcmask 108544  }
  0x14   : > { %s2872_s27 = smul.u32 60, %s4097_s16 }
  0x15   : > { %s2873_s7 = smul.u32 240, %s4097_s16 }
  0x16   : > { %s3047_s30 = scalar_lea.vmem %s4064_s0, %s2872_s27 }
  0x17   : > { %v205_v0 = vld [vmem:[%s3047_s30 + $0x8] sm:$0xff]  ;;  %v204_v1 = vld [vmem:[%s3047_s30] sm:$0xff]  ;;  %v206_v4 = vld [vmem:[%s3047_s30 + $0x10] sm:$0xff]  ;;  %s3704_s10 = scalar_lea.vmem %s4067_s3, %s2873_s7 }
  0x18   : > { %v226_v2 = vunpack.c.l.b16 %v205_v0  ;;  %v224_v3 = vunpack.c.l.b16 %v204_v1  ;;  %v228_v5 = vunpack.c.l.b16 %v206_v4  ;;  %v227_v9 = vunpack.c.h.b16 %v205_v0  ;;  %v207_v11 = vld [vmem:[%s3047_s30 + $0x18] sm:$0xff]  ;;  %v208_v16 = vld [vmem:[%s3047_s30 + $0x20] sm:$0xff]  ;;  %v209_v22 = vld [vmem:[%s3047_s30 + $0x28] sm:$0xff] }
  0x19   : > { %v225_v10 = vunpack.c.h.b16 %v204_v1  ;;  %v230_v12 = vunpack.c.l.b16 %v207_v11  ;;  %v231_v17 = vunpack.c.h.b16 %v207_v11  ;;  %v229_v18 = vunpack.c.h.b16 %v206_v4  ;;  %v210_v29 = vld [vmem:[%s3047_s30 + $0x30] sm:$0xff]  ;;  %v211_v30 = vld [vmem:[%s3047_s30 + $0x38] sm:$0xf] }
  0x1a   : > { %v3052_v6 = vpack.c.b16 %v226_v2, %v226_v2  ;;  %v3054_v7 = vpack.c.b16 %v224_v3, %v224_v3  ;;  %v3056_v8 = vpack.c.b16 %v228_v5, %v228_v5  ;;  %v3065_v13 = vpack.c.b16 %v227_v9, %v227_v9 }
  0x1b   : > { %v3067_v14 = vpack.c.b16 %v225_v10, %v225_v10  ;;  %v3069_v15 = vpack.c.b16 %v230_v12, %v230_v12  ;;  %v232_v19 = vunpack.c.l.b16 %v208_v16  ;;  %v3078_v20 = vpack.c.b16 %v231_v17, %v231_v17 }
  0x1c   : > { %258 = vrot.lane.b32.xlu0 %v3052_v6, %s2990_s4  ;;  %254 = vrot.lane.b32.xlu1 %v3054_v7, %s2990_s4  ;;  %v3080_v21 = vpack.c.b16 %v229_v18, %v229_v18  ;;  %v234_v24 = vunpack.c.l.b16 %v209_v22  ;;  %v235_v25 = vunpack.c.h.b16 %v209_v22  ;;  %v233_v26 = vunpack.c.h.b16 %v208_v16 }
  0x1d   : > { %262 = vrot.lane.b32.xlu2 %v3056_v8, %s2990_s4  ;;  %v3083_v23 = vpack.c.b16 %v232_v19, %v232_v19  ;;  %v236_v32 = vunpack.c.l.b16 %v210_v29  ;;  %v238_v33 = vunpack.c.l.b16 %v211_v30  ;;  %v237_v34 = vunpack.c.h.b16 %v210_v29 }
  0x1e   : > { %v3091_v27 = vpack.c.b16 %v234_v24, %v234_v24  ;;  %v3093_v28 = vpack.c.b16 %v235_v25, %v235_v25  ;;  %v3097_v31 = vpack.c.b16 %v233_v26, %v233_v26  ;;  %v548_v18 = vsel %vm303_vm1, %v3054_v7, 0 }
  0x1f   : > { %v3105_v35 = vpack.c.b16 %v236_v32, %v236_v32  ;;  %v3107_v36 = vpack.c.b16 %v238_v33, %v238_v33  ;;  %v3109_v37 = vpack.c.b16 %v237_v34, %v237_v34  ;;  %v551_v32 = vsel %vm303_vm1, %v3067_v14, 0 }
  0x20   : > { %v554_v33 = vsel %vm303_vm1, %v3052_v6, 0  ;;  %v560_v34 = vsel %vm303_vm1, %v3056_v8, 0 }
  0x24   : > { %260 = vrot.lane.b32.xlu0 %v3065_v13, %s2990_s4  ;;  %256 = vrot.lane.b32.xlu1 %v3067_v14, %s2990_s4 }
  0x25   : > { %266 = vrot.lane.b32.xlu2 %v3069_v15, %s2990_s4 }
  0x2c   : > { %268 = vrot.lane.b32.xlu0 %v3078_v20, %s2990_s4  ;;  %264 = vrot.lane.b32.xlu1 %v3080_v21, %s2990_s4 }
  0x2d   : > { %270 = vrot.lane.b32.xlu2 %v3083_v23, %s2990_s4 }
  0x34   : > { %274 = vrot.lane.b32.xlu0 %v3091_v27, %s2990_s4  ;;  %276 = vrot.lane.b32.xlu1 %v3093_v28, %s2990_s4 }
  0x35   : > { %272 = vrot.lane.b32.xlu2 %v3097_v31, %s2990_s4 }
  0x3c   : > { %278 = vrot.lane.b32.xlu0 %v3105_v35, %s2990_s4  ;;  %282 = vrot.lane.b32.xlu1 %v3107_v36, %s2990_s4 }
  0x3d   : > { %280 = vrot.lane.b32.xlu2 %v3109_v37, %s2990_s4 }
  0x44   : > { %789 = vrot.lane.b32.xlu0 %v3054_v7, %s2991_s5  ;;  %791 = vrot.lane.b32.xlu1 %v3067_v14, %s2991_s5 }
  0x45   : > { %793 = vrot.lane.b32.xlu2 %v3052_v6, %s2991_s5 }
  0x4c   : > { %797 = vrot.lane.b32.xlu0 %v3056_v8, %s2991_s5  ;;  %799 = vrot.lane.b32.xlu1 %v3080_v21, %s2991_s5 }
  0x4d   : > { %795 = vrot.lane.b32.xlu2 %v3065_v13, %s2991_s5 }
  0x54   : > { %801 = vrot.lane.b32.xlu0 %v3069_v15, %s2991_s5  ;;  %805 = vrot.lane.b32.xlu1 %v3083_v23, %s2991_s5 }
  0x55   : > { %807 = vrot.lane.b32.xlu2 %v3097_v31, %s2991_s5 }
  0x5c   : > { %803 = vrot.lane.b32.xlu0 %v3078_v20, %s2991_s5  ;;  %809 = vrot.lane.b32.xlu1 %v3091_v27, %s2991_s5 }
  0x5d   : > { %813 = vrot.lane.b32.xlu2 %v3105_v35, %s2991_s5 }
  0x64   : > { %811 = vrot.lane.b32.xlu1 %v3093_v28, %s2991_s5  ;;  %815 = vrot.lane.b32.xlu0 %v3109_v37, %s2991_s5 }
  0x65   : > { %817 = vrot.lane.b32.xlu2 %v3107_v36, %s2991_s5 }
  0x6c   : > { %1096 = vrot.lane.b32.xlu0 %v3067_v14, %s2992_s6  ;;  %1098 = vrot.lane.b32.xlu1 %v3052_v6, %s2992_s6  ;;  %v569_v14 = vsel %vm303_vm1, %v3078_v20, 0  ;;  %v563_v6 = vsel %vm303_vm1, %v3080_v21, 0 }
  0x6d   : > { %1094 = vrot.lane.b32.xlu2 %v3054_v7, %s2992_s6  ;;  %v557_v7 = vsel %vm303_vm1, %v3065_v13, 0 }
  0x74   : > { %1100 = vrot.lane.b32.xlu0 %v3065_v13, %s2992_s6  ;;  %1104 = vrot.lane.b32.xlu1 %v3080_v21, %s2992_s6  ;;  %v3257_v13 = vld [vmem:[#allocation2] sm:$0x3]  ;;  %v575_v21 = vsel %vm303_vm1, %v3097_v31, 0 }
  0x75   : > { %1106 = vrot.lane.b32.xlu2 %v3069_v15, %s2992_s6 }
  0x77   : > { %v263_v38 = vpop.permute.xlu2 %262 }
  0x7c   : > { %1102 = vrot.lane.b32.xlu0 %v3056_v8, %s2992_s6  ;;  %1108 = vrot.lane.b32.xlu1 %v3078_v20, %s2992_s6  ;;  %v566_v8 = vsel %vm303_vm1, %v3069_v15, 0  ;;  %v581_v20 = vsel %vm303_vm1, %v3093_v28, 0  ;;  %v578_v15 = vsel %vm303_vm1, %v3091_v27, 0 }
  0x7d   : > { %1112 = vrot.lane.b32.xlu2 %v3097_v31, %s2992_s6 }
  0x7f   : > { %v267_v39 = vpop.permute.xlu2 %266 }
  0x84   : > { %1110 = vrot.lane.b32.xlu1 %v3083_v23, %s2992_s6  ;;  %1114 = vrot.lane.b32.xlu0 %v3091_v27, %s2992_s6 }
  0x85   : > { %1116 = vrot.lane.b32.xlu2 %v3093_v28, %s2992_s6 }
  0x87   : > { %v271_v42 = vpop.permute.xlu2 %270 }
  0x8c   : > { %1120 = vrot.lane.b32.xlu0 %v3109_v37, %s2992_s6  ;;  %1122 = vrot.lane.b32.xlu1 %v3107_v36, %s2992_s6 }
  0x8d   : > { %1118 = vrot.lane.b32.xlu2 %v3105_v35, %s2992_s6 }
  0x8e   : > { %v259_v40 = vpop.permute.xlu0 %258  ;;  %v255_v41 = vpop.permute.xlu1 %254 }
  0x8f   : > { %v273_v53 = vpop.permute.xlu2 %272 }
  0x90   : > { %v293_v55 = vsel %vm284_vm0, %v271_v42, %v273_v53 }
  0x91   : > { %v3179_v58 = vsel %vm303_vm1, %v293_v55, 0 }
  0x96   : > { %v261_v43 = vpop.permute.xlu0 %260  ;;  %v257_v44 = vpop.permute.xlu1 %256 }
  0x97   : > { %v285_v45 = vsel %vm284_vm0, %v255_v41, %v257_v44  ;;  %v286_v46 = vsel %vm284_vm0, %v257_v44, %v259_v40  ;;  %v287_v47 = vsel %vm284_vm0, %v259_v40, %v261_v43  ;;  %v288_v48 = vsel %vm284_vm0, %v261_v43, %v263_v38  ;;  %v281_v12 = vpop.permute.xlu2 %280 }
  0x98   : > { %v3152_v49 = vsel %vm303_vm1, %v285_v45, 0  ;;  %v3155_v50 = vsel %vm303_vm1, %v286_v46, 0  ;;  %v3158_v51 = vsel %vm303_vm1, %v287_v47, 0  ;;  %v3161_v52 = vsel %vm303_vm1, %v288_v48, 0 }
  0x99   : > { %356 = vmatpush.bf16.msra.mxu0 %v3152_v49  ;;  %369 = vmatpush.bf16.msra.mxu1 %v3155_v50  ;;  %v587_v43 = vsel %vm303_vm1, %v3109_v37, 0  ;;  %v590_v44 = vsel %vm303_vm1, %v3107_v36, 0 }
  0x9a   : > { %382 = vmatpush.bf16.msra.mxu2 %v3158_v51  ;;  %395 = vmatpush.bf16.msra.mxu3 %v3161_v52 }
  0x9c   : > { %2711 = vmatmul.msk.bf16.vlgmr.msra.gmra.mxu0 %vm299_vm2, %v3165_v54  ;;  %2712 = vmatmul.msk.bf16.vlgmr.msra.gmra.mxu1 %vm299_vm2, %v3165_v54 }
  0x9d   : > { %2713 = vmatmul.msk.bf16.vlgmr.msra.gmra.mxu2 %vm299_vm2, %v3165_v54  ;;  %2714 = vmatmul.msk.bf16.vlgmr.msra.gmra.mxu3 %vm299_vm2, %v3165_v54 }
  0x9e   : > { %v269_v56 = vpop.permute.xlu0 %268  ;;  %v265_v57 = vpop.permute.xlu1 %264 }
  0x9f   : > { %v289_v59 = vsel %vm284_vm0, %v263_v38, %v265_v57  ;;  %v290_v60 = vsel %vm284_vm0, %v265_v57, %v267_v39  ;;  %v291_v61 = vsel %vm284_vm0, %v267_v39, %v269_v56  ;;  %v292_v62 = vsel %vm284_vm0, %v269_v56, %v271_v42  ;;  %v794_v31 = vpop.permute.xlu2 %793 }
  0xa0   : > { %v3186_v63 = vsel %vm303_vm1, %v289_v59, 0  ;;  %v3189_v0 = vsel %vm303_vm1, %v290_v60, 0  ;;  %v3192_v1 = vsel %vm303_vm1, %v291_v61, 0  ;;  %v3195_v2 = vsel %vm303_vm1, %v292_v62, 0 }
  0xa1   : > { %408 = vmatpush.bf16.msrb.mxu0 %v3186_v63  ;;  %421 = vmatpush.bf16.msrb.mxu1 %v3189_v0  ;;  %v572_v38 = vsel %vm303_vm1, %v3083_v23, 0  ;;  %v584_v23 = vsel %vm303_vm1, %v3105_v35, 0 }
  0xa2   : > { %434 = vmatpush.bf16.msrb.mxu2 %v3192_v1  ;;  %447 = vmatpush.bf16.msrb.mxu3 %v3195_v2 }
  0xa5   : > { %460 = vmatpush.bf16.msra.mxu0 %v3179_v58 }
  0xa6   : > { %v275_v3 = vpop.permute.xlu0 %274  ;;  %v277_v4 = vpop.permute.xlu1 %276 }
  0xa7   : > { %v294_v5 = vsel %vm284_vm0, %v273_v53, %v275_v3  ;;  %v295_v9 = vsel %vm284_vm0, %v275_v3, %v277_v4  ;;  %v796_v46 = vpop.permute.xlu2 %795 }
  0xa8   : > { %v3205_v10 = vsel %vm303_vm1, %v294_v5, 0  ;;  %v3208_v11 = vsel %vm303_vm1, %v295_v9, 0  ;;  %v822_v37 = vsel %vm819_vm3, %v794_v31, %v796_v46 }
  0xa9   : > { %473 = vmatpush.bf16.msra.mxu1 %v3205_v10  ;;  %486 = vmatpush.bf16.msra.mxu2 %v3208_v11 }
  0xac   : > { %2715 = vmatmul.msk.bf16.vlgmr.msrb.gmra.mxu0 %vm299_vm2, %v3165_v54  ;;  %2716 = vmatmul.msk.bf16.vlgmr.msrb.gmra.mxu1 %vm299_vm2, %v3165_v54 }
  0xad   : > { %2717 = vmatmul.msk.bf16.vlgmr.msrb.gmra.mxu2 %vm299_vm2, %v3165_v54  ;;  %2718 = vmatmul.msk.bf16.vlgmr.msrb.gmra.mxu3 %vm299_vm2, %v3165_v54 }
  0xae   : > { %v279_v16 = vpop.permute.xlu0 %278  ;;  %v283_v17 = vpop.permute.xlu1 %282 }
  0xaf   : > { %v296_v19 = vsel %vm284_vm0, %v277_v4, %v279_v16  ;;  %v297_v22 = vsel %vm284_vm0, %v279_v16, %v281_v12  ;;  %v298_v24 = vsel %vm284_vm0, %v281_v12, %v283_v17  ;;  %v3226_v25 = vsel %vm303_vm1, %v283_v17, 0  ;;  %v808_v60 = vpop.permute.xlu2 %807  ;;  %v3345_v12 = vld [vmem:[#allocation2 + $0xc] sm:$0x3] }
  0xb0   : > { %v3229_v26 = vsel %vm303_vm1, %v296_v19, 0  ;;  %v3232_v29 = vsel %vm303_vm1, %v297_v22, 0  ;;  %v3235_v30 = vsel %vm303_vm1, %v298_v24, 0  ;;  %538 = vmatpush.bf16.msrb.mxu2 %v3226_v25 }
  0xb1   : > { %499 = vmatpush.bf16.msra.mxu3 %v3229_v26  ;;  %512 = vmatpush.bf16.msrb.mxu0 %v3232_v29 }
  0xb2   : > { %525 = vmatpush.bf16.msrb.mxu1 %v3235_v30 }
  0xb5   : > { %599 = vmatpush.bf16.msrb.mxu3 %v548_v18 }
  0xb6   : > { %v790_v28 = vpop.permute.xlu0 %789  ;;  %v792_v39 = vpop.permute.xlu1 %791 }
  0xb7   : > { %v820_v40 = vsel %vm819_vm3, %v790_v28, %v792_v39  ;;  %v821_v27 = vsel %vm819_vm3, %v792_v39, %v794_v31  ;;  %v814_v22 = vpop.permute.xlu2 %813 }
  0xb8   : > { %v3294_v35 = vsel %vm303_vm1, %v820_v40, 0  ;;  %v3297_v41 = vsel %vm303_vm1, %v821_v27, 0 }
  0xbc   : > { %2719 = vmatmul.msk.bf16.vlgmr.msra.gmra.mxu0 %vm299_vm2, %v3165_v54  ;;  %2720 = vmatmul.msk.bf16.vlgmr.msra.gmra.mxu1 %vm299_vm2, %v3165_v54 }
  0xbd   : > { %2721 = vmatmul.msk.bf16.vlgmr.msra.gmra.mxu2 %vm299_vm2, %v3165_v54  ;;  %2722 = vmatmul.msk.bf16.vlgmr.msra.gmra.mxu3 %vm299_vm2, %v3165_v54 }
  0xbe   : > { %638 = vmatpush.bf16.msra.mxu2 %v557_v7  ;;  %612 = vmatpush.bf16.msra.mxu0 %v551_v32  ;;  %v798_v42 = vpop.permute.xlu0 %797  ;;  %v800_v45 = vpop.permute.xlu1 %799 }
  0xbf   : > { %625 = vmatpush.bf16.msra.mxu1 %v554_v33  ;;  %651 = vmatpush.bf16.msra.mxu3 %v560_v34  ;;  %v823_v48 = vsel %vm819_vm3, %v796_v46, %v798_v42  ;;  %v824_v36 = vsel %vm819_vm3, %v798_v42, %v800_v45  ;;  %v818_v32 = vpop.permute.xlu2 %817 }
  0xc0   : > { %v3321_v55 = vsel %vm303_vm1, %v823_v48, 0  ;;  %v3328_v56 = vsel %vm303_vm1, %v824_v36, 0 }
  0xc6   : > { %v802_v47 = vpop.permute.xlu0 %801  ;;  %v806_v59 = vpop.permute.xlu1 %805 }
  0xc7   : > { %v825_v53 = vsel %vm819_vm3, %v800_v45, %v802_v47  ;;  %v828_v5 = vsel %vm819_vm3, %v806_v59, %v808_v60  ;;  %v1095_v42 = vpop.permute.xlu2 %1094 }
  0xc8   : > { %v3331_v57 = vsel %vm303_vm1, %v825_v53, 0  ;;  %v3358_v18 = vsel %vm303_vm1, %v828_v5, 0  ;;  %v3415_v53 = vsel %vm303_vm1, %v818_v32, 0 }
  0xc9   : > { %4080 = vst [vmem:[#allocation10_spill] sm:$0xff] %v3358_v18 }
  0xca   : > { %4086 = vst [vmem:[#allocation16_spill] sm:$0xff] %v3415_v53 }
  0xcc   : > { %2723 = vmatmul.msk.bf16.vlgmr.msrb.gmra.mxu0 %vm299_vm2, %v3165_v54  ;;  %2724 = vmatmul.msk.bf16.vlgmr.msrb.gmra.mxu1 %vm299_vm2, %v3165_v54 }
  0xcd   : > { %2725 = vmatmul.msk.bf16.vlgmr.msrb.gmra.mxu2 %vm299_vm2, %v3165_v54  ;;  %2726 = vmatmul.msk.bf16.vlgmr.msrb.gmra.mxu3 %vm299_vm2, %v3257_v13  ;;  %v3318_v54 = vsel %vm303_vm1, %v822_v37, 0 }
  0xce   : > { %690 = vmatpush.bf16.msrb.mxu2 %v569_v14  ;;  %664 = vmatpush.bf16.msrb.mxu0 %v563_v6  ;;  %v804_v61 = vpop.permute.xlu0 %803  ;;  %v810_v62 = vpop.permute.xlu1 %809 }
  0xcf   : > { %677 = vmatpush.bf16.msrb.mxu1 %v566_v8  ;;  %703 = vmatpush.bf16.msrb.mxu3 %v572_v38  ;;  %v826_v3 = vsel %vm819_vm3, %v802_v47, %v804_v61  ;;  %v827_v4 = vsel %vm819_vm3, %v804_v61, %v806_v59  ;;  %v829_v9 = vsel %vm819_vm3, %v808_v60, %v810_v62 }
  0xd0   : > { %v3348_v16 = vsel %vm303_vm1, %v826_v3, 0  ;;  %v3351_v17 = vsel %vm303_vm1, %v827_v4, 0  ;;  %v3361_v19 = vsel %vm303_vm1, %v829_v9, 0 }
  0xd1   : > { %4078 = vst [vmem:[#allocation8_spill] sm:$0xff] %v3348_v16 }
  0xd2   : > { %4079 = vst [vmem:[#allocation9_spill] sm:$0xff] %v3351_v17 }
  0xd3   : > { %4081 = vst [vmem:[#allocation11_spill] sm:$0xff] %v3361_v19 }
  0xd6   : > { %v816_v24 = vpop.permute.xlu0 %815  ;;  %v812_v7 = vpop.permute.xlu1 %811 }
  0xd7   : > { %v830_v33 = vsel %vm819_vm3, %v810_v62, %v812_v7  ;;  %v831_v34 = vsel %vm819_vm3, %v812_v7, %v814_v22  ;;  %v832_v6 = vsel %vm819_vm3, %v814_v22, %v816_v24  ;;  %v833_v8 = vsel %vm819_vm3, %v816_v24, %v818_v32  ;;  %v1107_v22 = vpop.permute.xlu2 %1106 }
  0xd8   : > { %v3380_v38 = vsel %vm303_vm1, %v830_v33, 0 }
  0xd9   : > { %4082 = vst [vmem:[#allocation12_spill] sm:$0xff] %v3380_v38 }
  0xdc   : > { %2727 = vmatmul.msk.bf16.vlgmr.msra.gmra.mxu0 %vm299_vm2, %v3257_v13  ;;  %2728 = vmatmul.msk.bf16.vlgmr.msra.gmra.mxu1 %vm299_vm2, %v3257_v13 }
  0xdd   : > { %2729 = vmatmul.msk.bf16.vlgmr.msra.gmra.mxu2 %vm299_vm2, %v3257_v13  ;;  %2730 = vmatmul.msk.bf16.vlgmr.msra.gmra.mxu3 %vm299_vm2, %v3257_v13 }
  0xde   : > { %742 = vmatpush.bf16.msra.mxu2 %v581_v20  ;;  %716 = vmatpush.bf16.msra.mxu0 %v575_v21  ;;  %v3383_v20 = vsel %vm303_vm1, %v831_v34, 0  ;;  %v3390_v21 = vsel %vm303_vm1, %v832_v6, 0  ;;  %v1099_v27 = vpop.permute.xlu1 %1098 }
  0xdf   : > { %729 = vmatpush.bf16.msra.mxu1 %v578_v15  ;;  %755 = vmatpush.bf16.msra.mxu3 %v584_v23  ;;  %4083 = vst [vmem:[#allocation13_spill] sm:$0xff] %v3383_v20  ;;  %v3393_v15 = vsel %vm303_vm1, %v833_v8, 0  ;;  %v1097_v23 = vpop.permute.xlu0 %1096  ;;  %v212_v8 = vld [vmem:[#allocation4] sm:$0x7] }
  0xe0   : > { %4084 = vst [vmem:[#allocation14_spill] sm:$0xff] %v3390_v21  ;;  %v1125_v46 = vsel %vm1124_vm4, %v1095_v42, %v1097_v23  ;;  %v1126_v48 = vsel %vm1124_vm4, %v1097_v23, %v1099_v27  ;;  %v2993_v42 = vmov 0  }
  0xe1   : > { %4085 = vst [vmem:[#allocation15_spill] sm:$0xff] %v3393_v15  ;;  %v3418_v59 = vsel %vm303_vm1, %v1125_v46, 0  ;;  %v3425_v60 = vsel %vm303_vm1, %v1126_v48, 0  ;;  %2909 = vset.pattern.permute.xlu0 %v2993_v42  ;;  %v1113_v48 = vpop.permute.xlu2 %1112  ;;  %v3484_v42 = vld [vmem:[#allocation2 + $0x10] sm:$0x3] }
  0xe2   : > { %1399 = vperm.xlu0 %2909, %v212_v8  }
  0xe6   : > { %v1105_v62 = vpop.permute.xlu1 %1104 }
  0xec   : > { %2731 = vmatmul.msk.bf16.vlgmr.msrb.gmra.mxu0 %vm299_vm2, %v3257_v13  ;;  %2732 = vmatmul.msk.bf16.vlgmr.msrb.gmra.mxu1 %vm299_vm2, %v3257_v13 }
  0xed   : > { %2733 = vmatmul.msk.bf16.vlgmr.msrb.gmra.mxu2 %vm299_vm2, %v3257_v13  ;;  %2734 = vmatmul.msk.bf16.vlgmr.msrb.gmra.mxu3 %vm299_vm2, %v3257_v13 }
  0xee   : > { %889 = vmatpush.bf16.msrb.mxu2 %v3294_v35  ;;  %902 = vmatpush.bf16.msrb.mxu3 %v3297_v41  ;;  %v1109_v7 = vpop.permute.xlu1 %1108 }
  0xef   : > { %768 = vmatpush.bf16.msrb.mxu0 %v587_v43  ;;  %781 = vmatpush.bf16.msrb.mxu1 %v590_v44  ;;  %v1101_v43 = vpop.permute.xlu0 %1100 }
  0xf0   : > { %v1127_v36 = vsel %vm1124_vm4, %v1099_v27, %v1101_v43  ;;  %v1131_v27 = vsel %vm1124_vm4, %v1107_v22, %v1109_v7 }
  0xf1   : > { %v3428_v61 = vsel %vm303_vm1, %v1127_v36, 0  ;;  %v3464_v46 = vsel %vm303_vm1, %v1131_v27, 0 }
  0xf7   : > { %v1103_v24 = vpop.permute.xlu0 %1102 }
  0xf8   : > { %v1128_v34 = vsel %vm1124_vm4, %v1101_v43, %v1103_v24  ;;  %v1129_v6 = vsel %vm1124_vm4, %v1103_v24, %v1105_v62  ;;  %v1117_v24 = vpop.permute.xlu2 %1116 }
  0xfc   : > { %2735 = vmatmul.msk.bf16.vlgmr.msra.gmra.mxu0 %vm299_vm2, %v3257_v13  ;;  %2736 = vmatmul.msk.bf16.vlgmr.msra.gmra.mxu1 %vm299_vm2, %v3257_v13 }
  0xfd   : > { %2737 = vmatmul.msk.bf16.vlgmr.msra.gmra.mxu2 %vm299_vm2, %v3257_v13  ;;  %2738 = vmatmul.msk.bf16.vlgmr.msra.gmra.mxu3 %vm299_vm2, %v3257_v13 }
  0xfe   : > { %915 = vmatpush.bf16.msra.mxu0 %v3318_v54  ;;  %928 = vmatpush.bf16.msra.mxu1 %v3321_v55 }
  0xff   : > { %941 = vmatpush.bf16.msra.mxu2 %v3328_v56  ;;  %954 = vmatpush.bf16.msra.mxu3 %v3331_v57 }
 0x10c   : > { %2739 = vmatmul.msk.bf16.vlgmr.msrb.gmra.mxu0 %vm299_vm2, %v3257_v13  ;;  %2740 = vmatmul.msk.bf16.vlgmr.msrb.gmra.mxu1 %vm299_vm2, %v3257_v13 }
 0x10d   : > { %2741 = vmatmul.msk.bf16.vlgmr.msrb.gmra.mxu2 %vm299_vm2, %v3345_v12  ;;  %2742 = vmatmul.msk.bf16.vlgmr.msrb.gmra.mxu3 %vm299_vm2, %v3345_v12 }
 0x10e   : > { %967 = vmatpush.bf16.msrb.mxu0 %v3348_v16  ;;  %980 = vmatpush.bf16.msrb.mxu1 %v3351_v17 }
 0x10f   : > { %993 = vmatpush.bf16.msrb.mxu2 %v3358_v18  ;;  %1006 = vmatpush.bf16.msrb.mxu3 %v3361_v19 }
 0x119   : > { %v3373_v13 = vpop.f32.mrf.mxu0  ;;  %v3375_v14 = vpop.f32.mrf.mxu1 }
 0x11c   : > { %2743 = vmatmul.msk.bf16.vlgmr.msra.gmra.mxu0 %vm299_vm2, %v3345_v12  ;;  %2744 = vmatmul.msk.bf16.vlgmr.msra.gmra.mxu1 %vm299_vm2, %v3345_v12 }
 0x11d   : > { %2745 = vmatmul.msk.bf16.vlgmr.msra.gmra.mxu2 %vm299_vm2, %v3345_v12  ;;  %2746 = vmatmul.msk.bf16.vlgmr.msra.gmra.mxu3 %vm299_vm2, %v3345_v12 }
 0x11e   : > { %1019 = vmatpush.bf16.msra.mxu0 %v3380_v38  ;;  %1032 = vmatpush.bf16.msra.mxu1 %v3383_v20 }
 0x11f   : > { %1045 = vmatpush.bf16.msra.mxu2 %v3390_v21  ;;  %1058 = vmatpush.bf16.msra.mxu3 %v3393_v15 }
 0x120   : > { %v3403_v28 = vpop.f32.mrf.mxu2  ;;  %v3405_v31 = vpop.f32.mrf.mxu3 }
 0x121   : > { %v360_v39 = vpop.f32.mrf.mxu0  ;;  %v373_v40 = vpop.f32.mrf.mxu1 }
 0x122   : > { %v1130_v40 = vsel %vm1124_vm4, %v1105_v62, %v1107_v22  ;;  %v1111_v22 = vpop.permute.xlu1 %1110 }
 0x123   : > { %v3461_v43 = vsel %vm303_vm1, %v1130_v40, 0  ;;  %v1133_v8 = vsel %vm1124_vm4, %v1111_v22, %v1113_v48 }
 0x128   : > { %v386_v44 = vpop.f32.mrf.mxu2  ;;  %v399_v45 = vpop.f32.mrf.mxu3 }
 0x129   : > { %v3408_v47 = vpop.f32.mrf.mxu0  ;;  %v3410_v37 = vpop.f32.mrf.mxu1  ;;  %v3451_v44 = vsel %vm303_vm1, %v1128_v34, 0  ;;  %v3454_v45 = vsel %vm303_vm1, %v1129_v6, 0  ;;  %v1132_v6 = vsel %vm1124_vm4, %v1109_v7, %v1111_v22 }
 0x12c   : > { %2747 = vmatmul.msk.bf16.vlgmr.msrb.gmra.mxu0 %vm299_vm2, %v3345_v12  ;;  %2748 = vmatmul.msk.bf16.vlgmr.msrb.gmra.mxu1 %vm299_vm2, %v3345_v12 }
 0x12d   : > { %2749 = vmatmul.msk.bf16.vlgmr.msrb.gmra.mxu2 %vm299_vm2, %v3345_v12  ;;  %2750 = vmatmul.msk.bf16.vlgmr.msrb.gmra.mxu3 %vm299_vm2, %v3345_v12 }
 0x12e   : > { %1071 = vmatpush.bf16.msrb.mxu0 %v3415_v53  ;;  %1194 = vmatpush.bf16.msrb.mxu1 %v3418_v59 }
 0x12f   : > { %1207 = vmatpush.bf16.msrb.mxu2 %v3425_v60  ;;  %1220 = vmatpush.bf16.msrb.mxu3 %v3428_v61 }
 0x130   : > { %v3438_v3 = vpop.f32.mrf.mxu2  ;;  %v3440_v4 = vpop.f32.mrf.mxu3 }
 0x131   : > { %v412_v5 = vpop.f32.mrf.mxu0  ;;  %v425_v9 = vpop.f32.mrf.mxu1 }
 0x138   : > { %v438_v32 = vpop.f32.mrf.mxu2  ;;  %v451_v33 = vpop.f32.mrf.mxu3 }
 0x139   : > { %v3444_v23 = vpop.f32.mrf.mxu0  ;;  %v3446_v39 = vpop.f32.mrf.mxu1 }
 0x13a   : > { %v1115_v32 = vpop.permute.xlu0 %1114 }
 0x13b   : > { %v1134_v53 = vsel %vm1124_vm4, %v1113_v48, %v1115_v32 }
 0x13c   : > { %2751 = vmatmul.msk.bf16.vlgmr.msra.gmra.mxu0 %vm299_vm2, %v3345_v12  ;;  %2752 = vmatmul.msk.bf16.vlgmr.msra.gmra.mxu1 %vm299_vm2, %v3345_v12  ;;  %v3499_v7 = vsel %vm303_vm1, %v1134_v53, 0 }
 0x13d   : > { %2753 = vmatmul.msk.bf16.vlgmr.msra.gmra.mxu2 %vm299_vm2, %v3345_v12  ;;  %2754 = vmatmul.msk.bf16.vlgmr.msra.gmra.mxu3 %vm299_vm2, %v3345_v12 }
 0x13e   : > { %1233 = vmatpush.bf16.msra.mxu0 %v3451_v44  ;;  %1246 = vmatpush.bf16.msra.mxu1 %v3454_v45 }
 0x13f   : > { %1259 = vmatpush.bf16.msra.mxu2 %v3461_v43  ;;  %1272 = vmatpush.bf16.msra.mxu3 %v3464_v46 }
 0x140   : > { %v3474_v36 = vpop.f32.mrf.mxu2  ;;  %v3476_v62 = vpop.f32.mrf.mxu3 }
 0x141   : > { %v464_v5 = vpop.f32.mrf.mxu0  ;;  %v477_v9 = vpop.f32.mrf.mxu1 }
 0x142   : > { %v1135_v5 = vsel %vm1124_vm4, %v1115_v32, %v1117_v24  ;;  %v3489_v9 = vsel %vm303_vm1, %v1132_v6, 0  ;;  %v1119_v6 = vpop.permute.xlu2 %1118 }
 0x143   : > { %v3502_v22 = vsel %vm303_vm1, %v1135_v5, 0  ;;  %v1123_v5 = vpop.permute.xlu1 %1122  ;;  %v1136_v20 = vsel %vm1124_vm4, %v1117_v24, %v1119_v6 }
 0x148   : > { %v490_v33 = vpop.f32.mrf.mxu2  ;;  %v503_v34 = vpop.f32.mrf.mxu3 }
 0x149   : > { %v3480_v40 = vpop.f32.mrf.mxu0  ;;  %v3482_v27 = vpop.f32.mrf.mxu1  ;;  %v3492_v33 = vsel %vm303_vm1, %v1133_v8, 0 }
 0x14a   : > { %v1121_v8 = vpop.permute.xlu0 %1120 }
 0x14b   : > { %v1137_v38 = vsel %vm1124_vm4, %v1119_v6, %v1121_v8  ;;  %v1138_v17 = vsel %vm1124_vm4, %v1121_v8, %v1123_v5 }
 0x14c   : > { %2755 = vmatmul.msk.bf16.vlgmr.msrb.gmra.mxu0 %vm299_vm2, %v3345_v12  ;;  %2756 = vmatmul.msk.bf16.vlgmr.msrb.gmra.mxu1 %vm299_vm2, %v3484_v42 }
 0x14d   : > { %2757 = vmatmul.msk.bf16.vlgmr.msrb.gmra.mxu2 %vm299_vm2, %v3484_v42  ;;  %2758 = vmatmul.msk.bf16.vlgmr.msrb.gmra.mxu3 %vm299_vm2, %v3484_v42 }
 0x14e   : > { %1285 = vmatpush.bf16.msrb.mxu0 %v3489_v9  ;;  %1298 = vmatpush.bf16.msrb.mxu1 %v3492_v33 }
 0x14f   : > { %1311 = vmatpush.bf16.msrb.mxu2 %v3499_v7  ;;  %1324 = vmatpush.bf16.msrb.mxu3 %v3502_v22 }
 0x150   : > { %v3512_v12 = vpop.f32.mrf.mxu2  ;;  %v601_v53 = vpop.f32.mrf.mxu3 }
 0x151   : > { %v3515_v48 = vadd.f32 %v601_v53, %v3373_v13  ;;  %v516_v32 = vpop.f32.mrf.mxu0  ;;  %v529_v34 = vpop.f32.mrf.mxu1  ;;  %v3527_v53 = vsel %vm303_vm1, %v1136_v20, 0 }
 0x158   : > { %v542_v15 = vpop.f32.mrf.mxu2  ;;  %v603_v21 = vpop.f32.mrf.mxu3 }
 0x159   : > { %v614_v19 = vpop.f32.mrf.mxu0  ;;  %v627_v18 = vpop.f32.mrf.mxu1  ;;  %v3530_v15 = vsel %vm303_vm1, %v1137_v38, 0  ;;  %v3537_v21 = vsel %vm303_vm1, %v1138_v17, 0 }
 0x15a   : > { %v3521_v16 = vadd.f32 %v614_v19, %v3375_v14  ;;  %v3524_v13 = vadd.f32 %v627_v18, %v3403_v28  ;;  %v3540_v19 = vsel %vm303_vm1, %v1123_v5, 0 }
 0x15c   : > { %2759 = vmatmul.msk.bf16.vlgmr.msra.gmra.mxu0 %vm299_vm2, %v3484_v42  ;;  %2760 = vmatmul.msk.bf16.vlgmr.msra.gmra.mxu1 %vm299_vm2, %v3484_v42 }
 0x15d   : > { %2761 = vmatmul.msk.bf16.vlgmr.msra.gmra.mxu2 %vm299_vm2, %v3484_v42  ;;  %2762 = vmatmul.msk.bf16.vlgmr.msra.gmra.mxu3 %vm299_vm2, %v3484_v42 }
 0x15e   : > { %1337 = vmatpush.bf16.msra.mxu0 %v3527_v53  ;;  %1350 = vmatpush.bf16.msra.mxu1 %v3530_v15 }
 0x15f   : > { %1363 = vmatpush.bf16.msra.mxu2 %v3537_v21  ;;  %1376 = vmatpush.bf16.msra.mxu3 %v3540_v19 }
 0x160   : > { %v640_v18 = vpop.f32.mrf.mxu2  ;;  %v653_v17 = vpop.f32.mrf.mxu3 }
 0x161   : > { %v3551_v14 = vadd.f32 %v640_v18, %v3405_v31  ;;  %v3554_v38 = vadd.f32 %v653_v17, %v3408_v47  ;;  %v616_v20 = vpop.f32.mrf.mxu0  ;;  %v629_v28 = vpop.f32.mrf.mxu1 }
 0x168   : > { %v642_v24 = vpop.f32.mrf.mxu2  ;;  %v655_v32 = vpop.f32.mrf.mxu3 }
 0x169   : > { %v666_v34 = vpop.f32.mrf.mxu0  ;;  %v679_v6 = vpop.f32.mrf.mxu1 }
 0x16a   : > { %v3557_v8 = vadd.f32 %v666_v34, %v3410_v37  ;;  %v3560_v5 = vadd.f32 %v679_v6, %v3438_v3 }
 0x16c   : > { %2763 = vmatmul.msk.bf16.vlgmr.msrb.gmra.mxu0 %vm299_vm2, %v3484_v42  ;;  %2764 = vmatmul.msk.bf16.vlgmr.msrb.gmra.mxu1 %vm299_vm2, %v3484_v42 }
 0x16d   : > { %2765 = vmatmul.msk.bf16.vlgmr.msrb.gmra.mxu2 %vm299_vm2, %v3484_v42  ;;  %2766 = vmatmul.msk.bf16.vlgmr.msrb.gmra.mxu3 %vm299_vm2, %v3484_v42 }
 0x16e   : > { %1475 = vmatpush.bf16.msrb.mxu0 %v3418_v59  ;;  %1488 = vmatpush.bf16.msrb.mxu1 %v3425_v60 }
 0x16f   : > { %1501 = vmatpush.bf16.msrb.mxu2 %v3428_v61  ;;  %1514 = vmatpush.bf16.msrb.mxu3 %v3451_v44 }
 0x170   : > { %v692_v31 = vpop.f32.mrf.mxu2  ;;  %v705_v47 = vpop.f32.mrf.mxu3 }
 0x171   : > { %v3575_v37 = vadd.f32 %v692_v31, %v3440_v4  ;;  %v3578_v3 = vadd.f32 %v705_v47, %v3444_v23  ;;  %v668_v18 = vpop.f32.mrf.mxu0  ;;  %v681_v17 = vpop.f32.mrf.mxu1 }
 0x178   : > { %v694_v20 = vpop.f32.mrf.mxu2  ;;  %v707_v28 = vpop.f32.mrf.mxu3 }
 0x179   : > { %v718_v24 = vpop.f32.mrf.mxu0  ;;  %v731_v32 = vpop.f32.mrf.mxu1  ;;  %v1464_v28 = vld [vmem:[#allocation2 + $0xe] sm:$0x3] }
 0x17a   : > { %v3581_v34 = vadd.f32 %v718_v24, %v3446_v39  ;;  %v3584_v6 = vadd.f32 %v731_v32, %v3474_v36 }
 0x17c   : > { %2767 = vmatmul.msk.bf16.vlgmr.msra.gmra.mxu0 %vm299_vm2, %v3484_v42  ;;  %2768 = vmatmul.msk.bf16.vlgmr.msra.gmra.mxu1 %vm299_vm2, %v3484_v42 }
 0x17d   : > { %2769 = vmatmul.msk.bf16.vlgmr.msra.gmra.mxu2 %vm299_vm2, %v3484_v42  ;;  %2770 = vmatmul.msk.bf16.vlgmr.msra.gmra.mxu3 %vm299_vm2, %v3484_v42 }
 0x17e   : > { %1527 = vmatpush.bf16.msra.mxu0 %v3454_v45  ;;  %1540 = vmatpush.bf16.msra.mxu1 %v3461_v43 }
 0x17f   : > { %1553 = vmatpush.bf16.msra.mxu2 %v3464_v46  ;;  %1566 = vmatpush.bf16.msra.mxu3 %v3489_v9 }
 0x180   : > { %v744_v4 = vpop.f32.mrf.mxu2  ;;  %v757_v23 = vpop.f32.mrf.mxu3 }
 0x181   : > { %v3599_v39 = vadd.f32 %v744_v4, %v3476_v62  ;;  %v3602_v36 = vadd.f32 %v757_v23, %v3480_v40  ;;  %v720_v31 = vpop.f32.mrf.mxu0  ;;  %v733_v47 = vpop.f32.mrf.mxu1 }
 0x188   : > { %v746_v18 = vpop.f32.mrf.mxu2  ;;  %v759_v42 = vpop.f32.mrf.mxu3 }
 0x189   : > { %v770_v17 = vpop.f32.mrf.mxu0  ;;  %v783_v20 = vpop.f32.mrf.mxu1 }
 0x18a   : > { %v3605_v24 = vadd.f32 %v770_v17, %v3482_v27  ;;  %v3608_v32 = vadd.f32 %v783_v20, %v3512_v12 }
 0x18c   : > { %2771 = vmatmul.msk.bf16.vlgmr.msrb.gmra.mxu0 %vm299_vm2, %v1464_v28  ;;  %2772 = vmatmul.msk.bf16.vlgmr.msrb.gmra.mxu1 %vm299_vm2, %v1464_v28 }
 0x18d   : > { %2773 = vmatmul.msk.bf16.vlgmr.msrb.gmra.mxu2 %vm299_vm2, %v1464_v28  ;;  %2774 = vmatmul.msk.bf16.vlgmr.msrb.gmra.mxu3 %vm299_vm2, %v1464_v28 }
 0x18e   : > { %1579 = vmatpush.bf16.msrb.mxu0 %v3492_v33  ;;  %1592 = vmatpush.bf16.msrb.mxu1 %v3499_v7 }
 0x18f   : > { %1605 = vmatpush.bf16.msrb.mxu2 %v3502_v22  ;;  %1618 = vmatpush.bf16.msrb.mxu3 %v3527_v53 }
 0x190   : > { %v891_v62 = vpop.f32.mrf.mxu2  ;;  %v3618_v40 = vpop.f32.mrf.mxu3 }
 0x191   : > { %v3621_v27 = vadd.f32 %v891_v62, %v3515_v48  ;;  %v772_v12 = vpop.f32.mrf.mxu0  ;;  %v785_v4 = vpop.f32.mrf.mxu1 }
 0x198   : > { %v893_v23 = vpop.f32.mrf.mxu2  ;;  %v906_v31 = vpop.f32.mrf.mxu3 }
 0x199   : > { %v917_v47 = vpop.f32.mrf.mxu0  ;;  %v3623_v18 = vpop.f32.mrf.mxu1 }
 0x19a   : > { %v3626_v42 = vadd.f32 %v917_v47, %v3524_v13 }
 0x19c   : > { %2775 = vmatmul.msk.bf16.vlgmr.msra.gmra.mxu0 %vm299_vm2, %v1464_v28  ;;  %2776 = vmatmul.msk.bf16.vlgmr.msra.gmra.mxu1 %vm299_vm2, %v1464_v28 }
 0x19d   : > { %2777 = vmatmul.msk.bf16.vlgmr.msra.gmra.mxu2 %vm299_vm2, %v1464_v28  ;;  %2778 = vmatmul.msk.bf16.vlgmr.msra.gmra.mxu3 %vm299_vm2, %v1464_v28 }
 0x19e   : > { %1631 = vmatpush.bf16.msra.mxu0 %v3530_v15  ;;  %1644 = vmatpush.bf16.msra.mxu1 %v3537_v21 }
 0x19f   : > { %1657 = vmatpush.bf16.msra.mxu2 %v3540_v19  ;;  %1673 = vmatpush.bf16.msra.mxu3 %v3152_v49 }
 0x1a0   : > { %v943_v48 = vpop.f32.mrf.mxu2  ;;  %v3636_v17 = vpop.f32.mrf.mxu3 }
 0x1a1   : > { %v3639_v13 = vadd.f32 %v943_v48, %v3554_v38  ;;  %v919_v20 = vpop.f32.mrf.mxu0  ;;  %v932_v62 = vpop.f32.mrf.mxu1 }
 0x1a8   : > { %v945_v12 = vpop.f32.mrf.mxu2  ;;  %v958_v4 = vpop.f32.mrf.mxu3 }
 0x1a9   : > { %v969_v23 = vpop.f32.mrf.mxu0  ;;  %v3641_v31 = vpop.f32.mrf.mxu1 }
 0x1aa   : > { %v3644_v47 = vadd.f32 %v969_v23, %v3560_v5 }
 0x1ac   : > { %2779 = vmatmul.msk.bf16.vlgmr.msrb.gmra.mxu0 %vm299_vm2, %v1464_v28  ;;  %2780 = vmatmul.msk.bf16.vlgmr.msrb.gmra.mxu1 %vm299_vm2, %v1464_v28 }
 0x1ad   : > { %2781 = vmatmul.msk.bf16.vlgmr.msrb.gmra.mxu2 %vm299_vm2, %v1464_v28  ;;  %2782 = vmatmul.msk.bf16.vlgmr.msrb.gmra.mxu3 %vm299_vm2, %v1464_v28 }
 0x1ae   : > { %1686 = vmatpush.bf16.msrb.mxu0 %v3155_v50  ;;  %1699 = vmatpush.bf16.msrb.mxu1 %v3158_v51  ;;  %v3664_v51 = vld [vmem:[#allocation2 + $0x2] sm:$0x3] }
 0x1af   : > { %1712 = vmatpush.bf16.msrb.mxu2 %v3161_v52  ;;  %1725 = vmatpush.bf16.msrb.mxu3 %v3186_v63 }
 0x1b0   : > { %v995_v49 = vpop.f32.mrf.mxu2  ;;  %v3654_v38 = vpop.f32.mrf.mxu3 }
 0x1b1   : > { %v3657_v5 = vadd.f32 %v995_v49, %v3578_v3  ;;  %v971_v48 = vpop.f32.mrf.mxu0  ;;  %v984_v20 = vpop.f32.mrf.mxu1 }
 0x1b8   : > { %v997_v62 = vpop.f32.mrf.mxu2  ;;  %v1010_v12 = vpop.f32.mrf.mxu3 }
 0x1b9   : > { %v1021_v4 = vpop.f32.mrf.mxu0  ;;  %v3659_v23 = vpop.f32.mrf.mxu1 }
 0x1ba   : > { %v3662_v50 = vadd.f32 %v1021_v4, %v3584_v6 }
 0x1bc   : > { %2783 = vmatmul.msk.bf16.vlgmr.msra.gmra.mxu0 %vm299_vm2, %v1464_v28  ;;  %2784 = vmatmul.msk.bf16.vlgmr.msra.gmra.mxu1 %vm299_vm2, %v1464_v28 }
 0x1bd   : > { %2785 = vmatmul.msk.bf16.vlgmr.msra.gmra.mxu2 %vm299_vm2, %v1464_v28  ;;  %2786 = vmatmul.msk.bf16.vlgmr.msra.gmra.mxu3 %vm299_vm2, %v3664_v51 }
 0x1be   : > { %1738 = vmatpush.bf16.msra.mxu0 %v3189_v0  ;;  %1751 = vmatpush.bf16.msra.mxu1 %v3192_v1 }
 0x1bf   : > { %1764 = vmatpush.bf16.msra.mxu2 %v3195_v2  ;;  %1777 = vmatpush.bf16.msra.mxu3 %v3179_v58  ;;  %v1078_v58 = vadd.f32 %v3618_v40, %v3521_v16  ;;  %v1080_v16 = vadd.f32 %v3623_v18, %v3551_v14 }
 0x1c0   : > { %v1047_v52 = vpop.f32.mrf.mxu2  ;;  %v3675_v63 = vpop.f32.mrf.mxu3 }
 0x1c1   : > { %v3678_v3 = vadd.f32 %v1047_v52, %v3602_v36  ;;  %v1023_v6 = vpop.f32.mrf.mxu0  ;;  %v1036_v49 = vpop.f32.mrf.mxu1 }
 0x1c2   : > { %v3698_v52 = vpop.permute.xlu0 %1399 }
 0x1c8   : > { %v1049_v28 = vpop.f32.mrf.mxu2  ;;  %v1062_v48 = vpop.f32.mrf.mxu3 }
 0x1c9   : > { %v3680_v20 = vpop.f32.mrf.mxu0  ;;  %v1196_v0 = vpop.f32.mrf.mxu1 }
 0x1ca   : > { %v1382_v36 = vadd.f32 %v1196_v0, %v3621_v27 }
 0x1cc   : > { %2787 = vmatmul.msk.bf16.vlgmr.msrb.gmra.mxu0 %vm299_vm2, %v3664_v51  ;;  %2788 = vmatmul.msk.bf16.vlgmr.msrb.gmra.mxu1 %vm299_vm2, %v3664_v51 }
 0x1cd   : > { %2789 = vmatmul.msk.bf16.vlgmr.msrb.gmra.mxu2 %vm299_vm2, %v3664_v51  ;;  %2790 = vmatmul.msk.bf16.vlgmr.msrb.gmra.mxu3 %vm299_vm2, %v3664_v51 }
 0x1ce   : > { %1790 = vmatpush.bf16.msrb.mxu0 %v3205_v10  ;;  %1803 = vmatpush.bf16.msrb.mxu1 %v3208_v11  ;;  %v1402_v11 = vadd.f32 %v3698_v52, %v1382_v36 }
 0x1cf   : > { %1816 = vmatpush.bf16.msrb.mxu2 %v3229_v26  ;;  %1829 = vmatpush.bf16.msrb.mxu3 %v3232_v29 }
 0x1d0   : > { %v1209_v1 = vpop.f32.mrf.mxu2  ;;  %v1222_v2 = vpop.f32.mrf.mxu3 }
 0x1d1   : > { %v1383_v62 = vadd.f32 %v1209_v1, %v1078_v58  ;;  %v1075_v12 = vpop.f32.mrf.mxu0  ;;  %v1198_v4 = vpop.f32.mrf.mxu1  ;;  %v1384_v28 = vadd.f32 %v1222_v2, %v3626_v42  ;;  %v1082_v42 = vadd.f32 %v3636_v17, %v3557_v8 }
 0x1d3   : > { %v1403_v10 = vadd.f32 %v3698_v52, %v1383_v62  ;;  %v1404_v14 = vadd.f32 %v3698_v52, %v1384_v28 }
 0x1d5   : > { %v1431_v26 = vrot.slane %v1403_v10, 4  ;;  %v1084_v10 = vadd.f32 %v3641_v31, %v3575_v37 }
 0x1d7   : > { %v1438_v29 = vsel %vm303_vm1, %v1402_v11, %v1431_v26 }
 0x1d8   : > { %1452 = vst [vmem:[%s3704_s10] sm:$0x77] %v1438_v29  ;;  %v1211_v40 = vpop.f32.mrf.mxu2  ;;  %v1224_v27 = vpop.f32.mrf.mxu3 }
 0x1d9   : > { %v1235_v6 = vpop.f32.mrf.mxu0  ;;  %v1248_v49 = vpop.f32.mrf.mxu1 }
 0x1da   : > { %v1385_v48 = vadd.f32 %v1235_v6, %v1080_v16  ;;  %v1386_v36 = vadd.f32 %v1248_v49, %v3639_v13 }
 0x1dc   : > { %v1405_v0 = vadd.f32 %v3698_v52, %v1385_v48  ;;  %2791 = vmatmul.msk.bf16.vlgmr.msra.gmra.mxu0 %vm299_vm2, %v3664_v51  ;;  %2792 = vmatmul.msk.bf16.vlgmr.msra.gmra.mxu1 %vm299_vm2, %v3664_v51  ;;  %v1406_v4 = vadd.f32 %v3698_v52, %v1386_v36 }
 0x1dd   : > { %2793 = vmatmul.msk.bf16.vlgmr.msra.gmra.mxu2 %vm299_vm2, %v3664_v51  ;;  %2794 = vmatmul.msk.bf16.vlgmr.msra.gmra.mxu3 %vm299_vm2, %v3664_v51 }
 0x1de   : > { %v1432_v18 = vrot.slane %v1405_v0, 4  ;;  %1842 = vmatpush.bf16.msra.mxu0 %v3235_v30  ;;  %1855 = vmatpush.bf16.msra.mxu1 %v3226_v25 }
 0x1df   : > { %1934 = vmatpush.bf16.msra.mxu2 %v3418_v59  ;;  %1947 = vmatpush.bf16.msra.mxu3 %v3425_v60 }
 0x1e0   : > { %v1439_v58 = vsel %vm303_vm1, %v1404_v14, %v1432_v18  ;;  %v1261_v1 = vpop.f32.mrf.mxu2  ;;  %v1274_v2 = vpop.f32.mrf.mxu3 }
 0x1e1   : > { %1453 = vst [vmem:[%s3704_s10 + $0x8] sm:$0x77] %v1439_v58  ;;  %v1387_v62 = vadd.f32 %v1261_v1, %v1082_v42  ;;  %v1237_v12 = vpop.f32.mrf.mxu0  ;;  %v1250_v30 = vpop.f32.mrf.mxu1  ;;  %v1388_v13 = vadd.f32 %v1274_v2, %v3644_v47  ;;  %v1086_v47 = vadd.f32 %v3654_v38, %v3581_v34  ;;  %v1088_v1 = vadd.f32 %v3659_v23, %v3599_v39 }
 0x1e3   : > { %v1407_v25 = vadd.f32 %v3698_v52, %v1387_v62  ;;  %v1408_v37 = vadd.f32 %v3698_v52, %v1388_v13 }
 0x1e5   : > { %v1433_v8 = vrot.slane %v1407_v25, 4  ;;  %v3764_v25 = vld [vmem:[#allocation2 + $0xa] sm:$0x3] }
 0x1e7   : > { %v1440_v17 = vsel %vm303_vm1, %v1406_v4, %v1433_v8  ;;  %v1091_v8 = vadd.f32 %v3680_v20, %v3608_v32 }
 0x1e8   : > { %1454 = vst [vmem:[%s3704_s10 + $0x10] sm:$0x77] %v1440_v17  ;;  %v1263_v11 = vpop.f32.mrf.mxu2  ;;  %v1276_v26 = vpop.f32.mrf.mxu3 }
 0x1e9   : > { %v1287_v29 = vpop.f32.mrf.mxu0  ;;  %v1300_v16 = vpop.f32.mrf.mxu1 }
 0x1ea   : > { %v1389_v40 = vadd.f32 %v1287_v29, %v1084_v10  ;;  %v1390_v48 = vadd.f32 %v1300_v16, %v3657_v5 }
 0x1ec   : > { %v1409_v27 = vadd.f32 %v3698_v52, %v1389_v40  ;;  %2795 = vmatmul.msk.bf16.vlgmr.msrb.gmra.mxu0 %vm299_vm2, %v3664_v51  ;;  %2796 = vmatmul.msk.bf16.vlgmr.msrb.gmra.mxu1 %vm299_vm2, %v3664_v51  ;;  %v1410_v58 = vadd.f32 %v3698_v52, %v1390_v48 }
 0x1ed   : > { %2797 = vmatmul.msk.bf16.vlgmr.msrb.gmra.mxu2 %vm299_vm2, %v3664_v51  ;;  %2798 = vmatmul.msk.bf16.vlgmr.msrb.gmra.mxu3 %vm299_vm2, %v3664_v51 }
 0x1ee   : > { %v1434_v31 = vrot.slane %v1409_v27, 4  ;;  %1960 = vmatpush.bf16.msrb.mxu0 %v3428_v61  ;;  %1973 = vmatpush.bf16.msrb.mxu1 %v3451_v44 }
 0x1ef   : > { %1986 = vmatpush.bf16.msrb.mxu2 %v3454_v45  ;;  %1999 = vmatpush.bf16.msrb.mxu3 %v3461_v43 }
 0x1f0   : > { %v1441_v6 = vsel %vm303_vm1, %v1408_v37, %v1434_v31  ;;  %v1313_v49 = vpop.f32.mrf.mxu2  ;;  %v1326_v28 = vpop.f32.mrf.mxu3 }
 0x1f1   : > { %1455 = vst [vmem:[%s3704_s10 + $0x18] sm:$0x77] %v1441_v6  ;;  %v1391_v0 = vadd.f32 %v1313_v49, %v1086_v47  ;;  %v1289_v14 = vpop.f32.mrf.mxu0  ;;  %v1302_v18 = vpop.f32.mrf.mxu1  ;;  %v1392_v5 = vadd.f32 %v1326_v28, %v3662_v50  ;;  %v1090_v50 = vadd.f32 %v3675_v63, %v3605_v24 }
 0x1f3   : > { %v1411_v42 = vadd.f32 %v3698_v52, %v1391_v0  ;;  %v1412_v39 = vadd.f32 %v3698_v52, %v1392_v5 }
 0x1f5   : > { %v1435_v34 = vrot.slane %v1411_v42, 4 }
 0x1f7   : > { %v1442_v38 = vsel %vm303_vm1, %v1410_v58, %v1435_v34 }
 0x1f8   : > { %1456 = vst [vmem:[%s3704_s10 + $0x20] sm:$0x77] %v1442_v38  ;;  %v1315_v2 = vpop.f32.mrf.mxu2  ;;  %v1328_v36 = vpop.f32.mrf.mxu3 }
 0x1f9   : > { %v1339_v62 = vpop.f32.mrf.mxu0  ;;  %v1352_v12 = vpop.f32.mrf.mxu1 }
 0x1fa   : > { %v1393_v30 = vadd.f32 %v1339_v62, %v1088_v1  ;;  %v1394_v11 = vadd.f32 %v1352_v12, %v3678_v3 }
 0x1fc   : > { %v1413_v4 = vadd.f32 %v3698_v52, %v1393_v30  ;;  %2799 = vmatmul.msk.bf16.vlgmr.msra.gmra.mxu0 %vm299_vm2, %v3664_v51  ;;  %2800 = vmatmul.msk.bf16.vlgmr.msra.gmra.mxu1 %vm299_vm2, %v3664_v51  ;;  %v1414_v20 = vadd.f32 %v3698_v52, %v1394_v11 }
 0x1fd   : > { %2809 = vmatmul.msk.bf16.vlgmr.msra.gmra.mxu2 %vm299_vm2, %v3764_v25  ;;  %2810 = vmatmul.msk.bf16.vlgmr.msra.gmra.mxu3 %vm299_vm2, %v3764_v25 }
 0x1fe   : > { %v1436_v23 = vrot.slane %v1413_v4, 4  ;;  %2012 = vmatpush.bf16.msra.mxu0 %v3464_v46  ;;  %2025 = vmatpush.bf16.msra.mxu1 %v3489_v9 }
 0x1ff   : > { %2038 = vmatpush.bf16.msra.mxu2 %v3492_v33  ;;  %2051 = vmatpush.bf16.msra.mxu3 %v3499_v7 }
 0x200   : > { %v1443_v51 = vsel %vm303_vm1, %v1412_v39, %v1436_v23  ;;  %v1365_v17 = vpop.f32.mrf.mxu2  ;;  %v1378_v10 = vpop.f32.mrf.mxu3 }
 0x201   : > { %1457 = vst [vmem:[%s3704_s10 + $0x28] sm:$0x77] %v1443_v51  ;;  %v1395_v26 = vadd.f32 %v1365_v17, %v1090_v50  ;;  %v1396_v29 = vadd.f32 %v1378_v10, %v1091_v8  ;;  %v1341_v16 = vpop.f32.mrf.mxu0  ;;  %v1354_v24 = vpop.f32.mrf.mxu1  ;;  %v3858_v50 = vld [vmem:[#allocation2 + $0x6] sm:$0x3]  ;;  %v4091_v8 = vld [vmem:[#allocation12_spill] sm:$0xff] }
 0x203   : > { %v1415_v32 = vadd.f32 %v3698_v52, %v1395_v26  ;;  %v1416_v63 = vadd.f32 %v3698_v52, %v1396_v29 }
 0x205   : > { %v1437_v13 = vrot.slane %v1415_v32, 4  ;;  %1460 = vst.msk [vmem:[%s3704_s10 + $0x38] sm:$0x7] %vm1459_vm5, %v1416_v63 }
 0x207   : > { %v1444_v40 = vsel %vm303_vm1, %v1414_v20, %v1437_v13 }
 0x208   : > { %1458 = vst [vmem:[%s3704_s10 + $0x30] sm:$0x77] %v1444_v40  ;;  %v1367_v27 = vpop.f32.mrf.mxu2  ;;  %v1380_v37 = vpop.f32.mrf.mxu3  ;;  %v4092_v40 = vld [vmem:[#allocation13_spill] sm:$0xff] }
 0x209   : > { %v3794_v3 = vpop.f32.mrf.mxu0  ;;  %v3796_v31 = vpop.f32.mrf.mxu1  ;;  %v4093_v27 = vld [vmem:[#allocation14_spill] sm:$0xff]  ;;  %v4094_v37 = vld [vmem:[#allocation15_spill] sm:$0xff] }
 0x20c   : > { %2811 = vmatmul.msk.bf16.vlgmr.msrb.gmra.mxu0 %vm299_vm2, %v3764_v25  ;;  %2812 = vmatmul.msk.bf16.vlgmr.msrb.gmra.mxu1 %vm299_vm2, %v3764_v25 }
 0x20d   : > { %2813 = vmatmul.msk.bf16.vlgmr.msrb.gmra.mxu2 %vm299_vm2, %v3764_v25  ;;  %2814 = vmatmul.msk.bf16.vlgmr.msrb.gmra.mxu3 %vm299_vm2, %v3764_v25 }
 0x20e   : > { %2064 = vmatpush.bf16.msrb.mxu0 %v3502_v22  ;;  %2077 = vmatpush.bf16.msrb.mxu1 %v3527_v53 }
 0x20f   : > { %2090 = vmatpush.bf16.msrb.mxu2 %v3530_v15  ;;  %2103 = vmatpush.bf16.msrb.mxu3 %v3537_v21 }
 0x210   : > { %v3810_v47 = vpop.f32.mrf.mxu2  ;;  %v3812_v6 = vpop.f32.mrf.mxu3 }
 0x211   : > { %v1479_v49 = vpop.f32.mrf.mxu0  ;;  %v1492_v28 = vpop.f32.mrf.mxu1 }
 0x218   : > { %v1505_v48 = vpop.f32.mrf.mxu2  ;;  %v1518_v0 = vpop.f32.mrf.mxu3 }
 0x219   : > { %v3814_v14 = vpop.f32.mrf.mxu0  ;;  %v3816_v18 = vpop.f32.mrf.mxu1 }
 0x21c   : > { %2815 = vmatmul.msk.bf16.vlgmr.msra.gmra.mxu0 %vm299_vm2, %v3764_v25  ;;  %2816 = vmatmul.msk.bf16.vlgmr.msra.gmra.mxu1 %vm299_vm2, %v3764_v25 }
 0x21d   : > { %2817 = vmatmul.msk.bf16.vlgmr.msra.gmra.mxu2 %vm299_vm2, %v3764_v25  ;;  %2818 = vmatmul.msk.bf16.vlgmr.msra.gmra.mxu3 %vm299_vm2, %v3764_v25 }
 0x21e   : > { %2116 = vmatpush.bf16.msra.mxu0 %v3540_v19  ;;  %2132 = vmatpush.bf16.msra.mxu1 %v3294_v35  ;;  %v4087_v35 = vld [vmem:[#allocation8_spill] sm:$0xff] }
 0x21f   : > { %2145 = vmatpush.bf16.msra.mxu2 %v3297_v41  ;;  %2158 = vmatpush.bf16.msra.mxu3 %v3318_v54 }
 0x220   : > { %v3830_v42 = vpop.f32.mrf.mxu2  ;;  %v3832_v58 = vpop.f32.mrf.mxu3 }
 0x221   : > { %v1531_v34 = vpop.f32.mrf.mxu0  ;;  %v1544_v38 = vpop.f32.mrf.mxu1 }
 0x228   : > { %v1557_v1 = vpop.f32.mrf.mxu2  ;;  %v1570_v2 = vpop.f32.mrf.mxu3 }
 0x229   : > { %v3834_v36 = vpop.f32.mrf.mxu0  ;;  %v3836_v62 = vpop.f32.mrf.mxu1 }
 0x22c   : > { %2819 = vmatmul.msk.bf16.vlgmr.msrb.gmra.mxu0 %vm299_vm2, %v3764_v25  ;;  %2820 = vmatmul.msk.bf16.vlgmr.msrb.gmra.mxu1 %vm299_vm2, %v3764_v25 }
 0x22d   : > { %2821 = vmatmul.msk.bf16.vlgmr.msrb.gmra.mxu2 %vm299_vm2, %v3764_v25  ;;  %2822 = vmatmul.msk.bf16.vlgmr.msrb.gmra.mxu3 %vm299_vm2, %v3764_v25 }
 0x22e   : > { %2171 = vmatpush.bf16.msrb.mxu0 %v3321_v55  ;;  %2184 = vmatpush.bf16.msrb.mxu1 %v3328_v56  ;;  %v4088_v55 = vld [vmem:[#allocation9_spill] sm:$0xff]  ;;  %v4089_v56 = vld [vmem:[#allocation10_spill] sm:$0xff] }
 0x22f   : > { %2197 = vmatpush.bf16.msrb.mxu2 %v3331_v57  ;;  %2210 = vmatpush.bf16.msrb.mxu3 %v4087_v35  ;;  %v4090_v57 = vld [vmem:[#allocation11_spill] sm:$0xff] }
 0x230   : > { %v3850_v41 = vpop.f32.mrf.mxu2  ;;  %v3852_v54 = vpop.f32.mrf.mxu3 }
 0x231   : > { %v1583_v12 = vpop.f32.mrf.mxu0  ;;  %v1596_v5 = vpop.f32.mrf.mxu1 }
 0x238   : > { %v1609_v30 = vpop.f32.mrf.mxu2  ;;  %v1622_v4 = vpop.f32.mrf.mxu3 }
 0x239   : > { %v3854_v39 = vpop.f32.mrf.mxu0  ;;  %v3856_v23 = vpop.f32.mrf.mxu1 }
 0x23c   : > { %2823 = vmatmul.msk.bf16.vlgmr.msra.gmra.mxu0 %vm299_vm2, %v3764_v25  ;;  %2824 = vmatmul.msk.bf16.vlgmr.msra.gmra.mxu1 %vm299_vm2, %v3858_v50 }
 0x23d   : > { %2825 = vmatmul.msk.bf16.vlgmr.msra.gmra.mxu2 %vm299_vm2, %v3858_v50  ;;  %2826 = vmatmul.msk.bf16.vlgmr.msra.gmra.mxu3 %vm299_vm2, %v3858_v50 }
 0x23e   : > { %2223 = vmatpush.bf16.msra.mxu0 %v4088_v55  ;;  %2236 = vmatpush.bf16.msra.mxu1 %v4089_v56 }
 0x23f   : > { %2249 = vmatpush.bf16.msra.mxu2 %v4090_v57  ;;  %2262 = vmatpush.bf16.msra.mxu3 %v4091_v8 }
 0x240   : > { %v3872_v51 = vpop.f32.mrf.mxu2  ;;  %v1675_v25 = vpop.f32.mrf.mxu3 }
 0x241   : > { %v1635_v17 = vpop.f32.mrf.mxu0  ;;  %v1648_v10 = vpop.f32.mrf.mxu1  ;;  %v1676_v24 = vadd.f32 %v1675_v25, %v3794_v3  ;;  %v4095_v3 = vld [vmem:[#allocation16_spill] sm:$0xff] }
 0x243   : > { %v1861_v20 = vadd.f32 %v1676_v24, %v3698_v52 }
 0x248   : > { %v1661_v11 = vpop.f32.mrf.mxu2  ;;  %v1677_v26 = vpop.f32.mrf.mxu3 }
 0x249   : > { %v1688_v29 = vpop.f32.mrf.mxu0  ;;  %v1701_v16 = vpop.f32.mrf.mxu1 }
 0x24a   : > { %v1689_v32 = vadd.f32 %v1688_v29, %v3796_v31  ;;  %v1702_v48 = vadd.f32 %v1701_v16, %v3810_v47 }
 0x24c   : > { %v1862_v63 = vadd.f32 %v1689_v32, %v3698_v52  ;;  %2827 = vmatmul.msk.bf16.vlgmr.msrb.gmra.mxu0 %vm299_vm2, %v3858_v50  ;;  %2828 = vmatmul.msk.bf16.vlgmr.msrb.gmra.mxu1 %vm299_vm2, %v3858_v50  ;;  %v1863_v2 = vadd.f32 %v1702_v48, %v3698_v52 }
 0x24d   : > { %2829 = vmatmul.msk.bf16.vlgmr.msrb.gmra.mxu2 %vm299_vm2, %v3858_v50  ;;  %2830 = vmatmul.msk.bf16.vlgmr.msrb.gmra.mxu3 %vm299_vm2, %v3858_v50 }
 0x24e   : > { %v1890_v13 = vrot.slane %v1862_v63, 4  ;;  %2275 = vmatpush.bf16.msrb.mxu0 %v4092_v40  ;;  %2288 = vmatpush.bf16.msrb.mxu1 %v4093_v27 }
 0x24f   : > { %2301 = vmatpush.bf16.msrb.mxu2 %v4094_v37  ;;  %2314 = vmatpush.bf16.msrb.mxu3 %v4095_v3 }
 0x250   : > { %v1897_v31 = vsel %vm303_vm1, %v1861_v20, %v1890_v13  ;;  %v1714_v49 = vpop.f32.mrf.mxu2  ;;  %v1727_v28 = vpop.f32.mrf.mxu3 }
 0x251   : > { %2801 = vst [vmem:[%s3704_s10 + $0x3c] sm:$0x77] %v1897_v31  ;;  %v1715_v0 = vadd.f32 %v1714_v49, %v3812_v6  ;;  %v1690_v34 = vpop.f32.mrf.mxu0  ;;  %v1703_v38 = vpop.f32.mrf.mxu1  ;;  %v1728_v56 = vadd.f32 %v1727_v28, %v3814_v14 }
 0x253   : > { %v1864_v1 = vadd.f32 %v1715_v0, %v3698_v52  ;;  %v1865_v57 = vadd.f32 %v1728_v56, %v3698_v52  ;;  %v2380_v0 = vld [vmem:[#allocation2 + $0x8] sm:$0x3] }
 0x255   : > { %v1891_v35 = vrot.slane %v1864_v1, 4 }
 0x257   : > { %v1898_v12 = vsel %vm303_vm1, %v1863_v2, %v1891_v35 }
 0x258   : > { %2802 = vst [vmem:[%s3704_s10 + $0x44] sm:$0x77] %v1898_v12  ;;  %v1716_v5 = vpop.f32.mrf.mxu2  ;;  %v1729_v30 = vpop.f32.mrf.mxu3 }
 0x259   : > { %v1740_v4 = vpop.f32.mrf.mxu0  ;;  %v1753_v55 = vpop.f32.mrf.mxu1 }
 0x25a   : > { %v1741_v47 = vadd.f32 %v1740_v4, %v3816_v18  ;;  %v1754_v17 = vadd.f32 %v1753_v55, %v3830_v42 }
 0x25c   : > { %v1866_v6 = vadd.f32 %v1741_v47, %v3698_v52  ;;  %2831 = vmatmul.msk.bf16.vlgmr.msra.gmra.mxu0 %vm299_vm2, %v3858_v50  ;;  %2832 = vmatmul.msk.bf16.vlgmr.msra.gmra.mxu1 %vm299_vm2, %v3858_v50  ;;  %v1867_v29 = vadd.f32 %v1754_v17, %v3698_v52 }
 0x25d   : > { %2833 = vmatmul.msk.bf16.vlgmr.msra.gmra.mxu2 %vm299_vm2, %v3858_v50  ;;  %2834 = vmatmul.msk.bf16.vlgmr.msra.gmra.mxu3 %vm299_vm2, %v3858_v50 }
 0x25e   : > { %v1892_v14 = vrot.slane %v1866_v6, 4  ;;  %2391 = vmatpush.bf16.msra.mxu0 %v3418_v59  ;;  %2404 = vmatpush.bf16.msra.mxu1 %v3425_v60 }
 0x25f   : > { %2417 = vmatpush.bf16.msra.mxu2 %v3428_v61  ;;  %2430 = vmatpush.bf16.msra.mxu3 %v3451_v44 }
 0x260   : > { %v1899_v18 = vsel %vm303_vm1, %v1865_v57, %v1892_v14  ;;  %v1766_v8 = vpop.f32.mrf.mxu2  ;;  %v1779_v25 = vpop.f32.mrf.mxu3 }
 0x261   : > { %2803 = vst [vmem:[%s3704_s10 + $0x4c] sm:$0x77] %v1899_v18  ;;  %v1767_v10 = vadd.f32 %v1766_v8, %v3832_v58  ;;  %v1742_v11 = vpop.f32.mrf.mxu0  ;;  %v1755_v26 = vpop.f32.mrf.mxu1  ;;  %v1780_v63 = vadd.f32 %v1779_v25, %v3834_v36 }
 0x263   : > { %v1868_v59 = vadd.f32 %v1767_v10, %v3698_v52  ;;  %v1869_v20 = vadd.f32 %v1780_v63, %v3698_v52 }
 0x265   : > { %v1893_v60 = vrot.slane %v1868_v59, 4 }
 0x267   : > { %v1900_v61 = vsel %vm303_vm1, %v1867_v29, %v1893_v60 }
 0x268   : > { %2804 = vst [vmem:[%s3704_s10 + $0x54] sm:$0x77] %v1900_v61  ;;  %v1768_v44 = vpop.f32.mrf.mxu2  ;;  %v1781_v16 = vpop.f32.mrf.mxu3 }
 0x269   : > { %v1792_v24 = vpop.f32.mrf.mxu0  ;;  %v1805_v32 = vpop.f32.mrf.mxu1 }
 0x26a   : > { %v1793_v42 = vadd.f32 %v1792_v24, %v3836_v62  ;;  %v1806_v27 = vadd.f32 %v1805_v32, %v3850_v41 }
 0x26c   : > { %v1870_v58 = vadd.f32 %v1793_v42, %v3698_v52  ;;  %2835 = vmatmul.msk.bf16.vlgmr.msrb.gmra.mxu0 %vm299_vm2, %v3858_v50  ;;  %2836 = vmatmul.msk.bf16.vlgmr.msrb.gmra.mxu1 %vm299_vm2, %v3858_v50  ;;  %v1871_v31 = vadd.f32 %v1806_v27, %v3698_v52 }
 0x26d   : > { %2837 = vmatmul.msk.bf16.vlgmr.msrb.gmra.mxu2 %vm299_vm2, %v3858_v50  ;;  %2838 = vmatmul.msk.bf16.vlgmr.msrb.gmra.mxu3 %vm299_vm2, %v3858_v50 }
 0x26e   : > { %v1894_v36 = vrot.slane %v1870_v58, 4  ;;  %2443 = vmatpush.bf16.msrb.mxu0 %v3454_v45  ;;  %2456 = vmatpush.bf16.msrb.mxu1 %v3461_v43 }
 0x26f   : > { %2469 = vmatpush.bf16.msrb.mxu2 %v3464_v46  ;;  %2482 = vmatpush.bf16.msrb.mxu3 %v3489_v9 }
 0x270   : > { %v1901_v62 = vsel %vm303_vm1, %v1869_v20, %v1894_v36  ;;  %v1818_v13 = vpop.f32.mrf.mxu2  ;;  %v1831_v40 = vpop.f32.mrf.mxu3 }
 0x271   : > { %2805 = vst [vmem:[%s3704_s10 + $0x5c] sm:$0x77] %v1901_v62  ;;  %v1819_v50 = vadd.f32 %v1818_v13, %v3852_v54  ;;  %v1794_v37 = vpop.f32.mrf.mxu0  ;;  %v1807_v3 = vpop.f32.mrf.mxu1  ;;  %v1832_v41 = vadd.f32 %v1831_v40, %v3854_v39 }
 0x273   : > { %v1872_v45 = vadd.f32 %v1819_v50, %v3698_v52  ;;  %v1873_v2 = vadd.f32 %v1832_v41, %v3698_v52 }
 0x275   : > { %v1895_v43 = vrot.slane %v1872_v45, 4 }
 0x277   : > { %v1902_v46 = vsel %vm303_vm1, %v1871_v31, %v1895_v43 }
 0x278   : > { %2806 = vst [vmem:[%s3704_s10 + $0x64] sm:$0x77] %v1902_v46  ;;  %v1820_v9 = vpop.f32.mrf.mxu2  ;;  %v1833_v49 = vpop.f32.mrf.mxu3 }
 0x279   : > { %v1844_v28 = vpop.f32.mrf.mxu0  ;;  %v1857_v48 = vpop.f32.mrf.mxu1 }
 0x27a   : > { %v1845_v54 = vadd.f32 %v1844_v28, %v3856_v23  ;;  %v1858_v34 = vadd.f32 %v1857_v48, %v3872_v51 }
 0x27c   : > { %v1874_v38 = vadd.f32 %v1845_v54, %v3698_v52  ;;  %v1875_v1 = vadd.f32 %v1858_v34, %v3698_v52  ;;  %2847 = vmatmul.msk.bf16.vlgmr.msra.gmra.mxu0 %vm299_vm2, %v2380_v0  ;;  %2848 = vmatmul.msk.bf16.vlgmr.msra.gmra.mxu1 %vm299_vm2, %v2380_v0 }
 0x27d   : > { %2849 = vmatmul.msk.bf16.vlgmr.msra.gmra.mxu2 %vm299_vm2, %v2380_v0  ;;  %2850 = vmatmul.msk.bf16.vlgmr.msra.gmra.mxu3 %vm299_vm2, %v2380_v0 }
 0x27e   : > { %v1896_v39 = vrot.slane %v1874_v38, 4  ;;  %2808 = vst.msk [vmem:[%s3704_s10 + $0x74] sm:$0x7] %vm1459_vm5, %v1875_v1  ;;  %2495 = vmatpush.bf16.msra.mxu0 %v3492_v33  ;;  %2508 = vmatpush.bf16.msra.mxu1 %v3499_v7 }
 0x27f   : > { %2521 = vmatpush.bf16.msra.mxu2 %v3502_v22  ;;  %2534 = vmatpush.bf16.msra.mxu3 %v3527_v53 }
 0x280   : > { %v1903_v23 = vsel %vm303_vm1, %v1873_v2, %v1896_v39  ;;  %v1936_v51 = vpop.f32.mrf.mxu2  ;;  %v1949_v35 = vpop.f32.mrf.mxu3 }
 0x281   : > { %2807 = vst [vmem:[%s3704_s10 + $0x6c] sm:$0x77] %v1903_v23  ;;  %v1846_v12 = vpop.f32.mrf.mxu0  ;;  %v1859_v5 = vpop.f32.mrf.mxu1 }
 0x288   : > { %v1938_v30 = vpop.f32.mrf.mxu2  ;;  %v1951_v4 = vpop.f32.mrf.mxu3 }
 0x289   : > { %v1962_v55 = vpop.f32.mrf.mxu0  ;;  %v1975_v56 = vpop.f32.mrf.mxu1 }
 0x28c   : > { %2851 = vmatmul.msk.bf16.vlgmr.msrb.gmra.mxu0 %vm299_vm2, %v2380_v0  ;;  %2852 = vmatmul.msk.bf16.vlgmr.msrb.gmra.mxu1 %vm299_vm2, %v2380_v0 }
 0x28d   : > { %2853 = vmatmul.msk.bf16.vlgmr.msrb.gmra.mxu2 %vm299_vm2, %v2380_v0  ;;  %2547 = vmatpush.bf16.msrb.mxu0 %v3530_v15 }
 0x28e   : > { %2560 = vmatpush.bf16.msrb.mxu1 %v3537_v21  ;;  %2573 = vmatpush.bf16.msrb.mxu2 %v3540_v19 }
 0x28f   : > { %2854 = vmatmul.msk.bf16.vlgmr.msrb.gmra.mxu3 %vm299_vm2, %v2380_v0 }
 0x290   : > { %v1988_v33 = vpop.f32.mrf.mxu2  ;;  %v2001_v7 = vpop.f32.mrf.mxu3 }
 0x291   : > { %v1964_v22 = vpop.f32.mrf.mxu0  ;;  %v1977_v53 = vpop.f32.mrf.mxu1 }
 0x298   : > { %v1990_v47 = vpop.f32.mrf.mxu2  ;;  %v2003_v6 = vpop.f32.mrf.mxu3 }
 0x299   : > { %v2014_v57 = vpop.f32.mrf.mxu0  ;;  %v2027_v14 = vpop.f32.mrf.mxu1 }
 0x29c   : > { %2855 = vmatmul.msk.bf16.vlgmr.msra.gmra.mxu0 %vm299_vm2, %v2380_v0  ;;  %2856 = vmatmul.msk.bf16.vlgmr.msra.gmra.mxu1 %vm299_vm2, %v2380_v0 }
 0x29d   : > { %2857 = vmatmul.msk.bf16.vlgmr.msra.gmra.mxu2 %vm299_vm2, %v2380_v0 }
 0x29f   : > { %2858 = vmatmul.msk.bf16.vlgmr.msra.gmra.mxu3 %vm299_vm2, %v2380_v0 }
 0x2a0   : > { %v3975_v15 = vpop.f32.mrf.mxu2  ;;  %v3977_v21 = vpop.f32.mrf.mxu3 }
 0x2a1   : > { %v2016_v19 = vpop.f32.mrf.mxu0  ;;  %v2029_v18 = vpop.f32.mrf.mxu1 }
 0x2a8   : > { %v2042_v8 = vpop.f32.mrf.mxu2  ;;  %v2055_v25 = vpop.f32.mrf.mxu3 }
 0x2a9   : > { %v3979_v17 = vpop.f32.mrf.mxu0  ;;  %v3981_v10 = vpop.f32.mrf.mxu1 }
 0x2ac   : > { %2859 = vmatmul.msk.bf16.vlgmr.msrb.gmra.mxu0 %vm299_vm2, %v2380_v0  ;;  %2860 = vmatmul.msk.bf16.vlgmr.msrb.gmra.mxu1 %vm299_vm2, %v2380_v0 }
 0x2ad   : > { %2861 = vmatmul.msk.bf16.vlgmr.msrb.gmra.mxu2 %vm299_vm2, %v2380_v0 }
 0x2b0   : > { %v3986_v11 = vpop.f32.mrf.mxu2  ;;  %v3988_v26 = vpop.f32.mrf.mxu3 }
 0x2b1   : > { %v2068_v59 = vpop.f32.mrf.mxu0  ;;  %v2081_v29 = vpop.f32.mrf.mxu1 }
 0x2b8   : > { %v2094_v60 = vpop.f32.mrf.mxu2  ;;  %v2107_v61 = vpop.f32.mrf.mxu3 }
 0x2b9   : > { %v3990_v44 = vpop.f32.mrf.mxu0  ;;  %v2134_v16 = vpop.f32.mrf.mxu1 }
 0x2ba   : > { %v2135_v63 = vadd.f32 %v2134_v16, %v1936_v51 }
 0x2bc   : > { %v2320_v62 = vadd.f32 %v2135_v63, %v3698_v52 }
 0x2c0   : > { %v2147_v24 = vpop.f32.mrf.mxu2  ;;  %v2160_v32 = vpop.f32.mrf.mxu3 }
 0x2c1   : > { %v2148_v42 = vadd.f32 %v2147_v24, %v1949_v35  ;;  %v2120_v58 = vpop.f32.mrf.mxu0  ;;  %v2136_v20 = vpop.f32.mrf.mxu1  ;;  %v2161_v45 = vadd.f32 %v2160_v32, %v1962_v55 }
 0x2c3   : > { %v2321_v36 = vadd.f32 %v2148_v42, %v3698_v52  ;;  %v2322_v46 = vadd.f32 %v2161_v45, %v3698_v52 }
 0x2c5   : > { %v2349_v13 = vrot.slane %v2321_v36, 4 }
 0x2c7   : > { %v2356_v40 = vsel %vm303_vm1, %v2320_v62, %v2349_v13 }
 0x2c8   : > { %2839 = vst [vmem:[%s3704_s10 + $0x78] sm:$0x77] %v2356_v40  ;;  %v2149_v27 = vpop.f32.mrf.mxu2  ;;  %v2162_v50 = vpop.f32.mrf.mxu3 }
 0x2c9   : > { %v2173_v37 = vpop.f32.mrf.mxu0  ;;  %v2186_v3 = vpop.f32.mrf.mxu1 }
 0x2ca   : > { %v2174_v31 = vadd.f32 %v2173_v37, %v1975_v56  ;;  %v2187_v0 = vadd.f32 %v2186_v3, %v1988_v33 }
 0x2cc   : > { %v2323_v43 = vadd.f32 %v2174_v31, %v3698_v52  ;;  %v2324_v1 = vadd.f32 %v2187_v0, %v3698_v52 }
 0x2ce   : > { %v2350_v9 = vrot.slane %v2323_v43, 4 }
 0x2d0   : > { %v2357_v49 = vsel %vm303_vm1, %v2322_v46, %v2350_v9  ;;  %v2199_v28 = vpop.f32.mrf.mxu2  ;;  %v2212_v48 = vpop.f32.mrf.mxu3 }
 0x2d1   : > { %2840 = vst [vmem:[%s3704_s10 + $0x80] sm:$0x77] %v2357_v49  ;;  %v2200_v41 = vadd.f32 %v2199_v28, %v2001_v7  ;;  %v2175_v54 = vpop.f32.mrf.mxu0  ;;  %v2188_v34 = vpop.f32.mrf.mxu1  ;;  %v2213_v5 = vadd.f32 %v2212_v48, %v2014_v57 }
 0x2d3   : > { %v2325_v38 = vadd.f32 %v2200_v41, %v3698_v52  ;;  %v2326_v55 = vadd.f32 %v2213_v5, %v3698_v52 }
 0x2d5   : > { %v2351_v2 = vrot.slane %v2325_v38, 4 }
 0x2d7   : > { %v2358_v39 = vsel %vm303_vm1, %v2324_v1, %v2351_v2 }
 0x2d8   : > { %2841 = vst [vmem:[%s3704_s10 + $0x88] sm:$0x77] %v2358_v39  ;;  %v2201_v23 = vpop.f32.mrf.mxu2  ;;  %v2214_v51 = vpop.f32.mrf.mxu3 }
 0x2d9   : > { %v2225_v35 = vpop.f32.mrf.mxu0  ;;  %v2238_v12 = vpop.f32.mrf.mxu1 }
 0x2da   : > { %v2226_v30 = vadd.f32 %v2225_v35, %v2027_v14  ;;  %v2239_v53 = vadd.f32 %v2238_v12, %v3975_v15 }
 0x2dc   : > { %v2327_v4 = vadd.f32 %v2226_v30, %v3698_v52  ;;  %v2328_v14 = vadd.f32 %v2239_v53, %v3698_v52 }
 0x2de   : > { %v2352_v56 = vrot.slane %v2327_v4, 4 }
 0x2e0   : > { %v2359_v33 = vsel %vm303_vm1, %v2326_v55, %v2352_v56  ;;  %v2251_v7 = vpop.f32.mrf.mxu2  ;;  %v2264_v22 = vpop.f32.mrf.mxu3 }
 0x2e1   : > { %2842 = vst [vmem:[%s3704_s10 + $0x90] sm:$0x77] %v2359_v33  ;;  %v2252_v47 = vadd.f32 %v2251_v7, %v3977_v21  ;;  %v2227_v6 = vpop.f32.mrf.mxu0  ;;  %v2240_v19 = vpop.f32.mrf.mxu1  ;;  %v2265_v61 = vadd.f32 %v2264_v22, %v3979_v17 }
 0x2e3   : > { %v2329_v57 = vadd.f32 %v2252_v47, %v3698_v52  ;;  %v2330_v16 = vadd.f32 %v2265_v61, %v3698_v52 }
 0x2e5   : > { %v2353_v18 = vrot.slane %v2329_v57, 4 }
 0x2e7   : > { %v2360_v8 = vsel %vm303_vm1, %v2328_v14, %v2353_v18 }
 0x2e8   : > { %2843 = vst [vmem:[%s3704_s10 + $0x98] sm:$0x77] %v2360_v8  ;;  %v2253_v25 = vpop.f32.mrf.mxu2  ;;  %v2266_v59 = vpop.f32.mrf.mxu3 }
 0x2e9   : > { %v2277_v29 = vpop.f32.mrf.mxu0  ;;  %v2290_v60 = vpop.f32.mrf.mxu1 }
 0x2ea   : > { %v2278_v15 = vadd.f32 %v2277_v29, %v3981_v10  ;;  %v2291_v58 = vadd.f32 %v2290_v60, %v3986_v11 }
 0x2ec   : > { %v2331_v21 = vadd.f32 %v2278_v15, %v3698_v52  ;;  %v2332_v40 = vadd.f32 %v2291_v58, %v3698_v52 }
 0x2ee   : > { %v2354_v24 = vrot.slane %v2331_v21, 4 }
 0x2f0   : > { %v2361_v32 = vsel %vm303_vm1, %v2330_v16, %v2354_v24  ;;  %v2303_v63 = vpop.f32.mrf.mxu2  ;;  %v2316_v42 = vpop.f32.mrf.mxu3 }
 0x2f1   : > { %2844 = vst [vmem:[%s3704_s10 + $0xa0] sm:$0x77] %v2361_v32  ;;  %v2304_v20 = vadd.f32 %v2303_v63, %v3988_v26  ;;  %v2317_v17 = vadd.f32 %v2316_v42, %v3990_v44  ;;  %v2279_v36 = vpop.f32.mrf.mxu0  ;;  %v2292_v10 = vpop.f32.mrf.mxu1 }
 0x2f3   : > { %v2333_v62 = vadd.f32 %v2304_v20, %v3698_v52  ;;  %v2334_v13 = vadd.f32 %v2317_v17, %v3698_v52 }
 0x2f5   : > { %v2355_v27 = vrot.slane %v2333_v62, 4  ;;  %2846 = vst.msk [vmem:[%s3704_s10 + $0xb0] sm:$0x7] %vm1459_vm5, %v2334_v13 }
 0x2f7   : > { %v2362_v50 = vsel %vm303_vm1, %v2332_v40, %v2355_v27 }
 0x2f8   : > { %2845 = vst [vmem:[%s3704_s10 + $0xa8] sm:$0x77] %v2362_v50  ;;  %v2305_v11 = vpop.f32.mrf.mxu2  ;;  %v2318_v37 = vpop.f32.mrf.mxu3 }
 0x2f9   : > { %v2393_v26 = vpop.f32.mrf.mxu0  ;;  %v2406_v44 = vpop.f32.mrf.mxu1 }
 0x2fa   : > { %v2394_v3 = vadd.f32 %v2393_v26, %v3698_v52  ;;  %v2407_v45 = vadd.f32 %v2406_v44, %v3698_v52 }
 0x2fc   : > { %v2593_v31 = vrot.slane %v2407_v45, 4 }
 0x2fe   : > { %v2600_v43 = vsel %vm303_vm1, %v2394_v3, %v2593_v31 }
 0x2ff   : > { %2862 = vst [vmem:[%s3704_s10 + $0xb4] sm:$0x77] %v2600_v43 }
 0x300   : > { %v2419_v46 = vpop.f32.mrf.mxu2  ;;  %v2432_v9 = vpop.f32.mrf.mxu3 }
 0x301   : > { %v2433_v49 = vadd.f32 %v2432_v9, %v3698_v52  ;;  %v2395_v28 = vpop.f32.mrf.mxu0  ;;  %v2408_v48 = vpop.f32.mrf.mxu1  ;;  %v2420_v0 = vadd.f32 %v2419_v46, %v3698_v52 }
 0x303   : > { %v2594_v41 = vrot.slane %v2433_v49, 4 }
 0x305   : > { %v2601_v54 = vsel %vm303_vm1, %v2420_v0, %v2594_v41 }
 0x306   : > { %2863 = vst [vmem:[%s3704_s10 + $0xbc] sm:$0x77] %v2601_v54 }
 0x308   : > { %v2421_v34 = vpop.f32.mrf.mxu2  ;;  %v2434_v38 = vpop.f32.mrf.mxu3 }
 0x309   : > { %v2445_v1 = vpop.f32.mrf.mxu0  ;;  %v2458_v2 = vpop.f32.mrf.mxu1 }
 0x30a   : > { %v2446_v39 = vadd.f32 %v2445_v1, %v3698_v52  ;;  %v2459_v23 = vadd.f32 %v2458_v2, %v3698_v52 }
 0x30c   : > { %v2595_v51 = vrot.slane %v2459_v23, 4 }
 0x30e   : > { %v2602_v35 = vsel %vm303_vm1, %v2446_v39, %v2595_v51 }
 0x30f   : > { %2864 = vst [vmem:[%s3704_s10 + $0xc4] sm:$0x77] %v2602_v35 }
 0x310   : > { %v2471_v12 = vpop.f32.mrf.mxu2 }
 0x311   : > { %v2447_v5 = vpop.f32.mrf.mxu0  ;;  %v2460_v30 = vpop.f32.mrf.mxu1  ;;  %v2472_v56 = vadd.f32 %v2471_v12, %v3698_v52 }
 0x312   : > { %v2484_v4 = vpop.f32.mrf.mxu3 }
 0x313   : > { %v2485_v55 = vadd.f32 %v2484_v4, %v3698_v52 }
 0x315   : > { %v2596_v33 = vrot.slane %v2485_v55, 4 }
 0x317   : > { %v2603_v7 = vsel %vm303_vm1, %v2472_v56, %v2596_v33 }
 0x318   : > { %2865 = vst [vmem:[%s3704_s10 + $0xcc] sm:$0x77] %v2603_v7  ;;  %v2473_v22 = vpop.f32.mrf.mxu2 }
 0x319   : > { %v2497_v53 = vpop.f32.mrf.mxu0  ;;  %v2510_v47 = vpop.f32.mrf.mxu1 }
 0x31a   : > { %v2486_v6 = vpop.f32.mrf.mxu3  ;;  %v2498_v19 = vadd.f32 %v2497_v53, %v3698_v52  ;;  %v2511_v57 = vadd.f32 %v2510_v47, %v3698_v52 }
 0x31c   : > { %v2597_v14 = vrot.slane %v2511_v57, 4 }
 0x31e   : > { %v2604_v18 = vsel %vm303_vm1, %v2498_v19, %v2597_v14 }
 0x31f   : > { %2866 = vst [vmem:[%s3704_s10 + $0xd4] sm:$0x77] %v2604_v18 }
 0x320   : > { %v2523_v8 = vpop.f32.mrf.mxu2 }
 0x321   : > { %v2499_v25 = vpop.f32.mrf.mxu0  ;;  %v2512_v59 = vpop.f32.mrf.mxu1  ;;  %v2524_v61 = vadd.f32 %v2523_v8, %v3698_v52 }
 0x322   : > { %v2536_v29 = vpop.f32.mrf.mxu3 }
 0x323   : > { %v2537_v60 = vadd.f32 %v2536_v29, %v3698_v52 }
 0x325   : > { %v2598_v15 = vrot.slane %v2537_v60, 4 }
 0x327   : > { %v2605_v21 = vsel %vm303_vm1, %v2524_v61, %v2598_v15 }
 0x328   : > { %2867 = vst [vmem:[%s3704_s10 + $0xdc] sm:$0x77] %v2605_v21  ;;  %v2525_v16 = vpop.f32.mrf.mxu2 }
 0x329   : > { %v2549_v24 = vpop.f32.mrf.mxu0  ;;  %v2562_v32 = vpop.f32.mrf.mxu1 }
 0x32a   : > { %v2550_v63 = vadd.f32 %v2549_v24, %v3698_v52  ;;  %v2563_v42 = vadd.f32 %v2562_v32, %v3698_v52  ;;  %v2538_v58 = vpop.f32.mrf.mxu3 }
 0x32c   : > { %v2599_v20 = vrot.slane %v2563_v42, 4 }
 0x32e   : > { %v2606_v17 = vsel %vm303_vm1, %v2550_v63, %v2599_v20 }
 0x32f   : > { %2868 = vst [vmem:[%s3704_s10 + $0xe4] sm:$0x77] %v2606_v17 }
 0x330   : > { %v2575_v36 = vpop.f32.mrf.mxu2 }
 0x331   : > { %v2576_v10 = vadd.f32 %v2575_v36, %v3698_v52  ;;  %v2551_v62 = vpop.f32.mrf.mxu0  ;;  %v2564_v13 = vpop.f32.mrf.mxu1 }
 0x333   : > { %2869 = vst.msk [vmem:[%s3704_s10 + $0xec] sm:$0x7] %vm1459_vm5, %v2576_v10 }
 0x338   : > { %v2577_v40 = vpop.f32.mrf.mxu2 }
 0x339 PF: > { %s15_s12 = sadd.s32 1, %s2984_s12  }
 0x33a   : > { %p12_p7 = scmp.ge.s32.totalorder %s15_s12, 4  }
 0x33c   :  { %14 = sbr.rel (!%p12_p7) target bundleno = 2 (0x2), region = 82 }
 0x341   :  { %2644 = vsyncpa [#allocation3], 1 }
 0x342   :  { %2646 = vsyncpa [#allocation3 + $0x1], 1 }
 0x343   :  { %2647 = vsyncpa [#allocation5], 1 }

// kernel: _lambda_.4
= control target key start
LH: loop header
LB: loop body
LE: loop exit
PB: predicated region body
PF: predicated region fallthrough
CT: control target
= control target key end

     0   :  { %9 = vsyncpa [#allocation3], 0  ;;  %s4564_s0 = inlined_call_operand.vmem [shape: bf16[2,8,1892], index: 0, kind: input, shape index: {}]   ;;  %s4565_s1 = inlined_call_operand.hbm [shape: bf16[3,3,8,8], index: 1, kind: input, shape index: {}]   ;;  %s4566_s2 = inlined_call_operand.hbm [shape: f32[8,1], index: 2, kind: input, shape index: {}]   ;;  %s4567_s3 = inlined_call_operand.vmem [shape: f32[1,1763], index: 3, kind: input, shape index: {}]   ;;  %s4568_s4 = inlined_call_operand.vmem [shape: bf16[2,8,1892], index: 4, kind: output, shape index: {}]  }
   0x1   :  { %10 = vsyncpa [#allocation5], 0  ;;  %s3353_s15 = smov 0  }
   0x2 LB: > { %s147_s18 = sshll.u32 %s4565_s1, 4  ;;  %s3055_s19 = sadd.s32 4294967295, %s3312_s15   ;;  %s3312_s15 = sphi %s3353_s15, %s16_s15   ;;  %s148_s18 = int_to_ptr.hbm [resolvable:$true] %s147_s18 }
   0x3   : > { %p3057_p0 = scmp.ge.s32.totalorder %s3312_s15, 1  ;;  %p136_p1 = scmp.lt.s32.totalorder %s3312_s15, 3 }
   0x4   : > { %p3210_p2 = scmp.eq.s32.totalorder %s3055_s19, 0  ;;  %s3314_s21 = smov [#allocation2]  }
   0x5   : > { %p3364_p3 = pnand %p3057_p0, %p136_p1  ;;  %s149_s22 = sshll.u32 %s3314_s21, 4  ;;  %s150_s22 = int_to_ptr.vmem [resolvable:$true] %s149_s22 }
   0x6   : > { %s162_s25 = sshll.u32 %s4566_s2, 4  ;;  %s3315_s26 = smov [#allocation4]   ;;  %s163_s25 = int_to_ptr.hbm [resolvable:$true] %s162_s25 }
   0x7   : > { %p3203_p4 = pneg %p3364_p3  ;;  %s164_s27 = sshll.u32 %s3315_s26, 4  ;;  %s165_s27 = int_to_ptr.vmem [resolvable:$true] %s164_s27 }
   0x8   : > { %s3316_s28 = smov 64   ;;  %s3317_s29 = smov 4  }
   0x9   : > { %p3204_p5 = pnand %p3210_p2, %p3203_p4  ;;  %188 = sbr.rel (%p3364_p3) target bundleno = 902 (0x386), region = 36 }
   0xb   : > { %3206 = dma.hbm_to_vmem [thread:$0]  (!%p3204_p5), %s148_s18, 576, %s150_s22, [#allocation3], %s3316_s28, %s3316_s28, %s3317_s29  }
   0xc   : > { %3209 = dma.hbm_to_vmem [thread:$0]  (!%p3204_p5), %s163_s25, 128, %s165_s27, [#allocation5]  }
   0xe   : > { %3303 = dma.done.wait (%p3210_p2), [#allocation3], 576  }
   0xf   : > { %3305 = vsyncadd (%p3210_p2), [#allocation3], 4294966720 }
  0x10   : > { %3307 = dma.done.wait (%p3210_p2), [#allocation5], 128  }
  0x11   : > { %3309 = vsyncadd (%p3210_p2), [#allocation5], 4294967168  ;;  %p220_p6 = scmp.lt.s32.totalorder %s3055_s19, 1  ;;  %s3318_s8 = smov 127   ;;  %vm305_vm0 = vcmask 1039360   ;;  %vm323_vm1 = vcmask 1043456  }
  0x12   : > { %s3319_s9 = smov 126   ;;  %s3320_s10 = smov 85   ;;  %v3513_v51 = vld [vmem:[#allocation2 + $0x4] sm:$0xf]  ;;  %vm319_vm2 = vcmask 64512   ;;  %vm805_vm3 = vcmask 1031168  }
  0x13   : > { %s4571_s19 = smov (!%p220_p6, %s3055_s19), 1  ;;  %s3321_s11 = smov 84   ;;  %vm1095_vm4 = vcmask 695296   ;;  %vm1383_vm5 = vcmask 687104   ;;  %vm1671_vm6 = vcmask 678912   ;;  %vm1959_vm7 = vcmask 343040  }
  0x14   : > { %s3194_s30 = smul.u32 60, %s4571_s19  ;;  %s3322_s12 = smov 83   ;;  %vm2247_vm8 = vcmask 334848   ;;  %vm2535_vm9 = vcmask 326656  }
  0x15   : > { %s3323_s13 = smov 42   ;;  %s3324_s14 = smov 41  }
  0x16   : > { %s3388_s7 = scalar_lea.vmem %s4564_s0, %s3194_s30  ;;  %s3325_s16 = smov 40  }
  0x17   : > { %v232_v0 = vld [vmem:[%s3388_s7 + $0x8] sm:$0xff]  ;;  %v231_v1 = vld [vmem:[%s3388_s7] sm:$0xff]  ;;  %v233_v2 = vld [vmem:[%s3388_s7 + $0x10] sm:$0xff]  ;;  %s4331_s20 = scalar_lea.vmem %s4568_s4, %s3194_s30  ;;  %s3327_s22 = smov 44  }
  0x18   : > { %v251_v3 = vunpack.c.l.b16 %v232_v0  ;;  %v249_v4 = vunpack.c.l.b16 %v231_v1  ;;  %v253_v5 = vunpack.c.l.b16 %v233_v2  ;;  %v252_v9 = vunpack.c.h.b16 %v232_v0  ;;  %v234_v14 = vld [vmem:[%s3388_s7 + $0x18] sm:$0xff]  ;;  %v235_v18 = vld [vmem:[%s3388_s7 + $0x20] sm:$0xff]  ;;  %v236_v22 = vld [vmem:[%s3388_s7 + $0x28] sm:$0xff] }
  0x19   : > { %v250_v10 = vunpack.c.h.b16 %v231_v1  ;;  %v254_v11 = vunpack.c.h.b16 %v233_v2  ;;  %v256_v16 = vunpack.c.h.b16 %v234_v14  ;;  %v255_v17 = vunpack.c.l.b16 %v234_v14  ;;  %v237_v29 = vld [vmem:[%s3388_s7 + $0x30] sm:$0xff] }
  0x1a   : > { %v3393_v6 = vpack.c.b16 %v251_v3, %v251_v3  ;;  %v3395_v7 = vpack.c.b16 %v249_v4, %v249_v4  ;;  %v3397_v8 = vpack.c.b16 %v253_v5, %v253_v5  ;;  %v3405_v12 = vpack.c.b16 %v252_v9, %v252_v9 }
  0x1b   : > { %v3407_v13 = vpack.c.b16 %v250_v10, %v250_v10  ;;  %v3410_v15 = vpack.c.b16 %v254_v11, %v254_v11  ;;  %v257_v19 = vunpack.c.l.b16 %v235_v18  ;;  %v3419_v20 = vpack.c.b16 %v256_v16, %v256_v16 }
  0x1c   : > { %281 = vrot.lane.b32.xlu1 %v3393_v6, %s3318_s8  ;;  %277 = vrot.lane.b32.xlu0 %v3395_v7, %s3318_s8  ;;  %v3421_v21 = vpack.c.b16 %v255_v17, %v255_v17  ;;  %v259_v24 = vunpack.c.l.b16 %v236_v22  ;;  %v258_v25 = vunpack.c.h.b16 %v235_v18  ;;  %v260_v26 = vunpack.c.h.b16 %v236_v22 }
  0x1d   : > { %285 = vrot.lane.b32.xlu2 %v3397_v8, %s3318_s8  ;;  %v3424_v23 = vpack.c.b16 %v257_v19, %v257_v19  ;;  %v262_v31 = vunpack.c.h.b16 %v237_v29  ;;  %v261_v32 = vunpack.c.l.b16 %v237_v29  ;;  %v552_v9 = vsel %vm323_vm1, %v3395_v7, 0 }
  0x1e   : > { %v3432_v27 = vpack.c.b16 %v259_v24, %v259_v24  ;;  %v3434_v28 = vpack.c.b16 %v258_v25, %v258_v25  ;;  %v3437_v30 = vpack.c.b16 %v260_v26, %v260_v26  ;;  %v555_v18 = vsel %vm323_vm1, %v3407_v13, 0 }
  0x1f   : > { %v3445_v33 = vpack.c.b16 %v262_v31, %v262_v31  ;;  %v3447_v34 = vpack.c.b16 %v261_v32, %v261_v32  ;;  %v564_v24 = vsel %vm323_vm1, %v3397_v8, 0  ;;  %v567_v25 = vsel %vm323_vm1, %v3410_v15, 0  ;;  %v238_v31 = vld [vmem:[%s3388_s7 + $0x38] sm:$0xf] }
  0x20   : > { %v558_v26 = vsel %vm323_vm1, %v3393_v6, 0  ;;  %v561_v29 = vsel %vm323_vm1, %v3405_v12, 0  ;;  %v1063_v32 = vunpack.c.l.b16 %v238_v31 }
  0x24   : > { %283 = vrot.lane.b32.xlu1 %v3405_v12, %s3318_s8  ;;  %279 = vrot.lane.b32.xlu0 %v3407_v13, %s3318_s8 }
  0x25   : > { %287 = vrot.lane.b32.xlu2 %v3410_v15, %s3318_s8 }
  0x2c   : > { %291 = vrot.lane.b32.xlu1 %v3419_v20, %s3318_s8  ;;  %289 = vrot.lane.b32.xlu0 %v3421_v21, %s3318_s8 }
  0x2d   : > { %293 = vrot.lane.b32.xlu2 %v3424_v23, %s3318_s8 }
  0x34   : > { %297 = vrot.lane.b32.xlu1 %v3432_v27, %s3318_s8  ;;  %295 = vrot.lane.b32.xlu0 %v3434_v28, %s3318_s8 }
  0x35   : > { %299 = vrot.lane.b32.xlu2 %v3437_v30, %s3318_s8 }
  0x3c   : > { %303 = vrot.lane.b32.xlu1 %v3445_v33, %s3318_s8  ;;  %301 = vrot.lane.b32.xlu0 %v3447_v34, %s3318_s8 }
  0x3d   : > { %777 = vrot.lane.b32.xlu2 %v3395_v7, %s3319_s9 }
  0x44   : > { %781 = vrot.lane.b32.xlu1 %v3393_v6, %s3319_s9  ;;  %779 = vrot.lane.b32.xlu0 %v3407_v13, %s3319_s9 }
  0x45   : > { %783 = vrot.lane.b32.xlu2 %v3405_v12, %s3319_s9 }
  0x4c   : > { %787 = vrot.lane.b32.xlu1 %v3410_v15, %s3319_s9  ;;  %785 = vrot.lane.b32.xlu0 %v3397_v8, %s3319_s9 }
  0x4d   : > { %789 = vrot.lane.b32.xlu2 %v3421_v21, %s3319_s9 }
  0x54   : > { %793 = vrot.lane.b32.xlu1 %v3424_v23, %s3319_s9  ;;  %791 = vrot.lane.b32.xlu0 %v3419_v20, %s3319_s9 }
  0x55   : > { %795 = vrot.lane.b32.xlu2 %v3434_v28, %s3319_s9 }
  0x5c   : > { %797 = vrot.lane.b32.xlu0 %v3432_v27, %s3319_s9  ;;  %799 = vrot.lane.b32.xlu1 %v3437_v30, %s3319_s9 }
  0x5d   : > { %801 = vrot.lane.b32.xlu2 %v3447_v34, %s3319_s9 }
  0x64   : > { %803 = vrot.lane.b32.xlu0 %v3445_v33, %s3319_s9  ;;  %1065 = vrot.lane.b32.xlu1 %v3395_v7, %s3320_s10 }
  0x65   : > { %1067 = vrot.lane.b32.xlu2 %v3407_v13, %s3320_s10 }
  0x6c   : > { %1071 = vrot.lane.b32.xlu1 %v3405_v12, %s3320_s10  ;;  %1069 = vrot.lane.b32.xlu0 %v3393_v6, %s3320_s10 }
  0x6d   : > { %1073 = vrot.lane.b32.xlu2 %v3397_v8, %s3320_s10 }
  0x74   : > { %1077 = vrot.lane.b32.xlu1 %v3421_v21, %s3320_s10  ;;  %1075 = vrot.lane.b32.xlu0 %v3410_v15, %s3320_s10 }
  0x75   : > { %1079 = vrot.lane.b32.xlu2 %v3419_v20, %s3320_s10 }
  0x77   : > { %v286_v35 = vpop.permute.xlu2 %285 }
  0x7c   : > { %1081 = vrot.lane.b32.xlu0 %v3424_v23, %s3320_s10  ;;  %1083 = vrot.lane.b32.xlu1 %v3434_v28, %s3320_s10 }
  0x7d   : > { %1085 = vrot.lane.b32.xlu2 %v3432_v27, %s3320_s10 }
  0x7f   : > { %v288_v38 = vpop.permute.xlu2 %287 }
  0x80   : > { %v310_v39 = vsel %vm305_vm0, %v286_v35, %v288_v38 }
  0x81   : > { %v337_v42 = vsel %vm323_vm1, %v310_v39, 0  ;;  %v570_v39 = vsel %vm323_vm1, %v3421_v21, 0 }
  0x84   : > { %1087 = vrot.lane.b32.xlu0 %v3437_v30, %s3320_s10  ;;  %1089 = vrot.lane.b32.xlu1 %v3447_v34, %s3320_s10 }
  0x85   : > { %1091 = vrot.lane.b32.xlu2 %v3445_v33, %s3320_s10 }
  0x87   : > { %v294_v52 = vpop.permute.xlu2 %293 }
  0x8c   : > { %1353 = vrot.lane.b32.xlu1 %v3395_v7, %s3321_s11 }
  0x8d   : > { %1355 = vrot.lane.b32.xlu2 %v3407_v13, %s3321_s11 }
  0x8e   : > { %v282_v36 = vpop.permute.xlu1 %281  ;;  %v278_v37 = vpop.permute.xlu0 %277 }
  0x8f   : > { %v300_v61 = vpop.permute.xlu2 %299 }
  0x94   : > { %1359 = vrot.lane.b32.xlu1 %v3405_v12, %s3321_s11 }
  0x95   : > { %1361 = vrot.lane.b32.xlu2 %v3397_v8, %s3321_s11 }
  0x96   : > { %v284_v40 = vpop.permute.xlu1 %283  ;;  %v280_v41 = vpop.permute.xlu0 %279 }
  0x97   : > { %v306_v43 = vsel %vm305_vm0, %v278_v37, %v280_v41  ;;  %v307_v44 = vsel %vm305_vm0, %v280_v41, %v282_v36  ;;  %v308_v45 = vsel %vm305_vm0, %v282_v36, %v284_v40  ;;  %v309_v46 = vsel %vm305_vm0, %v284_v40, %v286_v35  ;;  %v3597_v36 = vld [vmem:[#allocation2] sm:$0xf] }
  0x98   : > { %v325_v47 = vsel %vm323_vm1, %v306_v43, 0  ;;  %v328_v48 = vsel %vm323_vm1, %v307_v44, 0  ;;  %v331_v49 = vsel %vm323_vm1, %v308_v45, 0  ;;  %v334_v50 = vsel %vm323_vm1, %v309_v46, 0  ;;  %v778_v43 = vpop.permute.xlu2 %777 }
  0x99   : > { %373 = vmatpush.bf16.msra.mxu0 %v325_v47  ;;  %386 = vmatpush.bf16.msra.mxu1 %v328_v48  ;;  %v3585_v35 = vpack.c.b16 %v1063_v32, %v1063_v32  ;;  %v576_v37 = vsel %vm323_vm1, %v3424_v23, 0  ;;  %v573_v40 = vsel %vm323_vm1, %v3419_v20, 0  ;;  %v588_v41 = vsel %vm323_vm1, %v3447_v34, 0 }
  0x9a   : > { %399 = vmatpush.bf16.msra.mxu2 %v331_v49  ;;  %412 = vmatpush.bf16.msra.mxu3 %v334_v50  ;;  %v582_v45 = vsel %vm323_vm1, %v3432_v27, 0  ;;  %v585_v46 = vsel %vm323_vm1, %v3437_v30, 0 }
  0x9b   : > { %1093 = vrot.lane.b32.xlu0 %v3585_v35, %s3320_s10 }
  0x9c   : > { %3066 = vmatmul.msk.bf16.vlgmr.msra.gmra.mxu0 %vm319_vm2, %v3513_v51  ;;  %3067 = vmatmul.msk.bf16.vlgmr.msra.gmra.mxu1 %vm319_vm2, %v3513_v51 }
  0x9d   : > { %425 = vmatpush.bf16.msrb.mxu0 %v337_v42  ;;  %3068 = vmatmul.msk.bf16.vlgmr.msra.gmra.mxu2 %vm319_vm2, %v3513_v51  ;;  %v591_v42 = vsel %vm323_vm1, %v3445_v33, 0 }
  0x9e   : > { %3069 = vmatmul.msk.bf16.vlgmr.msra.gmra.mxu3 %vm319_vm2, %v3513_v51  ;;  %v292_v53 = vpop.permute.xlu1 %291  ;;  %v290_v54 = vpop.permute.xlu0 %289  ;;  %1365 = vrot.lane.b32.xlu1 %v3421_v21, %s3321_s11 }
  0x9f   : > { %1367 = vrot.lane.b32.xlu2 %v3419_v20, %s3321_s11  ;;  %v311_v55 = vsel %vm305_vm0, %v288_v38, %v290_v54  ;;  %v312_v56 = vsel %vm305_vm0, %v290_v54, %v292_v53  ;;  %v313_v57 = vsel %vm305_vm0, %v292_v53, %v294_v52  ;;  %v579_v38 = vsel %vm323_vm1, %v3434_v28, 0 }
  0xa0   : > { %v340_v58 = vsel %vm323_vm1, %v311_v55, 0  ;;  %v343_v59 = vsel %vm323_vm1, %v312_v56, 0  ;;  %v346_v60 = vsel %vm323_vm1, %v313_v57, 0  ;;  %v784_v48 = vpop.permute.xlu2 %783 }
  0xa1   : > { %438 = vmatpush.bf16.msrb.mxu1 %v340_v58  ;;  %451 = vmatpush.bf16.msrb.mxu2 %v343_v59 }
  0xa2   : > { %464 = vmatpush.bf16.msrb.mxu3 %v346_v60 }
  0xa3   : > { %1357 = vrot.lane.b32.xlu0 %v3393_v6, %s3321_s11 }
  0xa6   : > { %v298_v62 = vpop.permute.xlu1 %297  ;;  %v296_v63 = vpop.permute.xlu0 %295  ;;  %1371 = vrot.lane.b32.xlu1 %v3434_v28, %s3321_s11 }
  0xa7   : > { %1373 = vrot.lane.b32.xlu2 %v3432_v27, %s3321_s11  ;;  %v314_v0 = vsel %vm305_vm0, %v294_v52, %v296_v63  ;;  %v315_v1 = vsel %vm305_vm0, %v296_v63, %v298_v62  ;;  %v316_v2 = vsel %vm305_vm0, %v298_v62, %v300_v61 }
  0xa8   : > { %v349_v3 = vsel %vm323_vm1, %v314_v0, 0  ;;  %v352_v4 = vsel %vm323_vm1, %v315_v1, 0  ;;  %v355_v5 = vsel %vm323_vm1, %v316_v2, 0  ;;  %v790_v59 = vpop.permute.xlu2 %789 }
  0xa9   : > { %477 = vmatpush.bf16.msra.mxu0 %v349_v3  ;;  %490 = vmatpush.bf16.msra.mxu1 %v352_v4 }
  0xaa   : > { %503 = vmatpush.bf16.msra.mxu2 %v355_v5 }
  0xab   : > { %1363 = vrot.lane.b32.xlu0 %v3410_v15, %s3321_s11 }
  0xac   : > { %3070 = vmatmul.msk.bf16.vlgmr.msrb.gmra.mxu0 %vm319_vm2, %v3513_v51  ;;  %3071 = vmatmul.msk.bf16.vlgmr.msrb.gmra.mxu1 %vm319_vm2, %v3513_v51 }
  0xad   : > { %3072 = vmatmul.msk.bf16.vlgmr.msrb.gmra.mxu2 %vm319_vm2, %v3513_v51 }
  0xae   : > { %3073 = vmatmul.msk.bf16.vlgmr.msrb.gmra.mxu3 %vm319_vm2, %v3513_v51  ;;  %v304_v10 = vpop.permute.xlu1 %303  ;;  %v302_v11 = vpop.permute.xlu0 %301  ;;  %600 = vmatpush.bf16.msrb.mxu2 %v552_v9 }
  0xaf   : > { %1377 = vrot.lane.b32.xlu1 %v3447_v34, %s3321_s11  ;;  %v364_v14 = vsel %vm323_vm1, %v304_v10, 0  ;;  %v317_v16 = vsel %vm305_vm0, %v300_v61, %v302_v11  ;;  %v318_v17 = vsel %vm305_vm0, %v302_v11, %v304_v10  ;;  %1379 = vrot.lane.b32.xlu2 %v3445_v33, %s3321_s11 }
  0xb0   : > { %v358_v19 = vsel %vm323_vm1, %v317_v16, 0  ;;  %v361_v22 = vsel %vm323_vm1, %v318_v17, 0  ;;  %542 = vmatpush.bf16.msrb.mxu1 %v364_v14  ;;  %v796_v9 = vpop.permute.xlu2 %795 }
  0xb1   : > { %516 = vmatpush.bf16.msra.mxu3 %v358_v19  ;;  %529 = vmatpush.bf16.msrb.mxu0 %v361_v22 }
  0xb3   : > { %1369 = vrot.lane.b32.xlu0 %v3424_v23, %s3321_s11 }
  0xb5   : > { %613 = vmatpush.bf16.msrb.mxu3 %v555_v18  ;;  %v3709_v18 = vld [vmem:[#allocation2 + $0x8] sm:$0xf] }
  0xb6   : > { %v780_v44 = vpop.permute.xlu0 %779  ;;  %v782_v47 = vpop.permute.xlu1 %781 }
  0xb7   : > { %1641 = vrot.lane.b32.xlu1 %v3395_v7, %s3322_s12  ;;  %1643 = vrot.lane.b32.xlu2 %v3407_v13, %s3322_s12  ;;  %v806_v50 = vsel %vm805_vm3, %v778_v43, %v780_v44  ;;  %v808_v52 = vsel %vm805_vm3, %v782_v47, %v784_v48 }
  0xb8   : > { %v823_v54 = vsel %vm323_vm1, %v806_v50, 0  ;;  %v829_v56 = vsel %vm323_vm1, %v808_v52, 0  ;;  %v802_v14 = vpop.permute.xlu2 %801 }
  0xbb   : > { %1375 = vrot.lane.b32.xlu0 %v3437_v30, %s3321_s11 }
  0xbc   : > { %3074 = vmatmul.msk.bf16.vlgmr.msra.gmra.mxu0 %vm319_vm2, %v3513_v51  ;;  %3075 = vmatmul.msk.bf16.vlgmr.msra.gmra.mxu1 %vm319_vm2, %v3513_v51 }
  0xbd   : > { %3076 = vmatmul.msk.bf16.vlgmr.msra.gmra.mxu2 %vm319_vm2, %v3513_v51  ;;  %626 = vmatpush.bf16.msra.mxu0 %v558_v26 }
  0xbe   : > { %3077 = vmatmul.msk.bf16.vlgmr.msra.gmra.mxu3 %vm319_vm2, %v3513_v51  ;;  %652 = vmatpush.bf16.msra.mxu2 %v564_v24  ;;  %v786_v49 = vpop.permute.xlu0 %785  ;;  %v788_v58 = vpop.permute.xlu1 %787 }
  0xbf   : > { %665 = vmatpush.bf16.msra.mxu3 %v567_v25  ;;  %639 = vmatpush.bf16.msra.mxu1 %v561_v29  ;;  %v809_v53 = vsel %vm805_vm3, %v784_v48, %v786_v49  ;;  %v810_v62 = vsel %vm805_vm3, %v786_v49, %v788_v58  ;;  %v811_v63 = vsel %vm805_vm3, %v788_v58, %v790_v59 }
  0xc0   : > { %1647 = vrot.lane.b32.xlu1 %v3405_v12, %s3322_s12  ;;  %1649 = vrot.lane.b32.xlu2 %v3397_v8, %s3322_s12  ;;  %v832_v57 = vsel %vm323_vm1, %v809_v53, 0  ;;  %v835_v2 = vsel %vm323_vm1, %v810_v62, 0  ;;  %v838_v3 = vsel %vm323_vm1, %v811_v63, 0 }
  0xc3   : > { %1381 = vrot.lane.b32.xlu0 %v3585_v35, %s3321_s11 }
  0xc6   : > { %v794_v60 = vpop.permute.xlu1 %793  ;;  %v792_v61 = vpop.permute.xlu0 %791 }
  0xc7   : > { %v812_v0 = vsel %vm805_vm3, %v790_v59, %v792_v61  ;;  %v813_v1 = vsel %vm805_vm3, %v792_v61, %v794_v60  ;;  %v814_v16 = vsel %vm805_vm3, %v794_v60, %v796_v9 }
  0xc8   : > { %1653 = vrot.lane.b32.xlu1 %v3421_v21, %s3322_s12  ;;  %1655 = vrot.lane.b32.xlu2 %v3419_v20, %s3322_s12  ;;  %v841_v4 = vsel %vm323_vm1, %v812_v0, 0  ;;  %v844_v5 = vsel %vm323_vm1, %v813_v1, 0  ;;  %v847_v24 = vsel %vm323_vm1, %v814_v16, 0 }
  0xcb   : > { %1645 = vrot.lane.b32.xlu0 %v3393_v6, %s3322_s12 }
  0xcc   : > { %3078 = vmatmul.msk.bf16.vlgmr.msrb.gmra.mxu0 %vm319_vm2, %v3513_v51  ;;  %3079 = vmatmul.msk.bf16.vlgmr.msrb.gmra.mxu1 %vm319_vm2, %v3513_v51  ;;  %v807_v51 = vsel %vm805_vm3, %v780_v44, %v782_v47 }
  0xcd   : > { %3080 = vmatmul.msk.bf16.vlgmr.msrb.gmra.mxu2 %vm319_vm2, %v3597_v36  ;;  %678 = vmatpush.bf16.msrb.mxu0 %v570_v39  ;;  %v826_v55 = vsel %vm323_vm1, %v807_v51, 0 }
  0xce   : > { %3081 = vmatmul.msk.bf16.vlgmr.msrb.gmra.mxu3 %vm319_vm2, %v3597_v36  ;;  %704 = vmatpush.bf16.msrb.mxu2 %v576_v37  ;;  %v798_v10 = vpop.permute.xlu0 %797  ;;  %v800_v11 = vpop.permute.xlu1 %799 }
  0xcf   : > { %717 = vmatpush.bf16.msrb.mxu3 %v579_v38  ;;  %691 = vmatpush.bf16.msrb.mxu1 %v573_v40  ;;  %v815_v17 = vsel %vm805_vm3, %v796_v9, %v798_v10  ;;  %v816_v19 = vsel %vm805_vm3, %v798_v10, %v800_v11  ;;  %v817_v22 = vsel %vm805_vm3, %v800_v11, %v802_v14 }
  0xd0   : > { %1659 = vrot.lane.b32.xlu1 %v3434_v28, %s3322_s12  ;;  %1661 = vrot.lane.b32.xlu2 %v3432_v27, %s3322_s12  ;;  %v850_v25 = vsel %vm323_vm1, %v815_v17, 0  ;;  %v853_v26 = vsel %vm323_vm1, %v816_v19, 0  ;;  %v856_v29 = vsel %vm323_vm1, %v817_v22, 0 }
  0xd3   : > { %1651 = vrot.lane.b32.xlu0 %v3410_v15, %s3322_s12 }
  0xd6   : > { %v804_v31 = vpop.permute.xlu0 %803  ;;  %v1066_v32 = vpop.permute.xlu1 %1065 }
  0xd7   : > { %v818_v38 = vsel %vm805_vm3, %v802_v14, %v804_v31  ;;  %v862_v44 = vsel %vm323_vm1, %v804_v31, 0 }
  0xd8   : > { %1665 = vrot.lane.b32.xlu1 %v3447_v34, %s3322_s12  ;;  %1667 = vrot.lane.b32.xlu2 %v3445_v33, %s3322_s12  ;;  %v859_v43 = vsel %vm323_vm1, %v818_v38, 0 }
  0xdb   : > { %1657 = vrot.lane.b32.xlu0 %v3424_v23, %s3322_s12 }
  0xdc   : > { %3082 = vmatmul.msk.bf16.vlgmr.msra.gmra.mxu0 %vm319_vm2, %v3597_v36  ;;  %3083 = vmatmul.msk.bf16.vlgmr.msra.gmra.mxu1 %vm319_vm2, %v3597_v36 }
  0xdd   : > { %3084 = vmatmul.msk.bf16.vlgmr.msra.gmra.mxu2 %vm319_vm2, %v3597_v36  ;;  %730 = vmatpush.bf16.msra.mxu0 %v582_v45 }
  0xde   : > { %3085 = vmatmul.msk.bf16.vlgmr.msra.gmra.mxu3 %vm319_vm2, %v3597_v36  ;;  %756 = vmatpush.bf16.msra.mxu2 %v588_v41  ;;  %v1070_v37 = vpop.permute.xlu0 %1069  ;;  %v1072_v47 = vpop.permute.xlu1 %1071 }
  0xdf   : > { %769 = vmatpush.bf16.msra.mxu3 %v591_v42  ;;  %743 = vmatpush.bf16.msra.mxu1 %v585_v46 }
  0xe0   : > { %1929 = vrot.lane.b32.xlu1 %v3395_v7, %s3323_s13  ;;  %1931 = vrot.lane.b32.xlu2 %v3407_v13, %s3323_s13 }
  0xe3   : > { %1663 = vrot.lane.b32.xlu0 %v3437_v30, %s3322_s12 }
  0xe6   : > { %v1078_v53 = vpop.permute.xlu1 %1077 }
  0xe8   : > { %1935 = vrot.lane.b32.xlu1 %v3405_v12, %s3323_s13  ;;  %1937 = vrot.lane.b32.xlu2 %v3397_v8, %s3323_s13 }
  0xeb   : > { %1669 = vrot.lane.b32.xlu0 %v3585_v35, %s3322_s12 }
  0xec   : > { %3086 = vmatmul.msk.bf16.vlgmr.msrb.gmra.mxu0 %vm319_vm2, %v3597_v36  ;;  %3087 = vmatmul.msk.bf16.vlgmr.msrb.gmra.mxu1 %vm319_vm2, %v3597_v36 }
  0xed   : > { %3088 = vmatmul.msk.bf16.vlgmr.msrb.gmra.mxu2 %vm319_vm2, %v3597_v36  ;;  %871 = vmatpush.bf16.msrb.mxu0 %v823_v54  ;;  %v1076_v54 = vpop.permute.xlu0 %1075 }
  0xee   : > { %3089 = vmatmul.msk.bf16.vlgmr.msrb.gmra.mxu3 %vm319_vm2, %v3597_v36  ;;  %884 = vmatpush.bf16.msrb.mxu1 %v826_v55  ;;  %v1101_v62 = vsel %vm1095_vm4, %v1076_v54, %v1078_v53  ;;  %v1084_v14 = vpop.permute.xlu1 %1083 }
  0xef   : > { %897 = vmatpush.bf16.msrb.mxu2 %v829_v56  ;;  %910 = vmatpush.bf16.msrb.mxu3 %v832_v57  ;;  %v1098_v57 = vsel %vm1095_vm4, %v1070_v37, %v1072_v47 }
  0xf0   : > { %1941 = vrot.lane.b32.xlu1 %v3421_v21, %s3323_s13  ;;  %1943 = vrot.lane.b32.xlu2 %v3419_v20, %s3323_s13  ;;  %v1120_v63 = vsel %vm323_vm1, %v1098_v57, 0 }
  0xf3   : > { %1933 = vrot.lane.b32.xlu0 %v3393_v6, %s3323_s13 }
  0xf5   : > { %v1082_v11 = vpop.permute.xlu0 %1081 }
  0xf8   : > { %1947 = vrot.lane.b32.xlu1 %v3434_v28, %s3323_s13  ;;  %1949 = vrot.lane.b32.xlu2 %v3432_v27, %s3323_s13 }
  0xfb   : > { %1939 = vrot.lane.b32.xlu0 %v3410_v15, %s3323_s13 }
  0xfc   : > { %3090 = vmatmul.msk.bf16.vlgmr.msra.gmra.mxu0 %vm319_vm2, %v3597_v36  ;;  %3091 = vmatmul.msk.bf16.vlgmr.msra.gmra.mxu1 %vm319_vm2, %v3597_v36 }
  0xfd   : > { %3092 = vmatmul.msk.bf16.vlgmr.msra.gmra.mxu2 %vm319_vm2, %v3597_v36  ;;  %923 = vmatpush.bf16.msra.mxu0 %v835_v2  ;;  %v1129_v2 = vsel %vm323_vm1, %v1101_v62, 0 }
  0xfe   : > { %3093 = vmatmul.msk.bf16.vlgmr.msra.gmra.mxu3 %vm319_vm2, %v3597_v36  ;;  %936 = vmatpush.bf16.msra.mxu1 %v838_v3  ;;  %v1068_v36 = vpop.permute.xlu2 %1067 }
  0xff   : > { %949 = vmatpush.bf16.msra.mxu2 %v841_v4  ;;  %962 = vmatpush.bf16.msra.mxu3 %v844_v5  ;;  %v1096_v41 = vsel %vm1095_vm4, %v1066_v32, %v1068_v36  ;;  %v1097_v42 = vsel %vm1095_vm4, %v1068_v36, %v1070_v37  ;;  %v3812_v32 = vld [vmem:[#allocation2 + $0xc] sm:$0xf] }
 0x100   : > { %1953 = vrot.lane.b32.xlu1 %v3447_v34, %s3323_s13  ;;  %1955 = vrot.lane.b32.xlu2 %v3445_v33, %s3323_s13  ;;  %v1114_v45 = vsel %vm323_vm1, %v1096_v41, 0  ;;  %v1117_v46 = vsel %vm323_vm1, %v1097_v42, 0  ;;  %v1088_v42 = vpop.permute.xlu0 %1087 }
 0x103   : > { %1945 = vrot.lane.b32.xlu0 %v3424_v23, %s3323_s13 }
 0x106   : > { %v1074_v52 = vpop.permute.xlu2 %1073 }
 0x107   : > { %v1099_v58 = vsel %vm1095_vm4, %v1072_v47, %v1074_v52  ;;  %v1100_v61 = vsel %vm1095_vm4, %v1074_v52, %v1076_v54  ;;  %v1090_v47 = vpop.permute.xlu1 %1089 }
 0x108   : > { %2217 = vrot.lane.b32.xlu1 %v3395_v7, %s3324_s14  ;;  %2219 = vrot.lane.b32.xlu2 %v3407_v13, %s3324_s14  ;;  %v1123_v0 = vsel %vm323_vm1, %v1099_v58, 0  ;;  %v1126_v1 = vsel %vm323_vm1, %v1100_v61, 0  ;;  %v1107_v54 = vsel %vm1095_vm4, %v1088_v42, %v1090_v47 }
 0x109   : > { %v1147_v62 = vsel %vm323_vm1, %v1107_v54, 0 }
 0x10b   : > { %1951 = vrot.lane.b32.xlu0 %v3437_v30, %s3323_s13 }
 0x10c   : > { %3094 = vmatmul.msk.bf16.vlgmr.msrb.gmra.mxu0 %vm319_vm2, %v3709_v18  ;;  %3095 = vmatmul.msk.bf16.vlgmr.msrb.gmra.mxu1 %vm319_vm2, %v3709_v18 }
 0x10d   : > { %3096 = vmatmul.msk.bf16.vlgmr.msrb.gmra.mxu2 %vm319_vm2, %v3709_v18  ;;  %975 = vmatpush.bf16.msrb.mxu0 %v847_v24 }
 0x10e   : > { %3097 = vmatmul.msk.bf16.vlgmr.msrb.gmra.mxu3 %vm319_vm2, %v3709_v18  ;;  %988 = vmatpush.bf16.msrb.mxu1 %v850_v25  ;;  %v1080_v3 = vpop.permute.xlu2 %1079 }
 0x10f   : > { %1001 = vmatpush.bf16.msrb.mxu2 %v853_v26  ;;  %1014 = vmatpush.bf16.msrb.mxu3 %v856_v29  ;;  %v1102_v22 = vsel %vm1095_vm4, %v1078_v53, %v1080_v3  ;;  %v1103_v24 = vsel %vm1095_vm4, %v1080_v3, %v1082_v11  ;;  %v1104_v29 = vsel %vm1095_vm4, %v1082_v11, %v1084_v14 }
 0x110   : > { %2223 = vrot.lane.b32.xlu1 %v3405_v12, %s3324_s14  ;;  %2225 = vrot.lane.b32.xlu2 %v3397_v8, %s3324_s14  ;;  %v1132_v36 = vsel %vm323_vm1, %v1102_v22, 0  ;;  %v1135_v37 = vsel %vm323_vm1, %v1103_v24, 0  ;;  %v1138_v38 = vsel %vm323_vm1, %v1104_v29, 0 }
 0x113   : > { %1957 = vrot.lane.b32.xlu0 %v3585_v35, %s3323_s13 }
 0x116   : > { %v1086_v16 = vpop.permute.xlu2 %1085 }
 0x117   : > { %v1105_v31 = vsel %vm1095_vm4, %v1084_v14, %v1086_v16  ;;  %v1106_v53 = vsel %vm1095_vm4, %v1086_v16, %v1088_v42 }
 0x118   : > { %2229 = vrot.lane.b32.xlu1 %v3421_v21, %s3324_s14  ;;  %2231 = vrot.lane.b32.xlu2 %v3419_v20, %s3324_s14  ;;  %v1141_v41 = vsel %vm323_vm1, %v1105_v31, 0  ;;  %v1144_v61 = vsel %vm323_vm1, %v1106_v53, 0 }
 0x119   : > { %v3734_v39 = vpop.f32.mrf.mxu0  ;;  %v3736_v40 = vpop.f32.mrf.mxu1 }
 0x11b   : > { %2221 = vrot.lane.b32.xlu0 %v3393_v6, %s3324_s14 }
 0x11c   : > { %3098 = vmatmul.msk.bf16.vlgmr.msra.gmra.mxu0 %vm319_vm2, %v3709_v18  ;;  %3099 = vmatmul.msk.bf16.vlgmr.msra.gmra.mxu1 %vm319_vm2, %v3709_v18 }
 0x11d   : > { %3100 = vmatmul.msk.bf16.vlgmr.msra.gmra.mxu2 %vm319_vm2, %v3709_v18  ;;  %1027 = vmatpush.bf16.msra.mxu0 %v859_v43 }
 0x11e   : > { %3101 = vmatmul.msk.bf16.vlgmr.msra.gmra.mxu3 %vm319_vm2, %v3709_v18  ;;  %1040 = vmatpush.bf16.msra.mxu1 %v862_v44 }
 0x11f   : > { %1162 = vmatpush.bf16.msra.mxu2 %v1114_v45  ;;  %1175 = vmatpush.bf16.msra.mxu3 %v1117_v46  ;;  %v1092_v46 = vpop.permute.xlu2 %1091 }
 0x120   : > { %v3758_v48 = vpop.f32.mrf.mxu2  ;;  %2235 = vrot.lane.b32.xlu1 %v3434_v28, %s3324_s14  ;;  %2237 = vrot.lane.b32.xlu2 %v3432_v27, %s3324_s14  ;;  %v1108_v57 = vsel %vm1095_vm4, %v1090_v47, %v1092_v46 }
 0x121   : > { %v3760_v49 = vpop.f32.mrf.mxu3  ;;  %v377_v50 = vpop.f32.mrf.mxu0 }
 0x122   : > { %v390_v51 = vpop.f32.mrf.mxu1  ;;  %v1094_v50 = vpop.permute.xlu0 %1093 }
 0x123   : > { %v1109_v58 = vsel %vm1095_vm4, %v1092_v46, %v1094_v50  ;;  %2227 = vrot.lane.b32.xlu0 %v3410_v15, %s3324_s14 }
 0x128   : > { %v403_v55 = vpop.f32.mrf.mxu2  ;;  %2241 = vrot.lane.b32.xlu1 %v3447_v34, %s3324_s14  ;;  %2243 = vrot.lane.b32.xlu2 %v3445_v33, %s3324_s14 }
 0x129   : > { %v416_v56 = vpop.f32.mrf.mxu3  ;;  %v3770_v59 = vpop.f32.mrf.mxu0 }
 0x12a   : > { %v3772_v60 = vpop.f32.mrf.mxu1 }
 0x12b   : > { %2233 = vrot.lane.b32.xlu0 %v3424_v23, %s3324_s14 }
 0x12c   : > { %3102 = vmatmul.msk.bf16.vlgmr.msrb.gmra.mxu0 %vm319_vm2, %v3709_v18  ;;  %3103 = vmatmul.msk.bf16.vlgmr.msrb.gmra.mxu1 %vm319_vm2, %v3709_v18 }
 0x12d   : > { %3104 = vmatmul.msk.bf16.vlgmr.msrb.gmra.mxu2 %vm319_vm2, %v3709_v18  ;;  %1188 = vmatpush.bf16.msrb.mxu0 %v1120_v63  ;;  %v1150_v63 = vsel %vm323_vm1, %v1108_v57, 0 }
 0x12e   : > { %3105 = vmatmul.msk.bf16.vlgmr.msrb.gmra.mxu3 %vm319_vm2, %v3709_v18  ;;  %1201 = vmatpush.bf16.msrb.mxu1 %v1123_v0  ;;  %v1153_v0 = vsel %vm323_vm1, %v1109_v58, 0 }
 0x12f   : > { %1214 = vmatpush.bf16.msrb.mxu2 %v1126_v1  ;;  %1227 = vmatpush.bf16.msrb.mxu3 %v1129_v2  ;;  %v1354_v1 = vpop.permute.xlu1 %1353  ;;  %v1356_v2 = vpop.permute.xlu2 %1355 }
 0x130   : > { %v3794_v4 = vpop.f32.mrf.mxu2  ;;  %2505 = vrot.lane.b32.xlu1 %v3395_v7, %s3325_s16  ;;  %2507 = vrot.lane.b32.xlu2 %v3407_v13, %s3325_s16 }
 0x131   : > { %v3796_v5 = vpop.f32.mrf.mxu3  ;;  %v429_v9 = vpop.f32.mrf.mxu0 }
 0x132   : > { %v442_v10 = vpop.f32.mrf.mxu1 }
 0x133   : > { %2239 = vrot.lane.b32.xlu0 %v3437_v30, %s3324_s14 }
 0x138   : > { %v455_v17 = vpop.f32.mrf.mxu2  ;;  %2511 = vrot.lane.b32.xlu1 %v3405_v12, %s3325_s16  ;;  %2513 = vrot.lane.b32.xlu2 %v3397_v8, %s3325_s16 }
 0x139   : > { %v468_v19 = vpop.f32.mrf.mxu3  ;;  %v3806_v25 = vpop.f32.mrf.mxu0 }
 0x13a   : > { %v3808_v26 = vpop.f32.mrf.mxu1  ;;  %v1358_v17 = vpop.permute.xlu0 %1357 }
 0x13b   : > { %v1360_v19 = vpop.permute.xlu1 %1359  ;;  %v1385_v29 = vsel %vm1383_vm5, %v1356_v2, %v1358_v17  ;;  %2245 = vrot.lane.b32.xlu0 %v3585_v35, %s3324_s14 }
 0x13c   : > { %3106 = vmatmul.msk.bf16.vlgmr.msra.gmra.mxu0 %vm319_vm2, %v3709_v18  ;;  %3107 = vmatmul.msk.bf16.vlgmr.msra.gmra.mxu1 %vm319_vm2, %v3709_v18  ;;  %v1405_v42 = vsel %vm323_vm1, %v1385_v29, 0 }
 0x13d   : > { %3108 = vmatmul.msk.bf16.vlgmr.msra.gmra.mxu2 %vm319_vm2, %v3812_v32  ;;  %1240 = vmatpush.bf16.msra.mxu0 %v1132_v36 }
 0x13e   : > { %3109 = vmatmul.msk.bf16.vlgmr.msra.gmra.mxu3 %vm319_vm2, %v3812_v32  ;;  %1253 = vmatpush.bf16.msra.mxu1 %v1135_v37  ;;  %v1386_v37 = vsel %vm1383_vm5, %v1358_v17, %v1360_v19 }
 0x13f   : > { %1266 = vmatpush.bf16.msra.mxu2 %v1138_v38  ;;  %1279 = vmatpush.bf16.msra.mxu3 %v1141_v41 }
 0x140   : > { %v3828_v43 = vpop.f32.mrf.mxu2  ;;  %2517 = vrot.lane.b32.xlu1 %v3421_v21, %s3325_s16  ;;  %2519 = vrot.lane.b32.xlu2 %v3419_v20, %s3325_s16 }
 0x141   : > { %v3830_v44 = vpop.f32.mrf.mxu3  ;;  %v481_v18 = vpop.f32.mrf.mxu0 }
 0x142   : > { %v494_v45 = vpop.f32.mrf.mxu1  ;;  %v1364_v12 = vpop.permute.xlu0 %1363 }
 0x143   : > { %2509 = vrot.lane.b32.xlu0 %v3393_v6, %s3325_s16 }
 0x148   : > { %v507_v51 = vpop.f32.mrf.mxu2  ;;  %2523 = vrot.lane.b32.xlu1 %v3434_v28, %s3325_s16  ;;  %2525 = vrot.lane.b32.xlu2 %v3432_v27, %s3325_s16 }
 0x149   : > { %v520_v52 = vpop.f32.mrf.mxu3  ;;  %v3836_v55 = vpop.f32.mrf.mxu0 }
 0x14a   : > { %v3838_v56 = vpop.f32.mrf.mxu1  ;;  %v1366_v51 = vpop.permute.xlu1 %1365 }
 0x14b   : > { %v1370_v53 = vpop.permute.xlu0 %1369  ;;  %2515 = vrot.lane.b32.xlu0 %v3410_v15, %s3325_s16 }
 0x14c   : > { %3110 = vmatmul.msk.bf16.vlgmr.msrb.gmra.mxu0 %vm319_vm2, %v3812_v32  ;;  %3111 = vmatmul.msk.bf16.vlgmr.msrb.gmra.mxu1 %vm319_vm2, %v3812_v32 }
 0x14d   : > { %3112 = vmatmul.msk.bf16.vlgmr.msrb.gmra.mxu2 %vm319_vm2, %v3812_v32  ;;  %1292 = vmatpush.bf16.msrb.mxu0 %v1144_v61 }
 0x14e   : > { %3113 = vmatmul.msk.bf16.vlgmr.msrb.gmra.mxu3 %vm319_vm2, %v3812_v32  ;;  %1305 = vmatpush.bf16.msrb.mxu1 %v1147_v62 }
 0x14f   : > { %1318 = vmatpush.bf16.msrb.mxu2 %v1150_v63  ;;  %1331 = vmatpush.bf16.msrb.mxu3 %v1153_v0 }
 0x150   : > { %v602_v3 = vpop.f32.mrf.mxu2  ;;  %2529 = vrot.lane.b32.xlu1 %v3447_v34, %s3325_s16  ;;  %2531 = vrot.lane.b32.xlu2 %v3445_v33, %s3325_s16 }
 0x151   : > { %v615_v9 = vpop.f32.mrf.mxu3  ;;  %v3857_v10 = vadd.f32 %v602_v3, %v3734_v39  ;;  %v533_v14 = vpop.f32.mrf.mxu0 }
 0x152   : > { %v3860_v11 = vadd.f32 %v615_v9, %v3736_v40  ;;  %v546_v16 = vpop.f32.mrf.mxu1  ;;  %v1362_v39 = vpop.permute.xlu2 %1361  ;;  %v1384_v40 = vsel %vm1383_vm5, %v1354_v1, %v1356_v2 }
 0x153   : > { %v1387_v38 = vsel %vm1383_vm5, %v1360_v19, %v1362_v39  ;;  %v1402_v41 = vsel %vm323_vm1, %v1384_v40, 0  ;;  %v1388_v57 = vsel %vm1383_vm5, %v1362_v39, %v1364_v12  ;;  %v1372_v28 = vpop.permute.xlu1 %1371  ;;  %v1376_v16 = vpop.permute.xlu0 %1375  ;;  %v3950_v40 = vld [vmem:[#allocation2 + $0x10] sm:$0xf]  ;;  %2521 = vrot.lane.b32.xlu0 %v3424_v23, %s3325_s16 }
 0x154   : > { %v1414_v0 = vsel %vm323_vm1, %v1388_v57, 0  ;;  %v1392_v39 = vsel %vm1383_vm5, %v1370_v53, %v1372_v28 }
 0x158   : > { %v604_v22 = vpop.f32.mrf.mxu2 }
 0x159   : > { %v617_v24 = vpop.f32.mrf.mxu3  ;;  %v628_v31 = vpop.f32.mrf.mxu0 }
 0x15a   : > { %v641_v36 = vpop.f32.mrf.mxu1  ;;  %v3873_v7 = vadd.f32 %v628_v31, %v3758_v48  ;;  %v1408_v48 = vsel %vm323_vm1, %v1386_v37, 0  ;;  %v1368_v52 = vpop.permute.xlu2 %1367  ;;  %v1426_v31 = vsel %vm323_vm1, %v1392_v39, 0 }
 0x15b   : > { %v3876_v13 = vadd.f32 %v641_v36, %v3760_v49  ;;  %v1411_v49 = vsel %vm323_vm1, %v1387_v38, 0  ;;  %v1390_v62 = vsel %vm1383_vm5, %v1366_v51, %v1368_v52  ;;  %v1391_v63 = vsel %vm1383_vm5, %v1368_v52, %v1370_v53  ;;  %v1378_v17 = vpop.permute.xlu1 %1377  ;;  %v1382_v38 = vpop.permute.xlu0 %1381  ;;  %2527 = vrot.lane.b32.xlu0 %v3437_v30, %s3325_s16 }
 0x15c   : > { %3114 = vmatmul.msk.bf16.vlgmr.msra.gmra.mxu0 %vm319_vm2, %v3812_v32  ;;  %3115 = vmatmul.msk.bf16.vlgmr.msra.gmra.mxu1 %vm319_vm2, %v3812_v32  ;;  %v1423_v6 = vsel %vm323_vm1, %v1391_v63, 0  ;;  %v1395_v29 = vsel %vm1383_vm5, %v1376_v16, %v1378_v17 }
 0x15d   : > { %3116 = vmatmul.msk.bf16.vlgmr.msra.gmra.mxu2 %vm319_vm2, %v3812_v32  ;;  %1450 = vmatpush.bf16.msra.mxu0 %v1402_v41 }
 0x15e   : > { %3117 = vmatmul.msk.bf16.vlgmr.msra.gmra.mxu3 %vm319_vm2, %v3812_v32  ;;  %1463 = vmatpush.bf16.msra.mxu1 %v1405_v42 }
 0x15f   : > { %1476 = vmatpush.bf16.msra.mxu2 %v1408_v48  ;;  %1489 = vmatpush.bf16.msra.mxu3 %v1411_v49 }
 0x160   : > { %v654_v8 = vpop.f32.mrf.mxu2 }
 0x161   : > { %v667_v18 = vpop.f32.mrf.mxu3  ;;  %v3897_v45 = vadd.f32 %v654_v8, %v3770_v59  ;;  %v630_v47 = vpop.f32.mrf.mxu0 }
 0x162   : > { %v3900_v46 = vadd.f32 %v667_v18, %v3772_v60  ;;  %v643_v50 = vpop.f32.mrf.mxu1  ;;  %v1389_v60 = vsel %vm1383_vm5, %v1364_v12, %v1366_v51 }
 0x163   : > { %v1417_v1 = vsel %vm323_vm1, %v1389_v60, 0  ;;  %v1642_v8 = vpop.permute.xlu1 %1641  ;;  %v1646_v47 = vpop.permute.xlu0 %1645  ;;  %2533 = vrot.lane.b32.xlu0 %v3585_v35, %s3325_s16 }
 0x168   : > { %v656_v54 = vpop.f32.mrf.mxu2 }
 0x169   : > { %v669_v59 = vpop.f32.mrf.mxu3  ;;  %v680_v58 = vpop.f32.mrf.mxu0 }
 0x16a   : > { %v693_v61 = vpop.f32.mrf.mxu1  ;;  %v3913_v21 = vadd.f32 %v680_v58, %v3794_v4  ;;  %v1420_v4 = vsel %vm323_vm1, %v1390_v62, 0 }
 0x16b   : > { %v3916_v20 = vadd.f32 %v693_v61, %v3796_v5  ;;  %v1648_v35 = vpop.permute.xlu1 %1647 }
 0x16c   : > { %3118 = vmatmul.msk.bf16.vlgmr.msrb.gmra.mxu0 %vm319_vm2, %v3812_v32  ;;  %3119 = vmatmul.msk.bf16.vlgmr.msrb.gmra.mxu1 %vm319_vm2, %v3812_v32 }
 0x16d   : > { %3120 = vmatmul.msk.bf16.vlgmr.msrb.gmra.mxu2 %vm319_vm2, %v3812_v32  ;;  %1502 = vmatpush.bf16.msrb.mxu0 %v1414_v0 }
 0x16e   : > { %3121 = vmatmul.msk.bf16.vlgmr.msrb.gmra.mxu3 %vm319_vm2, %v3812_v32  ;;  %1515 = vmatpush.bf16.msrb.mxu1 %v1417_v1  ;;  %v1374_v32 = vpop.permute.xlu2 %1373 }
 0x16f   : > { %1528 = vmatpush.bf16.msrb.mxu2 %v1420_v4  ;;  %1541 = vmatpush.bf16.msrb.mxu3 %v1423_v6  ;;  %v1394_v15 = vsel %vm1383_vm5, %v1374_v32, %v1376_v16 }
 0x170   : > { %v706_v27 = vpop.f32.mrf.mxu2  ;;  %v1432_v37 = vsel %vm323_vm1, %v1394_v15, 0 }
 0x171   : > { %v719_v5 = vpop.f32.mrf.mxu3  ;;  %v3937_v2 = vadd.f32 %v706_v27, %v3806_v25  ;;  %v682_v9 = vpop.f32.mrf.mxu0 }
 0x172   : > { %v3940_v3 = vadd.f32 %v719_v5, %v3808_v26  ;;  %v695_v14 = vpop.f32.mrf.mxu1  ;;  %v1393_v26 = vsel %vm1383_vm5, %v1372_v28, %v1374_v32  ;;  %v1652_v27 = vpop.permute.xlu0 %1651 }
 0x173   : > { %v1429_v36 = vsel %vm323_vm1, %v1393_v26, 0  ;;  %v1654_v28 = vpop.permute.xlu1 %1653  ;;  %v1674_v14 = vsel %vm1671_vm6, %v1646_v47, %v1648_v35 }
 0x174   : > { %v1696_v39 = vsel %vm323_vm1, %v1674_v14, 0 }
 0x176   : > { %v1380_v23 = vpop.permute.xlu2 %1379 }
 0x177   : > { %v1396_v52 = vsel %vm1383_vm5, %v1378_v17, %v1380_v23  ;;  %v1397_v53 = vsel %vm1383_vm5, %v1380_v23, %v1382_v38 }
 0x178   : > { %v708_v19 = vpop.f32.mrf.mxu2  ;;  %v1438_v60 = vsel %vm323_vm1, %v1396_v52, 0  ;;  %v1441_v58 = vsel %vm323_vm1, %v1397_v53, 0 }
 0x179   : > { %v721_v25 = vpop.f32.mrf.mxu3  ;;  %v732_v22 = vpop.f32.mrf.mxu0 }
 0x17a   : > { %v745_v24 = vpop.f32.mrf.mxu1  ;;  %v3955_v34 = vadd.f32 %v732_v22, %v3828_v43  ;;  %v1435_v43 = vsel %vm323_vm1, %v1395_v29, 0 }
 0x17b   : > { %v3958_v33 = vadd.f32 %v745_v24, %v3830_v44  ;;  %v1660_v38 = vpop.permute.xlu1 %1659 }
 0x17c   : > { %3122 = vmatmul.msk.bf16.vlgmr.msra.gmra.mxu0 %vm319_vm2, %v3950_v40  ;;  %3123 = vmatmul.msk.bf16.vlgmr.msra.gmra.mxu1 %vm319_vm2, %v3950_v40 }
 0x17d   : > { %3124 = vmatmul.msk.bf16.vlgmr.msra.gmra.mxu2 %vm319_vm2, %v3950_v40  ;;  %1554 = vmatpush.bf16.msra.mxu0 %v1426_v31 }
 0x17e   : > { %3125 = vmatmul.msk.bf16.vlgmr.msra.gmra.mxu3 %vm319_vm2, %v3950_v40  ;;  %1567 = vmatpush.bf16.msra.mxu1 %v1429_v36  ;;  %v1644_v18 = vpop.permute.xlu2 %1643 }
 0x17f   : > { %1580 = vmatpush.bf16.msra.mxu2 %v1432_v37  ;;  %1593 = vmatpush.bf16.msra.mxu3 %v1435_v43  ;;  %v1673_v59 = vsel %vm1671_vm6, %v1644_v18, %v1646_v47  ;;  %v1658_v43 = vpop.permute.xlu0 %1657 }
 0x180   : > { %v758_v44 = vpop.f32.mrf.mxu2  ;;  %v1680_v47 = vsel %vm1671_vm6, %v1658_v43, %v1660_v38 }
 0x181   : > { %v771_v41 = vpop.f32.mrf.mxu3  ;;  %v3975_v42 = vadd.f32 %v758_v44, %v3836_v55  ;;  %v734_v49 = vpop.f32.mrf.mxu0 }
 0x182   : > { %v3978_v48 = vadd.f32 %v771_v41, %v3838_v56  ;;  %v747_v12 = vpop.f32.mrf.mxu1  ;;  %v1672_v56 = vsel %vm1671_vm6, %v1642_v8, %v1644_v18 }
 0x183   : > { %v1690_v61 = vsel %vm323_vm1, %v1672_v56, 0 }
 0x186   : > { %v1650_v6 = vpop.permute.xlu2 %1649 }
 0x187   : > { %v1675_v16 = vsel %vm1671_vm6, %v1648_v35, %v1650_v6  ;;  %v1676_v19 = vsel %vm1671_vm6, %v1650_v6, %v1652_v27 }
 0x188   : > { %v760_v50 = vpop.f32.mrf.mxu2  ;;  %v1699_v26 = vsel %vm323_vm1, %v1675_v16, 0  ;;  %v1702_v22 = vsel %vm323_vm1, %v1676_v19, 0 }
 0x189   : > { %v773_v51 = vpop.f32.mrf.mxu3  ;;  %v873_v55 = vpop.f32.mrf.mxu0 }
 0x18a   : > { %v886_v54 = vpop.f32.mrf.mxu1  ;;  %v3987_v57 = vadd.f32 %v873_v55, %v3857_v10  ;;  %v1693_v10 = vsel %vm323_vm1, %v1673_v59, 0  ;;  %v4050_v51 = vld [vmem:[#allocation2 + $0x14] sm:$0xf]  ;;  %v1714_v55 = vsel %vm323_vm1, %v1680_v47, 0 }
 0x18b   : > { %v3990_v30 = vadd.f32 %v886_v54, %v3860_v11 }
 0x18c   : > { %3126 = vmatmul.msk.bf16.vlgmr.msrb.gmra.mxu0 %vm319_vm2, %v3950_v40  ;;  %3127 = vmatmul.msk.bf16.vlgmr.msrb.gmra.mxu1 %vm319_vm2, %v3950_v40 }
 0x18d   : > { %3128 = vmatmul.msk.bf16.vlgmr.msrb.gmra.mxu2 %vm319_vm2, %v3950_v40  ;;  %1606 = vmatpush.bf16.msrb.mxu0 %v1438_v60 }
 0x18e   : > { %3129 = vmatmul.msk.bf16.vlgmr.msrb.gmra.mxu3 %vm319_vm2, %v3950_v40  ;;  %1619 = vmatpush.bf16.msrb.mxu1 %v1441_v58 }
 0x18f   : > { %1738 = vmatpush.bf16.msrb.mxu2 %v1690_v61  ;;  %1751 = vmatpush.bf16.msrb.mxu3 %v1693_v10  ;;  %v1666_v10 = vpop.permute.xlu1 %1665 }
 0x190   : > { %v899_v11 = vpop.f32.mrf.mxu2 }
 0x191   : > { %v912_v62 = vpop.f32.mrf.mxu3  ;;  %v4007_v63 = vadd.f32 %v899_v11, %v3873_v7  ;;  %v875_v1 = vpop.f32.mrf.mxu0  ;;  %v1677_v7 = vsel %vm1671_vm6, %v1652_v27, %v1654_v28 }
 0x192   : > { %v4010_v0 = vadd.f32 %v912_v62, %v3876_v13  ;;  %v888_v4 = vpop.f32.mrf.mxu1  ;;  %v1705_v24 = vsel %vm323_vm1, %v1677_v7, 0 }
 0x198   : > { %v901_v5 = vpop.f32.mrf.mxu2 }
 0x199   : > { %v914_v9 = vpop.f32.mrf.mxu3  ;;  %v925_v32 = vpop.f32.mrf.mxu0 }
 0x19a   : > { %v938_v17 = vpop.f32.mrf.mxu1  ;;  %v4017_v13 = vadd.f32 %v925_v32, %v3897_v45  ;;  %v1656_v45 = vpop.permute.xlu2 %1655 }
 0x19b   : > { %v4020_v25 = vadd.f32 %v938_v17, %v3900_v46  ;;  %v1678_v49 = vsel %vm1671_vm6, %v1654_v28, %v1656_v45  ;;  %v1679_v12 = vsel %vm1671_vm6, %v1656_v45, %v1658_v43  ;;  %v1930_v17 = vpop.permute.xlu1 %1929 }
 0x19c   : > { %3130 = vmatmul.msk.bf16.vlgmr.msra.gmra.mxu0 %vm319_vm2, %v3950_v40  ;;  %3131 = vmatmul.msk.bf16.vlgmr.msra.gmra.mxu1 %vm319_vm2, %v3950_v40  ;;  %v1708_v52 = vsel %vm323_vm1, %v1678_v49, 0  ;;  %v1711_v53 = vsel %vm323_vm1, %v1679_v12, 0 }
 0x19d   : > { %3132 = vmatmul.msk.bf16.vlgmr.msra.gmra.mxu2 %vm319_vm2, %v3950_v40  ;;  %1764 = vmatpush.bf16.msra.mxu0 %v1696_v39 }
 0x19e   : > { %3133 = vmatmul.msk.bf16.vlgmr.msra.gmra.mxu3 %vm319_vm2, %v3950_v40  ;;  %1777 = vmatpush.bf16.msra.mxu1 %v1699_v26 }
 0x19f   : > { %1790 = vmatpush.bf16.msra.mxu2 %v1702_v22  ;;  %1803 = vmatpush.bf16.msra.mxu3 %v1705_v24 }
 0x1a0   : > { %v951_v46 = vpop.f32.mrf.mxu2 }
 0x1a1   : > { %v964_v15 = vpop.f32.mrf.mxu3  ;;  %v4035_v29 = vadd.f32 %v951_v46, %v3913_v21  ;;  %v927_v36 = vpop.f32.mrf.mxu0 }
 0x1a2   : > { %v4038_v31 = vadd.f32 %v964_v15, %v3916_v20  ;;  %v940_v37 = vpop.f32.mrf.mxu1  ;;  %v1662_v23 = vpop.permute.xlu2 %1661 }
 0x1a3   : > { %v1681_v21 = vsel %vm1671_vm6, %v1660_v38, %v1662_v23  ;;  %v1936_v45 = vpop.permute.xlu1 %1935 }
 0x1a8   : > { %v953_v44 = vpop.f32.mrf.mxu2 }
 0x1a9   : > { %v966_v41 = vpop.f32.mrf.mxu3  ;;  %v977_v8 = vpop.f32.mrf.mxu0 }
 0x1aa   : > { %v990_v18 = vpop.f32.mrf.mxu1  ;;  %v4045_v20 = vadd.f32 %v977_v8, %v3937_v2  ;;  %v1717_v2 = vsel %vm323_vm1, %v1681_v21, 0  ;;  %v1668_v61 = vpop.permute.xlu2 %1667 }
 0x1ab   : > { %v4048_v50 = vadd.f32 %v990_v18, %v3940_v3  ;;  %v1664_v3 = vpop.permute.xlu0 %1663  ;;  %v1684_v27 = vsel %vm1671_vm6, %v1666_v10, %v1668_v61 }
 0x1ac   : > { %3134 = vmatmul.msk.bf16.vlgmr.msrb.gmra.mxu0 %vm319_vm2, %v3950_v40  ;;  %3135 = vmatmul.msk.bf16.vlgmr.msrb.gmra.mxu1 %vm319_vm2, %v3950_v40  ;;  %v1682_v1 = vsel %vm1671_vm6, %v1662_v23, %v1664_v3  ;;  %v1683_v4 = vsel %vm1671_vm6, %v1664_v3, %v1666_v10  ;;  %v1726_v16 = vsel %vm323_vm1, %v1684_v27, 0 }
 0x1ad   : > { %3136 = vmatmul.msk.bf16.vlgmr.msrb.gmra.mxu2 %vm319_vm2, %v4050_v51  ;;  %1816 = vmatpush.bf16.msrb.mxu0 %v1708_v52  ;;  %v1720_v9 = vsel %vm323_vm1, %v1682_v1, 0  ;;  %v1723_v14 = vsel %vm323_vm1, %v1683_v4, 0 }
 0x1ae   : > { %3137 = vmatmul.msk.bf16.vlgmr.msrb.gmra.mxu3 %vm319_vm2, %v4050_v51  ;;  %1829 = vmatpush.bf16.msrb.mxu1 %v1711_v53 }
 0x1af   : > { %1842 = vmatpush.bf16.msrb.mxu2 %v1714_v55  ;;  %1855 = vmatpush.bf16.msrb.mxu3 %v1717_v2  ;;  %v1942_v2 = vpop.permute.xlu1 %1941 }
 0x1b0   : > { %v1003_v54 = vpop.f32.mrf.mxu2 }
 0x1b1   : > { %v1016_v56 = vpop.f32.mrf.mxu3  ;;  %v4065_v59 = vadd.f32 %v1003_v54, %v3955_v34  ;;  %v979_v60 = vpop.f32.mrf.mxu0 }
 0x1b2   : > { %v4068_v40 = vadd.f32 %v1016_v56, %v3958_v33  ;;  %v992_v58 = vpop.f32.mrf.mxu1 }
 0x1b3   : > { %v1670_v35 = vpop.permute.xlu0 %1669 }
 0x1b4   : > { %v1685_v34 = vsel %vm1671_vm6, %v1668_v61, %v1670_v35 }
 0x1b5   : > { %v1729_v32 = vsel %vm323_vm1, %v1685_v34, 0 }
 0x1b8   : > { %v1005_v11 = vpop.f32.mrf.mxu2 }
 0x1b9   : > { %v1018_v62 = vpop.f32.mrf.mxu3  ;;  %v1029_v6 = vpop.f32.mrf.mxu0 }
 0x1ba   : > { %v1042_v28 = vpop.f32.mrf.mxu1  ;;  %v4075_v33 = vadd.f32 %v1029_v6, %v3975_v42  ;;  %v1932_v42 = vpop.permute.xlu2 %1931 }
 0x1bb   : > { %v4078_v5 = vadd.f32 %v1042_v28, %v3978_v48  ;;  %v1934_v24 = vpop.permute.xlu0 %1933  ;;  %v1960_v37 = vsel %vm1959_vm7, %v1930_v17, %v1932_v42 }
 0x1bc   : > { %3138 = vmatmul.msk.bf16.vlgmr.msra.gmra.mxu0 %vm319_vm2, %v4050_v51  ;;  %3139 = vmatmul.msk.bf16.vlgmr.msra.gmra.mxu1 %vm319_vm2, %v4050_v51  ;;  %v1961_v43 = vsel %vm1959_vm7, %v1932_v42, %v1934_v24  ;;  %v1978_v49 = vsel %vm323_vm1, %v1960_v37, 0 }
 0x1bd   : > { %3140 = vmatmul.msk.bf16.vlgmr.msra.gmra.mxu2 %vm319_vm2, %v4050_v51  ;;  %1868 = vmatpush.bf16.msra.mxu0 %v1720_v9  ;;  %v1981_v12 = vsel %vm323_vm1, %v1961_v43, 0 }
 0x1be   : > { %3141 = vmatmul.msk.bf16.vlgmr.msra.gmra.mxu3 %vm319_vm2, %v4050_v51  ;;  %1881 = vmatpush.bf16.msra.mxu1 %v1723_v14 }
 0x1bf   : > { %1894 = vmatpush.bf16.msra.mxu2 %v1726_v16  ;;  %1907 = vmatpush.bf16.msra.mxu3 %v1729_v32 }
 0x1c0   : > { %v1164_v48 = vpop.f32.mrf.mxu2 }
 0x1c1   : > { %v1177_v19 = vpop.f32.mrf.mxu3  ;;  %v4093_v7 = vadd.f32 %v1164_v48, %v3987_v57  ;;  %v1031_v26 = vpop.f32.mrf.mxu0  ;;  %v1962_v57 = vsel %vm1959_vm7, %v1934_v24, %v1936_v45 }
 0x1c2   : > { %v4096_v39 = vadd.f32 %v1177_v19, %v3990_v30  ;;  %v1044_v22 = vpop.f32.mrf.mxu1  ;;  %v1938_v46 = vpop.permute.xlu2 %1937  ;;  %v1984_v8 = vsel %vm323_vm1, %v1962_v57, 0 }
 0x1c3   : > { %v1963_v44 = vsel %vm1959_vm7, %v1936_v45, %v1938_v46  ;;  %v4156_v45 = vld [vmem:[#allocation2 + $0x18] sm:$0xf] }
 0x1c4   : > { %v1987_v18 = vsel %vm323_vm1, %v1963_v44, 0 }
 0x1c8   : > { %v1166_v15 = vpop.f32.mrf.mxu2 }
 0x1c9   : > { %v1179_v36 = vpop.f32.mrf.mxu3  ;;  %v1190_v38 = vpop.f32.mrf.mxu0 }
 0x1ca   : > { %v1203_v23 = vpop.f32.mrf.mxu1  ;;  %v4103_v30 = vadd.f32 %v1190_v38, %v4007_v63  ;;  %v1940_v63 = vpop.permute.xlu0 %1939 }
 0x1cb   : > { %v4106_v41 = vadd.f32 %v1203_v23, %v4010_v0  ;;  %v1944_v3 = vpop.permute.xlu2 %1943  ;;  %v1964_v58 = vsel %vm1959_vm7, %v1938_v46, %v1940_v63  ;;  %v1965_v61 = vsel %vm1959_vm7, %v1940_v63, %v1942_v2 }
 0x1cc   : > { %3142 = vmatmul.msk.bf16.vlgmr.msrb.gmra.mxu0 %vm319_vm2, %v4050_v51  ;;  %3143 = vmatmul.msk.bf16.vlgmr.msrb.gmra.mxu1 %vm319_vm2, %v4050_v51  ;;  %v1966_v11 = vsel %vm1959_vm7, %v1942_v2, %v1944_v3  ;;  %v1990_v1 = vsel %vm323_vm1, %v1964_v58, 0  ;;  %v1993_v4 = vsel %vm323_vm1, %v1965_v61, 0 }
 0x1cd   : > { %3144 = vmatmul.msk.bf16.vlgmr.msrb.gmra.mxu2 %vm319_vm2, %v4050_v51  ;;  %2026 = vmatpush.bf16.msrb.mxu0 %v1978_v49  ;;  %v1996_v6 = vsel %vm323_vm1, %v1966_v11, 0 }
 0x1ce   : > { %3145 = vmatmul.msk.bf16.vlgmr.msrb.gmra.mxu3 %vm319_vm2, %v4050_v51  ;;  %2039 = vmatpush.bf16.msrb.mxu1 %v1981_v12 }
 0x1cf   : > { %2052 = vmatpush.bf16.msrb.mxu2 %v1984_v8  ;;  %2065 = vmatpush.bf16.msrb.mxu3 %v1987_v18 }
 0x1d0   : > { %v1216_v0 = vpop.f32.mrf.mxu2 }
 0x1d1   : > { %v1229_v47 = vpop.f32.mrf.mxu3  ;;  %v4121_v21 = vadd.f32 %v1216_v0, %v4017_v13  ;;  %v1192_v53 = vpop.f32.mrf.mxu0 }
 0x1d2   : > { %v4124_v52 = vadd.f32 %v1229_v47, %v4020_v25  ;;  %v1205_v55 = vpop.f32.mrf.mxu1  ;;  %v1946_v54 = vpop.permute.xlu0 %1945 }
 0x1d3   : > { %v1967_v13 = vsel %vm1959_vm7, %v1944_v3, %v1946_v54  ;;  %v1950_v17 = vpop.permute.xlu2 %1949 }
 0x1d4   : > { %v1999_v28 = vsel %vm323_vm1, %v1967_v13, 0 }
 0x1d8   : > { %v1218_v56 = vpop.f32.mrf.mxu2 }
 0x1d9   : > { %v1231_v60 = vpop.f32.mrf.mxu3  ;;  %v1242_v10 = vpop.f32.mrf.mxu0 }
 0x1da   : > { %v1255_v35 = vpop.f32.mrf.mxu1  ;;  %v4131_v25 = vadd.f32 %v1242_v10, %v4035_v29  ;;  %v1948_v29 = vpop.permute.xlu1 %1947 }
 0x1db   : > { %v4134_v62 = vadd.f32 %v1255_v35, %v4038_v31  ;;  %v1952_v32 = vpop.permute.xlu0 %1951  ;;  %v1968_v19 = vsel %vm1959_vm7, %v1946_v54, %v1948_v29  ;;  %v1969_v26 = vsel %vm1959_vm7, %v1948_v29, %v1950_v17 }
 0x1dc   : > { %3146 = vmatmul.msk.bf16.vlgmr.msra.gmra.mxu0 %vm319_vm2, %v4050_v51  ;;  %3147 = vmatmul.msk.bf16.vlgmr.msra.gmra.mxu1 %vm319_vm2, %v4050_v51  ;;  %v2002_v36 = vsel %vm323_vm1, %v1968_v19, 0  ;;  %v2005_v37 = vsel %vm323_vm1, %v1969_v26, 0 }
 0x1dd   : > { %3148 = vmatmul.msk.bf16.vlgmr.msra.gmra.mxu2 %vm319_vm2, %v4050_v51  ;;  %2078 = vmatpush.bf16.msra.mxu0 %v1990_v1 }
 0x1de   : > { %3149 = vmatmul.msk.bf16.vlgmr.msra.gmra.mxu3 %vm319_vm2, %v4050_v51  ;;  %2091 = vmatpush.bf16.msra.mxu1 %v1993_v4 }
 0x1df   : > { %2104 = vmatpush.bf16.msra.mxu2 %v1996_v6  ;;  %2117 = vmatpush.bf16.msra.mxu3 %v1999_v28 }
 0x1e0   : > { %v1268_v31 = vpop.f32.mrf.mxu2 }
 0x1e1   : > { %v1281_v27 = vpop.f32.mrf.mxu3  ;;  %v4149_v34 = vadd.f32 %v1268_v31, %v4045_v20  ;;  %v1244_v14 = vpop.f32.mrf.mxu0  ;;  %v1970_v20 = vsel %vm1959_vm7, %v1950_v17, %v1952_v32 }
 0x1e2   : > { %v4152_v9 = vadd.f32 %v1281_v27, %v4048_v50  ;;  %v1257_v16 = vpop.f32.mrf.mxu1  ;;  %v1954_v42 = vpop.permute.xlu1 %1953  ;;  %v2008_v43 = vsel %vm323_vm1, %v1970_v20, 0 }
 0x1e3   : > { %v1971_v50 = vsel %vm1959_vm7, %v1952_v32, %v1954_v42  ;;  %v1958_v23 = vpop.permute.xlu0 %1957 }
 0x1e4   : > { %v2011_v38 = vsel %vm323_vm1, %v1971_v50, 0 }
 0x1e8   : > { %v1270_v48 = vpop.f32.mrf.mxu2 }
 0x1e9   : > { %v1283_v51 = vpop.f32.mrf.mxu3  ;;  %v1294_v22 = vpop.f32.mrf.mxu0 }
 0x1ea   : > { %v1307_v24 = vpop.f32.mrf.mxu1  ;;  %v4161_v46 = vadd.f32 %v1294_v22, %v4065_v59  ;;  %v1956_v59 = vpop.permute.xlu2 %1955 }
 0x1eb   : > { %v4164_v15 = vadd.f32 %v1307_v24, %v4068_v40  ;;  %v2218_v18 = vpop.permute.xlu1 %2217  ;;  %v2222_v0 = vpop.permute.xlu0 %2221  ;;  %v1972_v55 = vsel %vm1959_vm7, %v1954_v42, %v1956_v59  ;;  %v1973_v2 = vsel %vm1959_vm7, %v1956_v59, %v1958_v23 }
 0x1ec   : > { %3150 = vmatmul.msk.bf16.vlgmr.msrb.gmra.mxu0 %vm319_vm2, %v4156_v45  ;;  %3151 = vmatmul.msk.bf16.vlgmr.msrb.gmra.mxu1 %vm319_vm2, %v4156_v45  ;;  %v2014_v58 = vsel %vm323_vm1, %v1972_v55, 0  ;;  %v2017_v61 = vsel %vm323_vm1, %v1973_v2, 0 }
 0x1ed   : > { %3152 = vmatmul.msk.bf16.vlgmr.msrb.gmra.mxu2 %vm319_vm2, %v4156_v45  ;;  %2130 = vmatpush.bf16.msrb.mxu0 %v2002_v36 }
 0x1ee   : > { %3153 = vmatmul.msk.bf16.vlgmr.msrb.gmra.mxu3 %vm319_vm2, %v4156_v45  ;;  %2143 = vmatpush.bf16.msrb.mxu1 %v2005_v37 }
 0x1ef   : > { %2156 = vmatpush.bf16.msrb.mxu2 %v2008_v43  ;;  %2169 = vmatpush.bf16.msrb.mxu3 %v2011_v38 }
 0x1f0   : > { %v1320_v40 = vpop.f32.mrf.mxu2 }
 0x1f1   : > { %v1333_v57 = vpop.f32.mrf.mxu3  ;;  %v4179_v44 = vadd.f32 %v1320_v40, %v4075_v33  ;;  %v1296_v12 = vpop.f32.mrf.mxu0 }
 0x1f2   : > { %v4182_v49 = vadd.f32 %v1333_v57, %v4078_v5  ;;  %v1309_v8 = vpop.f32.mrf.mxu1  ;;  %v2220_v63 = vpop.permute.xlu2 %2219 }
 0x1f3   : > { %v2248_v33 = vsel %vm2247_vm8, %v2218_v18, %v2220_v63  ;;  %v2249_v56 = vsel %vm2247_vm8, %v2220_v63, %v2222_v0  ;;  %v2228_v31 = vpop.permute.xlu0 %2227 }
 0x1f4   : > { %v2266_v10 = vsel %vm323_vm1, %v2248_v33, 0  ;;  %v2269_v35 = vsel %vm323_vm1, %v2249_v56, 0 }
 0x1f8   : > { %v1322_v47 = vpop.f32.mrf.mxu2 }
 0x1f9   : > { %v1335_v53 = vpop.f32.mrf.mxu3  ;;  %v1452_v3 = vpop.f32.mrf.mxu0 }
 0x1fa   : > { %v1465_v54 = vpop.f32.mrf.mxu1  ;;  %v4189_v5 = vadd.f32 %v1452_v3, %v4093_v7  ;;  %v2224_v7 = vpop.permute.xlu1 %2223  ;;  %v4250_v53 = vld [vmem:[#allocation2 + $0x1c] sm:$0xf] }
 0x1fb   : > { %v4192_v60 = vadd.f32 %v1465_v54, %v4096_v39  ;;  %v2226_v28 = vpop.permute.xlu2 %2225  ;;  %v2250_v16 = vsel %vm2247_vm8, %v2222_v0, %v2224_v7  ;;  %v2234_v38 = vpop.permute.xlu0 %2233 }
 0x1fc   : > { %3154 = vmatmul.msk.bf16.vlgmr.msra.gmra.mxu0 %vm319_vm2, %v4156_v45  ;;  %3155 = vmatmul.msk.bf16.vlgmr.msra.gmra.mxu1 %vm319_vm2, %v4156_v45  ;;  %v2251_v32 = vsel %vm2247_vm8, %v2224_v7, %v2226_v28  ;;  %v2252_v48 = vsel %vm2247_vm8, %v2226_v28, %v2228_v31  ;;  %v2272_v19 = vsel %vm323_vm1, %v2250_v16, 0 }
 0x1fd   : > { %3156 = vmatmul.msk.bf16.vlgmr.msra.gmra.mxu2 %vm319_vm2, %v4156_v45  ;;  %2182 = vmatpush.bf16.msra.mxu0 %v2014_v58  ;;  %v2275_v26 = vsel %vm323_vm1, %v2251_v32, 0  ;;  %v2278_v22 = vsel %vm323_vm1, %v2252_v48, 0 }
 0x1fe   : > { %3157 = vmatmul.msk.bf16.vlgmr.msra.gmra.mxu3 %vm319_vm2, %v4156_v45  ;;  %2195 = vmatpush.bf16.msra.mxu1 %v2017_v61 }
 0x1ff   : > { %2314 = vmatpush.bf16.msra.mxu2 %v2266_v10  ;;  %2327 = vmatpush.bf16.msra.mxu3 %v2269_v35 }
 0x200   : > { %v1478_v39 = vpop.f32.mrf.mxu2 }
 0x201   : > { %v1491_v11 = vpop.f32.mrf.mxu3  ;;  %v4207_v13 = vadd.f32 %v1478_v39, %v4103_v30  ;;  %v1454_v4 = vpop.f32.mrf.mxu0 }
 0x202   : > { %v4210_v1 = vadd.f32 %v1491_v11, %v4106_v41  ;;  %v1467_v6 = vpop.f32.mrf.mxu1  ;;  %v2230_v29 = vpop.permute.xlu1 %2229 }
 0x203   : > { %v2253_v30 = vsel %vm2247_vm8, %v2228_v31, %v2230_v29 }
 0x204   : > { %v2281_v24 = vsel %vm323_vm1, %v2253_v30, 0 }
 0x208   : > { %v1480_v27 = vpop.f32.mrf.mxu2 }
 0x209   : > { %v1493_v14 = vpop.f32.mrf.mxu3  ;;  %v1504_v17 = vpop.f32.mrf.mxu0 }
 0x20a   : > { %v1517_v42 = vpop.f32.mrf.mxu1  ;;  %v4217_v41 = vadd.f32 %v1504_v17, %v4121_v21  ;;  %v2232_v21 = vpop.permute.xlu2 %2231 }
 0x20b   : > { %v4220_v51 = vadd.f32 %v1517_v42, %v4124_v52  ;;  %v2236_v23 = vpop.permute.xlu1 %2235  ;;  %v2254_v12 = vsel %vm2247_vm8, %v2230_v29, %v2232_v21  ;;  %v2255_v8 = vsel %vm2247_vm8, %v2232_v21, %v2234_v38 }
 0x20c   : > { %3158 = vmatmul.msk.bf16.vlgmr.msrb.gmra.mxu0 %vm319_vm2, %v4156_v45  ;;  %3159 = vmatmul.msk.bf16.vlgmr.msrb.gmra.mxu1 %vm319_vm2, %v4156_v45  ;;  %v2256_v0 = vsel %vm2247_vm8, %v2234_v38, %v2236_v23  ;;  %v2284_v55 = vsel %vm323_vm1, %v2254_v12, 0  ;;  %v2287_v2 = vsel %vm323_vm1, %v2255_v8, 0 }
 0x20d   : > { %3160 = vmatmul.msk.bf16.vlgmr.msrb.gmra.mxu2 %vm319_vm2, %v4156_v45  ;;  %2340 = vmatpush.bf16.msrb.mxu0 %v2272_v19  ;;  %v2290_v3 = vsel %vm323_vm1, %v2256_v0, 0 }
 0x20e   : > { %3161 = vmatmul.msk.bf16.vlgmr.msrb.gmra.mxu3 %vm319_vm2, %v4156_v45  ;;  %2353 = vmatpush.bf16.msrb.mxu1 %v2275_v26 }
 0x20f   : > { %2366 = vmatpush.bf16.msrb.mxu2 %v2278_v22  ;;  %2379 = vmatpush.bf16.msrb.mxu3 %v2281_v24 }
 0x210   : > { %v1530_v52 = vpop.f32.mrf.mxu2 }
 0x211   : > { %v1543_v20 = vpop.f32.mrf.mxu3  ;;  %v4235_v50 = vadd.f32 %v1530_v52, %v4131_v25  ;;  %v1506_v37 = vpop.f32.mrf.mxu0 }
 0x212   : > { %v4238_v36 = vadd.f32 %v1543_v20, %v4134_v62  ;;  %v1519_v43 = vpop.f32.mrf.mxu1  ;;  %v2238_v59 = vpop.permute.xlu2 %2237 }
 0x213   : > { %v2257_v25 = vsel %vm2247_vm8, %v2236_v23, %v2238_v59  ;;  %v2242_v35 = vpop.permute.xlu1 %2241 }
 0x218   : > { %v1532_v40 = vpop.f32.mrf.mxu2 }
 0x219   : > { %v1545_v57 = vpop.f32.mrf.mxu3  ;;  %v1556_v18 = vpop.f32.mrf.mxu0 }
 0x21a   : > { %v1569_v63 = vpop.f32.mrf.mxu1  ;;  %v4245_v62 = vadd.f32 %v1556_v18, %v4149_v34  ;;  %v2293_v34 = vsel %vm323_vm1, %v2257_v25, 0  ;;  %v2244_v10 = vpop.permute.xlu2 %2243 }
 0x21b   : > { %v4248_v47 = vadd.f32 %v1569_v63, %v4152_v9  ;;  %v2240_v9 = vpop.permute.xlu0 %2239  ;;  %v2260_v31 = vsel %vm2247_vm8, %v2242_v35, %v2244_v10  ;;  %v2506_v42 = vpop.permute.xlu1 %2505 }
 0x21c   : > { %3162 = vmatmul.msk.bf16.vlgmr.msra.gmra.mxu0 %vm319_vm2, %v4156_v45  ;;  %3163 = vmatmul.msk.bf16.vlgmr.msra.gmra.mxu1 %vm319_vm2, %v4156_v45  ;;  %v2258_v4 = vsel %vm2247_vm8, %v2238_v59, %v2240_v9  ;;  %v2259_v6 = vsel %vm2247_vm8, %v2240_v9, %v2242_v35  ;;  %v2302_v32 = vsel %vm323_vm1, %v2260_v31, 0 }
 0x21d   : > { %3164 = vmatmul.msk.bf16.vlgmr.msra.gmra.mxu2 %vm319_vm2, %v4250_v53  ;;  %2392 = vmatpush.bf16.msra.mxu0 %v2284_v55  ;;  %v2296_v14 = vsel %vm323_vm1, %v2258_v4, 0  ;;  %v2299_v16 = vsel %vm323_vm1, %v2259_v6, 0 }
 0x21e   : > { %3165 = vmatmul.msk.bf16.vlgmr.msra.gmra.mxu3 %vm319_vm2, %v4250_v53  ;;  %2405 = vmatpush.bf16.msra.mxu1 %v2287_v2 }
 0x21f   : > { %2418 = vmatpush.bf16.msra.mxu2 %v2290_v3  ;;  %2431 = vmatpush.bf16.msra.mxu3 %v2293_v34 }
 0x220   : > { %v1582_v54 = vpop.f32.mrf.mxu2 }
 0x221   : > { %v1595_v33 = vpop.f32.mrf.mxu3  ;;  %v4265_v56 = vadd.f32 %v1582_v54, %v4161_v46  ;;  %v1558_v58 = vpop.f32.mrf.mxu0 }
 0x222   : > { %v4268_v45 = vadd.f32 %v1595_v33, %v4164_v15  ;;  %v1571_v61 = vpop.f32.mrf.mxu1 }
 0x223   : > { %v2246_v7 = vpop.permute.xlu0 %2245  ;;  %v2512_v21 = vpop.permute.xlu1 %2511 }
 0x224   : > { %v2261_v46 = vsel %vm2247_vm8, %v2244_v10, %v2246_v7 }
 0x225   : > { %v2305_v17 = vsel %vm323_vm1, %v2261_v46, 0 }
 0x228   : > { %v1584_v39 = vpop.f32.mrf.mxu2 }
 0x229   : > { %v1597_v11 = vpop.f32.mrf.mxu3  ;;  %v1608_v28 = vpop.f32.mrf.mxu0 }
 0x22a   : > { %v1621_v29 = vpop.f32.mrf.mxu1  ;;  %v4275_v15 = vadd.f32 %v1608_v28, %v4179_v44  ;;  %v2508_v44 = vpop.permute.xlu2 %2507  ;;  %v3326_v11 = vmov 0  }
 0x22b   : > { %v4278_v27 = vadd.f32 %v1621_v29, %v4182_v49  ;;  %v2510_v24 = vpop.permute.xlu0 %2509  ;;  %v2536_v43 = vsel %vm2535_vm9, %v2506_v42, %v2508_v44  ;;  %v2518_v34 = vpop.permute.xlu1 %2517  ;;  %3236 = vset.pattern.permute.xlu1 %v3326_v11  ;;  %2899 = vst [vmem:[%s4331_s20] sm:$0xff] %v3326_v11  ;;  %3237 = vset.pattern.permute.xlu0 %v3326_v11 }
 0x22c   : > { %3166 = vmatmul.msk.bf16.vlgmr.msrb.gmra.mxu0 %vm319_vm2, %v4250_v53  ;;  %3167 = vmatmul.msk.bf16.vlgmr.msrb.gmra.mxu1 %vm319_vm2, %v4250_v53  ;;  %v2537_v38 = vsel %vm2535_vm9, %v2508_v44, %v2510_v24  ;;  %v2554_v12 = vsel %vm323_vm1, %v2536_v43, 0 }
 0x22d   : > { %3168 = vmatmul.msk.bf16.vlgmr.msrb.gmra.mxu2 %vm319_vm2, %v4250_v53  ;;  %2444 = vmatpush.bf16.msrb.mxu0 %v2296_v14  ;;  %v2557_v8 = vsel %vm323_vm1, %v2537_v38, 0 }
 0x22e   : > { %3169 = vmatmul.msk.bf16.vlgmr.msrb.gmra.mxu3 %vm319_vm2, %v4250_v53  ;;  %2457 = vmatpush.bf16.msrb.mxu1 %v2299_v16 }
 0x22f   : > { %2470 = vmatpush.bf16.msrb.mxu2 %v2302_v32  ;;  %2483 = vmatpush.bf16.msrb.mxu3 %v2305_v17 }
 0x230   : > { %v1740_v49 = vpop.f32.mrf.mxu2 }
 0x231   : > { %v1753_v48 = vpop.f32.mrf.mxu3  ;;  %v4293_v30 = vadd.f32 %v1740_v49, %v4189_v5  ;;  %v1610_v26 = vpop.f32.mrf.mxu0  ;;  %v2538_v5 = vsel %vm2535_vm9, %v2510_v24, %v2512_v21 }
 0x232   : > { %v4296_v19 = vadd.f32 %v1753_v48, %v4192_v60  ;;  %v1623_v22 = vpop.f32.mrf.mxu1  ;;  %v2514_v52 = vpop.permute.xlu2 %2513  ;;  %v2560_v18 = vsel %vm323_vm1, %v2538_v5, 0 }
 0x233   : > { %v2539_v40 = vsel %vm2535_vm9, %v2512_v21, %v2514_v52 }
 0x234   : > { %v2563_v63 = vsel %vm323_vm1, %v2539_v40, 0 }
 0x238   : > { %v1742_v20 = vpop.f32.mrf.mxu2 }
 0x239   : > { %v1755_v37 = vpop.f32.mrf.mxu3  ;;  %v1766_v23 = vpop.f32.mrf.mxu0  ;;  %v4367_v20 = vld [vmem:[#allocation2 + $0x20] sm:$0xf] }
 0x23a   : > { %v1779_v59 = vpop.f32.mrf.mxu1  ;;  %v4303_v60 = vadd.f32 %v1766_v23, %v4207_v13  ;;  %v2516_v13 = vpop.permute.xlu0 %2515 }
 0x23b   : > { %v4306_v57 = vadd.f32 %v1779_v59, %v4210_v1  ;;  %v2520_v9 = vpop.permute.xlu2 %2519  ;;  %v2541_v61 = vsel %vm2535_vm9, %v2516_v13, %v2518_v34 }
 0x23c   : > { %3170 = vmatmul.msk.bf16.vlgmr.msra.gmra.mxu0 %vm319_vm2, %v4250_v53  ;;  %3171 = vmatmul.msk.bf16.vlgmr.msra.gmra.mxu1 %vm319_vm2, %v4250_v53  ;;  %v2542_v7 = vsel %vm2535_vm9, %v2518_v34, %v2520_v9  ;;  %v2569_v29 = vsel %vm323_vm1, %v2541_v61, 0 }
 0x23d   : > { %3172 = vmatmul.msk.bf16.vlgmr.msra.gmra.mxu2 %vm319_vm2, %v4250_v53  ;;  %2602 = vmatpush.bf16.msra.mxu0 %v2554_v12  ;;  %v2572_v31 = vsel %vm323_vm1, %v2542_v7, 0 }
 0x23e   : > { %3173 = vmatmul.msk.bf16.vlgmr.msra.gmra.mxu3 %vm319_vm2, %v4250_v53  ;;  %2615 = vmatpush.bf16.msra.mxu1 %v2557_v8 }
 0x23f   : > { %2628 = vmatpush.bf16.msra.mxu2 %v2560_v18  ;;  %2641 = vmatpush.bf16.msra.mxu3 %v2563_v63 }
 0x240   : > { %v1792_v1 = vpop.f32.mrf.mxu2 }
 0x241   : > { %v1805_v0 = vpop.f32.mrf.mxu3  ;;  %v4321_v25 = vadd.f32 %v1792_v1, %v4217_v41  ;;  %v1768_v2 = vpop.f32.mrf.mxu0  ;;  %v2540_v41 = vsel %vm2535_vm9, %v2514_v52, %v2516_v13 }
 0x242   : > { %v4324_v55 = vadd.f32 %v1805_v0, %v4220_v51  ;;  %v1781_v3 = vpop.f32.mrf.mxu1  ;;  %v2522_v54 = vpop.permute.xlu0 %2521  ;;  %v2791_v51 = vld [vmem:[#allocation4] sm:$0xff]  ;;  %v2566_v28 = vsel %vm323_vm1, %v2540_v41, 0 }
 0x243   : > { %v2543_v39 = vsel %vm2535_vm9, %v2520_v9, %v2522_v54  ;;  %2794 = vperm.xlu1 %3236, %v2791_v51   ;;  %v2526_v44 = vpop.permute.xlu2 %2525 }
 0x244   : > { %v2575_v46 = vsel %vm323_vm1, %v2543_v39, 0 }
 0x248   : > { %v1794_v33 = vpop.f32.mrf.mxu2 }
 0x249   : > { %v1807_v58 = vpop.f32.mrf.mxu3  ;;  %v1818_v10 = vpop.f32.mrf.mxu0 }
 0x24a   : > { %v1831_v35 = vpop.f32.mrf.mxu1  ;;  %v4342_v4 = vadd.f32 %v1818_v10, %v4235_v50  ;;  %v2524_v50 = vpop.permute.xlu1 %2523 }
 0x24b   : > { %v4345_v6 = vadd.f32 %v1831_v35, %v4238_v36  ;;  %v2528_v48 = vpop.permute.xlu0 %2527  ;;  %v2544_v22 = vsel %vm2535_vm9, %v2522_v54, %v2524_v50  ;;  %v2545_v24 = vsel %vm2535_vm9, %v2524_v50, %v2526_v44  ;;  %v2532_v63 = vpop.permute.xlu2 %2531 }
 0x24c   : > { %3174 = vmatmul.msk.bf16.vlgmr.msrb.gmra.mxu0 %vm319_vm2, %v4250_v53  ;;  %3175 = vmatmul.msk.bf16.vlgmr.msrb.gmra.mxu1 %vm319_vm2, %v4250_v53  ;;  %v2578_v38 = vsel %vm323_vm1, %v2544_v22, 0  ;;  %v2581_v23 = vsel %vm323_vm1, %v2545_v24, 0 }
 0x24d   : > { %3176 = vmatmul.msk.bf16.vlgmr.msrb.gmra.mxu2 %vm319_vm2, %v4250_v53  ;;  %2654 = vmatpush.bf16.msrb.mxu0 %v2566_v28 }
 0x24e   : > { %3177 = vmatmul.msk.bf16.vlgmr.msrb.gmra.mxu3 %vm319_vm2, %v4250_v53  ;;  %2667 = vmatpush.bf16.msrb.mxu1 %v2569_v29 }
 0x24f   : > { %2680 = vmatpush.bf16.msrb.mxu2 %v2572_v31  ;;  %2693 = vmatpush.bf16.msrb.mxu3 %v2575_v46 }
 0x250   : > { %v1844_v36 = vpop.f32.mrf.mxu2 }
 0x251   : > { %v1857_v14 = vpop.f32.mrf.mxu3  ;;  %v4360_v16 = vadd.f32 %v1844_v36, %v4245_v62  ;;  %v1820_v17 = vpop.f32.mrf.mxu0  ;;  %v2546_v62 = vsel %vm2535_vm9, %v2526_v44, %v2528_v48 }
 0x252   : > { %v4363_v32 = vadd.f32 %v1857_v14, %v4248_v47  ;;  %v1833_v42 = vpop.f32.mrf.mxu1  ;;  %v2530_v49 = vpop.permute.xlu1 %2529  ;;  %v2584_v59 = vsel %vm323_vm1, %v2546_v62, 0 }
 0x253   : > { %v2547_v47 = vsel %vm2535_vm9, %v2528_v48, %v2530_v49  ;;  %v2534_v13 = vpop.permute.xlu0 %2533  ;;  %v2548_v2 = vsel %vm2535_vm9, %v2530_v49, %v2532_v63 }
 0x254   : > { %v2587_v5 = vsel %vm323_vm1, %v2547_v47, 0  ;;  %v2549_v3 = vsel %vm2535_vm9, %v2532_v63, %v2534_v13  ;;  %vm2966_vm9 = vcmask 1043808  }
 0x258   : > { %v1846_v26 = vpop.f32.mrf.mxu2 }
 0x259   : > { %v1859_v53 = vpop.f32.mrf.mxu3  ;;  %v1870_v21 = vpop.f32.mrf.mxu0 }
 0x25a   : > { %v1883_v52 = vpop.f32.mrf.mxu1  ;;  %v4372_v37 = vadd.f32 %v1870_v21, %v4265_v56 }
 0x25b   : > { %v4375_v43 = vadd.f32 %v1883_v52, %v4268_v45 }
 0x25c   : > { %3178 = vmatmul.msk.bf16.vlgmr.msra.gmra.mxu0 %vm319_vm2, %v4367_v20  ;;  %3179 = vmatmul.msk.bf16.vlgmr.msra.gmra.mxu1 %vm319_vm2, %v4367_v20 }
 0x25d   : > { %3180 = vmatmul.msk.bf16.vlgmr.msra.gmra.mxu2 %vm319_vm2, %v4367_v20  ;;  %2706 = vmatpush.bf16.msra.mxu0 %v2578_v38 }
 0x25e   : > { %3181 = vmatmul.msk.bf16.vlgmr.msra.gmra.mxu3 %vm319_vm2, %v4367_v20  ;;  %2719 = vmatpush.bf16.msra.mxu1 %v2581_v23 }
 0x25f   : > { %2732 = vmatpush.bf16.msra.mxu2 %v2584_v59  ;;  %2745 = vmatpush.bf16.msra.mxu3 %v2587_v5 }
 0x260   : > { %v1896_v56 = vpop.f32.mrf.mxu2 }
 0x261   : > { %v1909_v45 = vpop.f32.mrf.mxu3  ;;  %v1925_v40 = vadd.f32 %v1896_v56, %v4275_v15  ;;  %v1872_v8 = vpop.f32.mrf.mxu0  ;;  %v2590_v15 = vsel %vm323_vm1, %v2548_v2, 0 }
 0x262   : > { %v1926_v12 = vadd.f32 %v1909_v45, %v4278_v27  ;;  %v1885_v18 = vpop.f32.mrf.mxu1  ;;  %v2593_v27 = vsel %vm323_vm1, %v2549_v3, 0 }
 0x268   : > { %v1898_v1 = vpop.f32.mrf.mxu2 }
 0x269   : > { %v1911_v0 = vpop.f32.mrf.mxu3  ;;  %v2028_v34 = vpop.f32.mrf.mxu0 }
 0x26a   : > { %v2041_v9 = vpop.f32.mrf.mxu1  ;;  %v4394_v54 = vadd.f32 %v2028_v34, %v4293_v30 }
 0x26b   : > { %v4397_v33 = vadd.f32 %v2041_v9, %v4296_v19 }
 0x26c   : > { %3182 = vmatmul.msk.bf16.vlgmr.msrb.gmra.mxu0 %vm319_vm2, %v4367_v20  ;;  %3183 = vmatmul.msk.bf16.vlgmr.msrb.gmra.mxu1 %vm319_vm2, %v4367_v20 }
 0x26d   : > { %3184 = vmatmul.msk.bf16.vlgmr.msrb.gmra.mxu2 %vm319_vm2, %v4367_v20  ;;  %2758 = vmatpush.bf16.msrb.mxu0 %v2590_v15 }
 0x26e   : > { %3185 = vmatmul.msk.bf16.vlgmr.msrb.gmra.mxu3 %vm319_vm2, %v4367_v20  ;;  %2771 = vmatpush.bf16.msrb.mxu1 %v2593_v27 }
 0x270   : > { %v2054_v30 = vpop.f32.mrf.mxu2 }
 0x271   : > { %v2067_v19 = vpop.f32.mrf.mxu3  ;;  %v4410_v58 = vadd.f32 %v2054_v30, %v4303_v60  ;;  %v2030_v61 = vpop.f32.mrf.mxu0 }
 0x272   : > { %v4413_v41 = vadd.f32 %v2067_v19, %v4306_v57  ;;  %v2043_v51 = vpop.f32.mrf.mxu1 }
 0x278   : > { %v2056_v10 = vpop.f32.mrf.mxu2 }
 0x279   : > { %v2069_v35 = vpop.f32.mrf.mxu3  ;;  %v2080_v7 = vpop.f32.mrf.mxu0 }
 0x27a   : > { %v2093_v39 = vpop.f32.mrf.mxu1  ;;  %v4416_v28 = vadd.f32 %v2080_v7, %v4321_v25 }
 0x27b   : > { %v4419_v29 = vadd.f32 %v2093_v39, %v4324_v55 }
 0x27c   : > { %3186 = vmatmul.msk.bf16.vlgmr.msra.gmra.mxu0 %vm319_vm2, %v4367_v20  ;;  %3187 = vmatmul.msk.bf16.vlgmr.msra.gmra.mxu1 %vm319_vm2, %v4367_v20 }
 0x27d   : > { %3188 = vmatmul.msk.bf16.vlgmr.msra.gmra.mxu2 %vm319_vm2, %v4367_v20 }
 0x27e   : > { %3189 = vmatmul.msk.bf16.vlgmr.msra.gmra.mxu3 %vm319_vm2, %v4367_v20 }
 0x280   : > { %v2106_v60 = vpop.f32.mrf.mxu2 }
 0x281   : > { %v2119_v57 = vpop.f32.mrf.mxu3  ;;  %v4430_v25 = vadd.f32 %v2106_v60, %v4342_v4  ;;  %v2082_v31 = vpop.f32.mrf.mxu0 }
 0x282   : > { %v4433_v55 = vadd.f32 %v2119_v57, %v4345_v6  ;;  %v2095_v46 = vpop.f32.mrf.mxu1 }
 0x288   : > { %v2108_v50 = vpop.f32.mrf.mxu2 }
 0x289   : > { %v2121_v36 = vpop.f32.mrf.mxu3  ;;  %v2132_v14 = vpop.f32.mrf.mxu0  ;;  %v4482_v50 = vld [vmem:[%s4567_s3] sm:$0xff] }
 0x28a   : > { %v2145_v17 = vpop.f32.mrf.mxu1  ;;  %v4436_v42 = vadd.f32 %v2132_v14, %v4360_v16 }
 0x28b   : > { %v4439_v44 = vadd.f32 %v2145_v17, %v4363_v32  ;;  %v2857_v17 = vperm.slane %v4482_v50, 0 }
 0x28c   : > { %3190 = vmatmul.msk.bf16.vlgmr.msrb.gmra.mxu0 %vm319_vm2, %v4367_v20  ;;  %3191 = vmatmul.msk.bf16.vlgmr.msrb.gmra.mxu1 %vm319_vm2, %v4367_v20 }
 0x290   : > { %v2158_v4 = vpop.f32.mrf.mxu2 }
 0x291   : > { %v2171_v6 = vpop.f32.mrf.mxu3  ;;  %v4446_v49 = vadd.f32 %v2158_v4, %v4372_v37  ;;  %v2134_v26 = vpop.f32.mrf.mxu0 }
 0x292   : > { %v4449_v48 = vadd.f32 %v2171_v6, %v4375_v43  ;;  %v2147_v16 = vpop.f32.mrf.mxu1 }
 0x298   : > { %v2160_v53 = vpop.f32.mrf.mxu2 }
 0x299   : > { %v2173_v22 = vpop.f32.mrf.mxu3  ;;  %v2184_v32 = vpop.f32.mrf.mxu0 }
 0x29a   : > { %v2197_v24 = vpop.f32.mrf.mxu1  ;;  %v4451_v21 = vadd.f32 %v2184_v32, %v1925_v40 }
 0x29b   : > { %v4453_v52 = vadd.f32 %v2197_v24, %v1926_v12 }
 0x2a0   : > { %v2316_v62 = vpop.f32.mrf.mxu2 }
 0x2a1   : > { %v2329_v20 = vpop.f32.mrf.mxu3  ;;  %v2186_v47 = vpop.f32.mrf.mxu0  ;;  %v2489_v10 = vadd.f32 %v2316_v62, %v4394_v54  ;;  %v2858_v54 = vperm.slane %v4482_v50, 1 }
 0x2a2   : > { %v2199_v38 = vpop.f32.mrf.mxu1  ;;  %v2490_v35 = vadd.f32 %v2329_v20, %v4397_v33 }
 0x2a8   : > { %v2318_v23 = vpop.f32.mrf.mxu2 }
 0x2a9   : > { %v2331_v37 = vpop.f32.mrf.mxu3  ;;  %v2342_v59 = vpop.f32.mrf.mxu0 }
 0x2aa   : > { %v2355_v5 = vpop.f32.mrf.mxu1  ;;  %v2491_v6 = vadd.f32 %v2342_v59, %v4410_v58  ;;  %v2860_v58 = vperm.slane %v4482_v50, 3 }
 0x2ab   : > { %v2492_v26 = vadd.f32 %v2355_v5, %v4413_v41 }
 0x2b0   : > { %v4455_v43 = vpop.f32.mrf.mxu2 }
 0x2b1   : > { %v4457_v56 = vpop.f32.mrf.mxu3  ;;  %v2344_v45 = vpop.f32.mrf.mxu0 }
 0x2b2   : > { %v2357_v8 = vpop.f32.mrf.mxu1 }
 0x2b5   : > { %v4475_v51 = vpop.permute.xlu1 %2794 }
 0x2b8   : > { %v2370_v18 = vpop.f32.mrf.mxu2 }
 0x2b9   : > { %v2383_v63 = vpop.f32.mrf.mxu3  ;;  %v4459_v40 = vpop.f32.mrf.mxu0  ;;  %v2859_v18 = vperm.slane %v4482_v50, 2 }
 0x2ba   : > { %v4461_v12 = vpop.f32.mrf.mxu1 }
 0x2c0   : > { %v4463_v13 = vpop.f32.mrf.mxu2 }
 0x2c1   : > { %v4465_v1 = vpop.f32.mrf.mxu3  ;;  %v2396_v0 = vpop.f32.mrf.mxu0 }
 0x2c2   : > { %v2409_v2 = vpop.f32.mrf.mxu1  ;;  %v2493_v0 = vadd.f32 %v4455_v43, %v4416_v28  ;;  %v2861_v28 = vperm.slane %v4482_v50, 4  ;;  %v2862_v43 = vperm.slane %v4482_v50, 5 }
 0x2c3   : > { %v2494_v2 = vadd.f32 %v4457_v56, %v4419_v29 }
 0x2c8   : > { %v2422_v3 = vpop.f32.mrf.mxu2 }
 0x2c9   : > { %v2435_v34 = vpop.f32.mrf.mxu3  ;;  %v4467_v9 = vpop.f32.mrf.mxu0 }
 0x2ca   : > { %v4469_v15 = vpop.f32.mrf.mxu1 }
 0x2d0   : > { %v4471_v27 = vpop.f32.mrf.mxu2 }
 0x2d1   : > { %v4473_v30 = vpop.f32.mrf.mxu3  ;;  %v2448_v19 = vpop.f32.mrf.mxu0 }
 0x2d2   : > { %v2461_v61 = vpop.f32.mrf.mxu1 }
 0x2d8   : > { %v2474_v7 = vpop.f32.mrf.mxu2 }
 0x2d9   : > { %v2487_v39 = vpop.f32.mrf.mxu3  ;;  %v2604_v60 = vpop.f32.mrf.mxu0 }
 0x2da   : > { %v2617_v57 = vpop.f32.mrf.mxu1  ;;  %v2777_v31 = vadd.f32 %v2604_v60, %v2489_v10 }
 0x2db   : > { %v2778_v46 = vadd.f32 %v2617_v57, %v2490_v35 }
 0x2dc   : > { %v2797_v36 = vadd.f32 %v4475_v51, %v2777_v31 }
 0x2dd   : > { %v2798_v14 = vadd.f32 %v4475_v51, %v2778_v46  ;;  %v2495_v46 = vadd.f32 %v4459_v40, %v4430_v25  ;;  %v2863_v25 = vperm.slane %v4482_v50, 6  ;;  %v2864_v40 = vperm.slane %v4482_v50, 7 }
 0x2de   : > { %vm2811_vm10 = vcmp.gt.f32.partialorder %v2797_v36, 0.0  ;;  %v2825_v33 = vmul.f32 0.01, %v2797_v36 }
 0x2df   : > { %vm2812_vm11 = vcmp.gt.f32.partialorder %v2798_v14, 0.0  ;;  %v2826_v4 = vmul.f32 0.01, %v2798_v14 }
 0x2e0   : > { %v2630_v16 = vpop.f32.mrf.mxu2  ;;  %v2839_v22 = vsel %vm2811_vm10, %v2797_v36, %v2825_v33  ;;  %v2496_v36 = vadd.f32 %v4461_v12, %v4433_v55  ;;  %vm2967_vm10 = vcmask 1047556  }
 0x2e1   : > { %v2643_v53 = vpop.f32.mrf.mxu3  ;;  %v2840_v32 = vsel %vm2812_vm11, %v2798_v14, %v2826_v4  ;;  %v2779_v24 = vadd.f32 %v2630_v16, %v2491_v6  ;;  %v2606_v20 = vpop.f32.mrf.mxu0  ;;  %v2885_v38 = vmul.f32 %v2857_v17, %v2839_v22  ;;  %vm2943_vm11 = vcmask 359424  }
 0x2e2   : > { %v2780_v62 = vadd.f32 %v2643_v53, %v2492_v26  ;;  %v2619_v47 = vpop.f32.mrf.mxu1  ;;  %v2886_v23 = vmul.f32 %v2858_v54, %v2840_v32 }
 0x2e3   : > { %v2799_v37 = vadd.f32 %v4475_v51, %v2779_v24 }
 0x2e4   : > { %v2800_v45 = vadd.f32 %v4475_v51, %v2780_v62  ;;  %v2908_v8 = vpack.c.bf16 %v2886_v23, %v2885_v38  ;;  %v2497_v38 = vadd.f32 %v4463_v13, %v4436_v42  ;;  %v2498_v23 = vadd.f32 %v4465_v1, %v4439_v44 }
 0x2e5   : > { %vm2813_vm12 = vcmp.gt.f32.partialorder %v2799_v37, 0.0  ;;  %v2827_v41 = vmul.f32 0.01, %v2799_v37 }
 0x2e6   : > { %vm2814_vm13 = vcmp.gt.f32.partialorder %v2800_v45, 0.0  ;;  %v2828_v59 = vmul.f32 0.01, %v2800_v45  ;;  %2922 = vrot.lane.b32.xlu2 %v2908_v8, %s3327_s22 }
 0x2e7   : > { %v2841_v5 = vsel %vm2813_vm12, %v2799_v37, %v2827_v41  ;;  %vm2968_vm12 = vmor %vm2967_vm10, %vm2966_vm9 }
 0x2e8   : > { %v2842_v63 = vsel %vm2814_vm13, %v2800_v45, %v2828_v59  ;;  %v2632_v3 = vpop.f32.mrf.mxu2  ;;  %v2887_v19 = vmul.f32 %v2859_v18, %v2841_v5  ;;  %vm2906_vm13 = vcmask 814080  }
 0x2e9   : > { %v2645_v34 = vpop.f32.mrf.mxu3  ;;  %v2888_v61 = vmul.f32 %v2860_v58, %v2842_v63  ;;  %v2656_v10 = vpop.f32.mrf.mxu0  ;;  %v2854_v63 = vld [vmem:[%s4567_s3 + $0x8] sm:$0x3f]  ;;  %v2499_v3 = vadd.f32 %v4467_v9, %v4446_v49  ;;  %2907 = vst.msk [vmem:[%s4331_s20 + $0x38] sm:$0xf] %vm2906_vm13, %v3326_v11 }
 0x2ea   : > { %v2669_v35 = vpop.f32.mrf.mxu1  ;;  %v2781_v7 = vadd.f32 %v2656_v10, %v2493_v0  ;;  %v2865_v44 = vperm.slane %v2854_v63, 0  ;;  %v2866_v13 = vperm.slane %v2854_v63, 1  ;;  %v2500_v34 = vadd.f32 %v4469_v15, %v4449_v48 }
 0x2eb   : > { %v2782_v39 = vadd.f32 %v2669_v35, %v2494_v2  ;;  %v2909_v60 = vpack.c.bf16 %v2888_v61, %v2887_v19  ;;  %v2868_v49 = vperm.slane %v2854_v63, 3 }
 0x2ec   : > { %v2801_v57 = vadd.f32 %v4475_v51, %v2781_v7 }
 0x2ed   : > { %v2802_v31 = vadd.f32 %v4475_v51, %v2782_v39  ;;  %2924 = vrot.lane.b32.xlu0 %v2909_v60, %s3327_s22 }
 0x2ee   : > { %vm2815_vm14 = vcmp.gt.f32.partialorder %v2801_v57, 0.0  ;;  %v2829_v29 = vmul.f32 0.01, %v2801_v57 }
 0x2ef   : > { %vm2816_vm15 = vcmp.gt.f32.partialorder %v2802_v31, 0.0  ;;  %v2830_v56 = vmul.f32 0.01, %v2802_v31 }
 0x2f0   : > { %v2682_v14 = vpop.f32.mrf.mxu2  ;;  %v2843_v54 = vsel %vm2815_vm14, %v2801_v57, %v2829_v29  ;;  %vm2976_vm14 = vcmask 117760  }
 0x2f1   : > { %v2695_v17 = vpop.f32.mrf.mxu3  ;;  %v2844_v33 = vsel %vm2816_vm15, %v2802_v31, %v2830_v56  ;;  %v2783_v4 = vadd.f32 %v2682_v14, %v2495_v46  ;;  %v2658_v26 = vpop.f32.mrf.mxu0  ;;  %v2889_v53 = vmul.f32 %v2861_v28, %v2843_v54  ;;  %v2867_v46 = vperm.slane %v2854_v63, 2 }
 0x2f2   : > { %v2784_v6 = vadd.f32 %v2695_v17, %v2496_v36  ;;  %v2671_v16 = vpop.f32.mrf.mxu1  ;;  %v2890_v22 = vmul.f32 %v2862_v43, %v2844_v33  ;;  %v2501_v14 = vadd.f32 %v4471_v27, %v4451_v21  ;;  %v2502_v17 = vadd.f32 %v4473_v30, %v4453_v52 }
 0x2f3   : > { %v2803_v32 = vadd.f32 %v4475_v51, %v2783_v4  ;;  %v2870_v21 = vperm.slane %v2854_v63, 5 }
 0x2f4   : > { %v2804_v24 = vadd.f32 %v4475_v51, %v2784_v6  ;;  %v2910_v62 = vpack.c.bf16 %v2890_v22, %v2889_v53 }
 0x2f5   : > { %vm2817_vm0 = vcmp.gt.f32.partialorder %v2803_v32, 0.0  ;;  %v2831_v55 = vmul.f32 0.01, %v2803_v32 }
 0x2f6   : > { %vm2818_vm2 = vcmp.gt.f32.partialorder %v2804_v24, 0.0  ;;  %v2832_v12 = vmul.f32 0.01, %v2804_v24  ;;  %2926 = vrot.lane.b32.xlu1 %v2910_v62, %s3327_s22 }
 0x2f7   : > { %v2845_v20 = vsel %vm2817_vm0, %v2803_v32, %v2831_v55 }
 0x2f8   : > { %v2846_v47 = vsel %vm2818_vm2, %v2804_v24, %v2832_v12  ;;  %v2684_v37 = vpop.f32.mrf.mxu2  ;;  %v2891_v8 = vmul.f32 %v2863_v25, %v2845_v20  ;;  %v2869_v25 = vperm.slane %v2854_v63, 4 }
 0x2f9   : > { %v2697_v45 = vpop.f32.mrf.mxu3  ;;  %v2892_v18 = vmul.f32 %v2864_v40, %v2846_v47  ;;  %v2708_v58 = vpop.f32.mrf.mxu0 }
 0x2fa   : > { %v2721_v50 = vpop.f32.mrf.mxu1  ;;  %v2785_v41 = vadd.f32 %v2708_v58, %v2497_v38 }
 0x2fb   : > { %v2786_v59 = vadd.f32 %v2721_v50, %v2498_v23  ;;  %v2911_v5 = vpack.c.bf16 %v2892_v18, %v2891_v8 }
 0x2fc   : > { %v2805_v0 = vadd.f32 %v4475_v51, %v2785_v41 }
 0x2fd   : > { %v2806_v42 = vadd.f32 %v4475_v51, %v2786_v59  ;;  %2928 = vrot.lane.b32.xlu2 %v2911_v5, %s3327_s22 }
 0x2fe   : > { %vm2819_vm3 = vcmp.gt.f32.partialorder %v2805_v0, 0.0  ;;  %v2833_v1 = vmul.f32 0.01, %v2805_v0 }
 0x2ff   : > { %vm2820_vm4 = vcmp.gt.f32.partialorder %v2806_v42, 0.0  ;;  %v2834_v2 = vmul.f32 0.01, %v2806_v42 }
 0x300   : > { %v2734_v19 = vpop.f32.mrf.mxu2  ;;  %v2847_v10 = vsel %vm2819_vm3, %v2805_v0, %v2833_v1 }
 0x301   : > { %v2747_v61 = vpop.f32.mrf.mxu3  ;;  %v2848_v35 = vsel %vm2820_vm4, %v2806_v42, %v2834_v2  ;;  %v2787_v7 = vadd.f32 %v2734_v19, %v2499_v3  ;;  %v2710_v60 = vpop.f32.mrf.mxu0  ;;  %v2893_v31 = vmul.f32 %v2865_v44, %v2847_v10 }
 0x302   : > { %v2788_v39 = vadd.f32 %v2747_v61, %v2500_v34  ;;  %v2723_v57 = vpop.f32.mrf.mxu1  ;;  %v2894_v28 = vmul.f32 %v2866_v13, %v2848_v35 }
 0x303   : > { %v2807_v43 = vadd.f32 %v4475_v51, %v2787_v7 }
 0x304   : > { %v2808_v29 = vadd.f32 %v4475_v51, %v2788_v39  ;;  %v2912_v56 = vpack.c.bf16 %v2894_v28, %v2893_v31 }
 0x305   : > { %vm2821_vm5 = vcmp.gt.f32.partialorder %v2807_v43, 0.0  ;;  %v2835_v9 = vmul.f32 0.01, %v2807_v43 }
 0x306   : > { %vm2822_vm6 = vcmp.gt.f32.partialorder %v2808_v29, 0.0  ;;  %v2836_v48 = vmul.f32 0.01, %v2808_v29  ;;  %2930 = vrot.lane.b32.xlu0 %v2912_v56, %s3327_s22 }
 0x307   : > { %v2849_v15 = vsel %vm2821_vm5, %v2807_v43, %v2835_v9 }
 0x308   : > { %v2850_v36 = vsel %vm2822_vm6, %v2808_v29, %v2836_v48  ;;  %v2736_v54 = vpop.f32.mrf.mxu2  ;;  %v2895_v4 = vmul.f32 %v2867_v46, %v2849_v15 }
 0x309   : > { %v2749_v33 = vpop.f32.mrf.mxu3  ;;  %v2896_v6 = vmul.f32 %v2868_v49, %v2850_v36  ;;  %v2760_v26 = vpop.f32.mrf.mxu0 }
 0x30a   : > { %v2773_v16 = vpop.f32.mrf.mxu1  ;;  %v2789_v53 = vadd.f32 %v2760_v26, %v2501_v14 }
 0x30b   : > { %v2790_v22 = vadd.f32 %v2773_v16, %v2502_v17  ;;  %v2913_v32 = vpack.c.bf16 %v2896_v6, %v2895_v4 }
 0x30c   : > { %v2809_v24 = vadd.f32 %v4475_v51, %v2789_v53 }
 0x30d   : > { %v2810_v62 = vadd.f32 %v4475_v51, %v2790_v22  ;;  %2932 = vrot.lane.b32.xlu1 %v2913_v32, %s3327_s22 }
 0x30e   : > { %vm2823_vm7 = vcmp.gt.f32.partialorder %v2809_v24, 0.0  ;;  %v2837_v27 = vmul.f32 0.01, %v2809_v24 }
 0x30f   : > { %vm2824_vm8 = vcmp.gt.f32.partialorder %v2810_v62, 0.0  ;;  %v2838_v52 = vmul.f32 0.01, %v2810_v62 }
 0x310   : > { %v2851_v30 = vsel %vm2823_vm7, %v2809_v24, %v2837_v27 }
 0x311   : > { %v2852_v40 = vsel %vm2824_vm8, %v2810_v62, %v2838_v52  ;;  %v2897_v55 = vmul.f32 %v2869_v25, %v2851_v30  ;;  %v2762_v20 = vpop.f32.mrf.mxu0 }
 0x312   : > { %v2898_v12 = vmul.f32 %v2870_v21, %v2852_v40  ;;  %v2775_v47 = vpop.f32.mrf.mxu1 }
 0x314   : > { %v2914_v38 = vpack.c.bf16 %v2898_v12, %v2897_v55 }
 0x316   : > { %2934 = vrot.lane.b32.xlu2 %v2914_v38, %s3327_s22 }
 0x340   : > { %v2923_v51 = vpop.permute.xlu2 %2922 }
 0x341   : > { %v2936_v23 = vrot.slane %v2923_v51, 4 }
 0x343   : > { %v2944_v37 = vsel %vm2943_vm11, %v2936_v23, %v2923_v51 }
 0x344   : > { %2969 = vst.msk [vmem:[%s4331_s20] sm:$0xff] %vm2968_vm12, %v2944_v37 }
 0x357   : > { %v2929_v50 = vpop.permute.xlu2 %2928 }
 0x358   : > { %v2939_v59 = vrot.slane %v2929_v50, 4 }
 0x35f   : > { %v2925_v45 = vpop.permute.xlu0 %2924 }
 0x360   : > { %v2937_v8 = vrot.slane %v2925_v45, 4 }
 0x362   : > { %v2946_v18 = vsel %vm323_vm1, %v2936_v23, %v2937_v8 }
 0x363   : > { %v2947_v58 = vsel %vm2943_vm11, %v2946_v18, %v2925_v45 }
 0x364   : > { %2970 = vst [vmem:[%s4331_s20 + $0x8] sm:$0xff] %v2947_v58 }
 0x368   : > { %v2927_v41 = vpop.permute.xlu1 %2926 }
 0x369   : > { %v2938_v5 = vrot.slane %v2927_v41, 4 }
 0x36b   : > { %v2948_v63 = vsel %vm323_vm1, %v2937_v8, %v2938_v5  ;;  %v2950_v0 = vsel %vm323_vm1, %v2938_v5, %v2939_v59 }
 0x36c   : > { %v2949_v42 = vsel %vm2943_vm11, %v2948_v63, %v2927_v41  ;;  %v2951_v11 = vsel %vm2943_vm11, %v2950_v0, %v2929_v50 }
 0x36d   : > { %2971 = vst [vmem:[%s4331_s20 + $0x10] sm:$0xff] %v2949_v42 }
 0x36e   : > { %2972 = vst [vmem:[%s4331_s20 + $0x18] sm:$0xff] %v2951_v11 }
 0x370   : > { %v2935_v44 = vpop.permute.xlu2 %2934 }
 0x371   : > { %v2942_v13 = vrot.slane %v2935_v44, 4 }
 0x373   : > { %2977 = vst.msk [vmem:[%s4331_s20 + $0x38] sm:$0xf] %vm2976_vm14, %v2942_v13 }
 0x378   : > { %v2931_v1 = vpop.permute.xlu0 %2930 }
 0x379   : > { %v2940_v2 = vrot.slane %v2931_v1, 4 }
 0x37b   : > { %v2952_v3 = vsel %vm323_vm1, %v2939_v59, %v2940_v2 }
 0x37c   : > { %v2953_v34 = vsel %vm2943_vm11, %v2952_v3, %v2931_v1 }
 0x37d   : > { %2973 = vst [vmem:[%s4331_s20 + $0x20] sm:$0xff] %v2953_v34 }
 0x37f   : > { %v2933_v19 = vpop.permute.xlu1 %2932 }
 0x380   : > { %v2941_v61 = vrot.slane %v2933_v19, 4 }
 0x382   : > { %v2954_v10 = vsel %vm323_vm1, %v2940_v2, %v2941_v61  ;;  %v2956_v35 = vsel %vm323_vm1, %v2941_v61, %v2942_v13 }
 0x383   : > { %v2955_v7 = vsel %vm2943_vm11, %v2954_v10, %v2933_v19  ;;  %v2957_v39 = vsel %vm2943_vm11, %v2956_v35, %v2935_v44 }
 0x384   : > { %2974 = vst [vmem:[%s4331_s20 + $0x28] sm:$0xff] %v2955_v7 }
 0x385   : > { %2975 = vst [vmem:[%s4331_s20 + $0x30] sm:$0xff] %v2957_v39 }
 0x386 PF: > { %s16_s15 = sadd.s32 1, %s3312_s15  }
 0x387   : > { %p13_p7 = scmp.ge.s32.totalorder %s16_s15, 4  }
 0x389   :  { %15 = sbr.rel (!%p13_p7) target bundleno = 2 (0x2), region = 83 }
 0x38e   :  { %2999 = vsyncpa [#allocation3], 1 }
 0x38f   :  { %3001 = vsyncpa [#allocation3 + $0x1], 1 }
 0x390   :  { %3002 = vsyncpa [#allocation5], 1 }

</bundles_post_ra>
